<compile_context>
chip_gen: v7x
topology: tpu7x:2x2x1
jax: 0.10.0
libtpu: 0.0.40
codegen_flags: <defaults>
</compile_context>

<pallas_src>
import functools

import jax
import jax.numpy as jnp
from jax.experimental import pallas as pl
from jax.experimental.pallas import tpu as pltpu

# Left pad (in columns) of the conv scratch so the interior store lands at a
# sublane-aligned offset (multiple of 8); tap reads use offsets P-1 .. P+1.
_SUBLANE_PAD = 8


def _layernorm(x, g, b):
    mean = jnp.mean(x, axis=-1, keepdims=True)
    var = jnp.mean(jnp.square(x - mean), axis=-1, keepdims=True)
    return (x - mean) * jax.lax.rsqrt(var + 1e-5) * g + b


# --------------------------- fused attention block ---------------------------

def _attn_block_kernel(x_ref, ln_g_ref, ln_b_ref, dww_ref, dws_ref,
                       pww_ref, pwb_ref, ow_ref, ob_ref, o_ref, xp_ref,
                       *, heads, dim_head, img_size, scale):
    """One batch element: x + ConvAttention(LayerNorm(x)), fully fused in VMEM."""
    N, D = x_ref.shape[1], x_ref.shape[2]
    H = W = img_size
    P = _SUBLANE_PAD

    x = x_ref[0].astype(jnp.float32)                       # (N, D)
    h = _layernorm(x, ln_g_ref[...], ln_b_ref[...])        # (N, D)

    # ---- zero-padded image in VMEM scratch ("same" padding for the 3x3 stencil)
    xp_ref[...] = jnp.zeros(xp_ref.shape, jnp.float32)
    xp_ref[1:H + 1, P:P + W, :] = h.reshape(H, W, D)       # sublane-aligned store
    xp = xp_ref[...]                                       # (H+2, W+2P, D)

    # ---- 3x3 depthwise convs for q/k/v in one stencil pass (BN folded in)
    dww = dww_ref[...]                                     # (3, 3, 3, D)
    dws = dws_ref[...]                                     # (3, D)
    acc_q = jnp.zeros((H, W, D), jnp.float32)
    acc_k = jnp.zeros((H, W, D), jnp.float32)
    acc_v = jnp.zeros((H, W, D), jnp.float32)
    for di in range(3):
        for dj in range(3):
            xs = xp[di:di + H, P - 1 + dj:P - 1 + dj + W, :]   # (H, W, D)
            acc_q = acc_q + xs * dww[0, di, dj, :]
            acc_k = acc_k + xs * dww[1, di, dj, :]
            acc_v = acc_v + xs * dww[2, di, dj, :]
    aq = acc_q.reshape(N, D) + dws[0]
    ak = acc_k.reshape(N, D) + dws[1]
    av = acc_v.reshape(N, D) + dws[2]

    # ---- 1x1 pointwise convs (matmuls); q/k/v never leave VMEM
    pwb = pwb_ref[...]                                     # (3, inner)
    q = jnp.dot(aq, pww_ref[0], preferred_element_type=jnp.float32) + pwb[0]
    k = jnp.dot(ak, pww_ref[1], preferred_element_type=jnp.float32) + pwb[1]
    v = jnp.dot(av, pww_ref[2], preferred_element_type=jnp.float32) + pwb[2]

    # ---- multi-head attention in (n, h*d) layout; fold the out-projection per
    #      head so the accumulator stays D-lane-dense (no lane concat/transpose)
    ow = ow_ref[...]                                       # (inner, D)
    y = jnp.zeros((N, D), jnp.float32)
    for hd in range(heads):
        lo = hd * dim_head
        hi = lo + dim_head
        qh = q[:, lo:hi]
        kh = k[:, lo:hi]
        vh = v[:, lo:hi]
        # q @ k^T contracting the last axis of both (no materialised transpose)
        dots = jax.lax.dot_general(qh, kh, (((1,), (1,)), ((), ())),
                                   preferred_element_type=jnp.float32) * scale
        dots = dots - jnp.max(dots, axis=-1, keepdims=True)
        e = jnp.exp(dots)
        p = e * pl.reciprocal(jnp.sum(e, axis=-1, keepdims=True), approx=True)
        oh = jnp.dot(p, vh, preferred_element_type=jnp.float32)           # (N, dh)
        y = y + jnp.dot(oh, ow[lo:hi, :], preferred_element_type=jnp.float32)
    y = y + ob_ref[...]                                    # (1, D) bias, once

    o_ref[0] = (x + y).astype(o_ref.dtype)                 # residual fused here


# ----------------------------- fused FFN block --------------------------------

def _ffn_block_kernel(x_ref, ln_g_ref, ln_b_ref, w1_ref, b1_ref, w2_ref, b2_ref,
                      o_ref):
    """One batch element: x + FeedForward(LayerNorm(x)), fully fused in VMEM."""
    x = x_ref[0].astype(jnp.float32)
    h = _layernorm(x, ln_g_ref[...], ln_b_ref[...])
    h1 = jnp.dot(h, w1_ref[...], preferred_element_type=jnp.float32) + b1_ref[...]
    # exact (erf) GELU, matching torch.nn.GELU() default
    h1 = 0.5 * h1 * (1.0 + jax.lax.erf(h1 * 0.7071067811865476))
    h2 = jnp.dot(h1, w2_ref[...], preferred_element_type=jnp.float32) + b2_ref[...]
    o_ref[0] = (x + h2).astype(o_ref.dtype)                # residual fused here


# ------------------------------- wrappers --------------------------------------

def _full_spec(arr):
    nd = arr.ndim
    return pl.BlockSpec(arr.shape, lambda b, _nd=nd: (0,) * _nd)


def conv_attention_block(x, layer, *, img_size, heads, dim_head):
    B, N, D = x.shape
    kernel = functools.partial(_attn_block_kernel, heads=heads, dim_head=dim_head,
                               img_size=img_size, scale=dim_head ** -0.5)
    weights = (layer["ln1_g"], layer["ln1_b"], layer["dw_w"], layer["dw_shift"],
               layer["pw_w"], layer["pw_b"], layer["out_w"], layer["out_b"])
    tok_spec = pl.BlockSpec((1, N, D), lambda b: (b, 0, 0))
    return pl.pallas_call(
        kernel,
        out_shape=jax.ShapeDtypeStruct((B, N, D), x.dtype),
        grid=(B,),
        in_specs=[tok_spec] + [_full_spec(w) for w in weights],
        out_specs=tok_spec,
        scratch_shapes=[pltpu.VMEM(
            (img_size + 2, img_size + 2 * _SUBLANE_PAD, D), jnp.float32)],
        compiler_params=pltpu.CompilerParams(dimension_semantics=("parallel",)),
    )(x, *weights)


def feedforward_block(x, layer):
    B, N, D = x.shape
    weights = (layer["ln2_g"], layer["ln2_b"], layer["ff_w1"], layer["ff_b1"],
               layer["ff_w2"], layer["ff_b2"])
    tok_spec = pl.BlockSpec((1, N, D), lambda b: (b, 0, 0))
    return pl.pallas_call(
        _ffn_block_kernel,
        out_shape=jax.ShapeDtypeStruct((B, N, D), x.dtype),
        grid=(B,),
        in_specs=[tok_spec] + [_full_spec(w) for w in weights],
        out_specs=tok_spec,
        compiler_params=pltpu.CompilerParams(dimension_semantics=("parallel",)),
    )(x, *weights)


# ------------------------------- parameters ------------------------------------

def init_params(key, dim, heads, dim_head, mlp_dim, depth):
    inner = heads * dim_head
    eps = 1e-5

    def nrm(k, shape, std=0.02):
        return std * jax.random.normal(k, shape, jnp.float32)

    params = []
    for l in range(depth):
        ks = jax.random.split(jax.random.fold_in(key, l), 24)
        it = iter(range(24))
        dw_w, dw_shift, pw_w, pw_b = [], [], [], []
        for _ in range(3):  # q, k, v branches of the SepConv2d projections
            w = nrm(ks[next(it)], (3, 3, dim))               # (kh, kw, C)
            b = nrm(ks[next(it)], (dim,))
            bn_g = 1.0 + nrm(ks[next(it)], (dim,))
            bn_b = nrm(ks[next(it)], (dim,))
            # eval-mode BN (running_mean=0, running_var=1) folded into the conv
            s = bn_g / jnp.sqrt(1.0 + eps)
            dw_w.append(w * s)
            dw_shift.append(b * s + bn_b)
            pw_w.append(nrm(ks[next(it)], (dim, inner)))     # 1x1 conv as matmul
            pw_b.append(nrm(ks[next(it)], (inner,)))
        layer = {
            "ln1_g": jnp.ones((1, dim), jnp.float32),
            "ln1_b": jnp.zeros((1, dim), jnp.float32),
            "dw_w": jnp.stack(dw_w),                         # (3, 3, 3, dim)
            "dw_shift": jnp.stack(dw_shift),                 # (3, dim)
            "pw_w": jnp.stack(pw_w),                         # (3, dim, inner)
            "pw_b": jnp.stack(pw_b),                         # (3, inner)
            "out_w": nrm(ks[next(it)], (inner, dim)),
            "out_b": nrm(ks[next(it)], (dim,))[None, :],
            "ln2_g": jnp.ones((1, dim), jnp.float32),
            "ln2_b": jnp.zeros((1, dim), jnp.float32),
            "ff_w1": nrm(ks[next(it)], (dim, mlp_dim)),
            "ff_b1": nrm(ks[next(it)], (mlp_dim,))[None, :],
            "ff_w2": nrm(ks[next(it)], (mlp_dim, dim)),
            "ff_b2": nrm(ks[next(it)], (dim,))[None, :],
        }
        params.append(layer)
    return params


# -------------------------------- forward --------------------------------------

def transformer_forward(x, params, *, img_size, heads, dim_head):
    # x: (B, N, D), N = img_size**2; last_stage=False (no cls token)
    for layer in params:
        x = conv_attention_block(x, layer, img_size=img_size,
                                 heads=heads, dim_head=dim_head)
        x = feedforward_block(x, layer)
    return x


# ---------------------------------- main ----------------------------------------

if __name__ == "__main__":
    B = 2
    dim = 32
    img_size = 8
    depth = 2
    heads = 4
    dim_head = 8
    mlp_dim = 64
    N = img_size * img_size

    key = jax.random.PRNGKey(0)
    kx, kp = jax.random.split(key)
    x = jax.random.normal(kx, (B, N, dim), jnp.float32)
    params = init_params(kp, dim, heads, dim_head, mlp_dim, depth)

    fwd = jax.jit(functools.partial(transformer_forward,
                                    img_size=img_size, heads=heads,
                                    dim_head=dim_head))
    out = fwd(x, params)
    jax.block_until_ready(out)
    assert out.shape == (B, N, dim) and out.dtype == jnp.float32
    assert bool(jnp.all(jnp.isfinite(out)))
    # TODO(synk): BatchNorm2d is modeled in eval mode (running stats at init
    # values, folded into the depthwise conv); training-mode batch statistics
    # are not reproduced.
    print("KERNEL_OK")
</pallas_src>

<mosaic_0001>
module attributes {stable_mosaic.version = 11 : i64} {
  func.func @_ffn_block_kernel(%arg0: i32, %arg1: memref<1x64x32xf32, #tpu.memory_space<vmem>>, %arg2: memref<1x32xf32, #tpu.memory_space<vmem>>, %arg3: memref<1x32xf32, #tpu.memory_space<vmem>>, %arg4: memref<32x64xf32, #tpu.memory_space<vmem>>, %arg5: memref<1x64xf32, #tpu.memory_space<vmem>>, %arg6: memref<64x32xf32, #tpu.memory_space<vmem>>, %arg7: memref<1x32xf32, #tpu.memory_space<vmem>>, %arg8: memref<1x64x32xf32, #tpu.memory_space<vmem>>) attributes {dimension_semantics = [#tpu.dimension_semantics<parallel>], iteration_bounds = array<i64: 2>, scalar_prefetch = 0 : i64, scratch_operands = 0 : i64, tpu.core_type = #tpu.core_type<tc>, window_params = [{transform_indices = @transform_0, window_bounds = array<i64: 1, 64, 32>}, {pipeline_mode = #tpu.pipeline_mode<synchronous>, transform_indices = @transform_1, window_bounds = array<i64: 1, 32>}, {pipeline_mode = #tpu.pipeline_mode<synchronous>, transform_indices = @transform_2, window_bounds = array<i64: 1, 32>}, {pipeline_mode = #tpu.pipeline_mode<synchronous>, transform_indices = @transform_3, window_bounds = array<i64: 32, 64>}, {pipeline_mode = #tpu.pipeline_mode<synchronous>, transform_indices = @transform_4, window_bounds = array<i64: 1, 64>}, {pipeline_mode = #tpu.pipeline_mode<synchronous>, transform_indices = @transform_5, window_bounds = array<i64: 64, 32>}, {pipeline_mode = #tpu.pipeline_mode<synchronous>, transform_indices = @transform_6, window_bounds = array<i64: 1, 32>}, {transform_indices = @transform_7, window_bounds = array<i64: 1, 64, 32>}]} {
    %c0 = arith.constant 0 : index
    %c0_0 = arith.constant 0 : index
    %c0_1 = arith.constant 0 : index
    %0 = vector.load %arg1[%c0, %c0_0, %c0_1] : memref<1x64x32xf32, #tpu.memory_space<vmem>>, vector<1x64x32xf32>
    %1 = vector.shape_cast %0 : vector<1x64x32xf32> to vector<64x32xf32>
    %c0_2 = arith.constant 0 : index
    %c0_3 = arith.constant 0 : index
    %2 = vector.load %arg2[%c0_2, %c0_3] : memref<1x32xf32, #tpu.memory_space<vmem>>, vector<1x32xf32>
    %c0_4 = arith.constant 0 : index
    %c0_5 = arith.constant 0 : index
    %3 = vector.load %arg3[%c0_4, %c0_5] : memref<1x32xf32, #tpu.memory_space<vmem>>, vector<1x32xf32>
    %cst = arith.constant dense<0.000000e+00> : vector<64xf32>
    %4 = vector.multi_reduction <add>, %1, %cst [1] : vector<64x32xf32> to vector<64xf32>
    %5 = vector.shape_cast %4 : vector<64xf32> to vector<64x1xf32>
    %cst_6 = arith.constant 3.200000e+01 : f32
    %6 = vector.broadcast %cst_6 : f32 to vector<64x1xf32>
    %7 = arith.divf %5, %6 : vector<64x1xf32>
    %8 = vector.broadcast %7 : vector<64x1xf32> to vector<64x32xf32>
    %9 = arith.subf %1, %8 : vector<64x32xf32>
    %10 = arith.mulf %9, %9 : vector<64x32xf32>
    %cst_7 = arith.constant dense<0.000000e+00> : vector<64xf32>
    %11 = vector.multi_reduction <add>, %10, %cst_7 [1] : vector<64x32xf32> to vector<64xf32>
    %12 = vector.shape_cast %11 : vector<64xf32> to vector<64x1xf32>
    %cst_8 = arith.constant 3.200000e+01 : f32
    %13 = vector.broadcast %cst_8 : f32 to vector<64x1xf32>
    %14 = arith.divf %12, %13 : vector<64x1xf32>
    %15 = vector.broadcast %7 : vector<64x1xf32> to vector<64x32xf32>
    %16 = arith.subf %1, %15 : vector<64x32xf32>
    %cst_9 = arith.constant 9.99999974E-6 : f32
    %17 = vector.broadcast %cst_9 : f32 to vector<64x1xf32>
    %18 = arith.addf %14, %17 : vector<64x1xf32>
    %19 = math.rsqrt %18 : vector<64x1xf32>
    %20 = vector.broadcast %19 : vector<64x1xf32> to vector<64x32xf32>
    %21 = arith.mulf %16, %20 : vector<64x32xf32>
    %22 = vector.broadcast %2 : vector<1x32xf32> to vector<64x32xf32>
    %23 = arith.mulf %21, %22 : vector<64x32xf32>
    %24 = vector.broadcast %3 : vector<1x32xf32> to vector<64x32xf32>
    %25 = arith.addf %23, %24 : vector<64x32xf32>
    %c0_10 = arith.constant 0 : index
    %c0_11 = arith.constant 0 : index
    %26 = vector.load %arg4[%c0_10, %c0_11] : memref<32x64xf32, #tpu.memory_space<vmem>>, vector<32x64xf32>
    %cst_12 = arith.constant dense<0.000000e+00> : vector<64x64xf32>
    %27 = tpu.matmul %25, %26, %cst_12 {dimension_numbers = #tpu.dot_dimension_numbers<[1], [0], [0], [1], [0, 0, 1, 1], [], []>} : vector<64x32xf32>, vector<32x64xf32>, vector<64x64xf32> -> vector<64x64xf32>
    %c0_13 = arith.constant 0 : index
    %c0_14 = arith.constant 0 : index
    %28 = vector.load %arg5[%c0_13, %c0_14] : memref<1x64xf32, #tpu.memory_space<vmem>>, vector<1x64xf32>
    %29 = vector.broadcast %28 : vector<1x64xf32> to vector<64x64xf32>
    %30 = arith.addf %27, %29 : vector<64x64xf32>
    %cst_15 = arith.constant 5.000000e-01 : f32
    %31 = vector.broadcast %cst_15 : f32 to vector<64x64xf32>
    %32 = arith.mulf %31, %30 : vector<64x64xf32>
    %cst_16 = arith.constant 0.707106769 : f32
    %33 = vector.broadcast %cst_16 : f32 to vector<64x64xf32>
    %34 = arith.mulf %30, %33 : vector<64x64xf32>
    %35 = math.erf %34 : vector<64x64xf32>
    %cst_17 = arith.constant 1.000000e+00 : f32
    %36 = vector.broadcast %cst_17 : f32 to vector<64x64xf32>
    %37 = arith.addf %36, %35 : vector<64x64xf32>
    %38 = arith.mulf %32, %37 : vector<64x64xf32>
    %c0_18 = arith.constant 0 : index
    %c0_19 = arith.constant 0 : index
    %39 = vector.load %arg6[%c0_18, %c0_19] : memref<64x32xf32, #tpu.memory_space<vmem>>, vector<64x32xf32>
    %cst_20 = arith.constant dense<0.000000e+00> : vector<64x32xf32>
    %40 = tpu.matmul %38, %39, %cst_20 {dimension_numbers = #tpu.dot_dimension_numbers<[1], [0], [0], [1], [0, 0, 1, 1], [], []>} : vector<64x64xf32>, vector<64x32xf32>, vector<64x32xf32> -> vector<64x32xf32>
    %c0_21 = arith.constant 0 : index
    %c0_22 = arith.constant 0 : index
    %41 = vector.load %arg7[%c0_21, %c0_22] : memref<1x32xf32, #tpu.memory_space<vmem>>, vector<1x32xf32>
    %42 = vector.broadcast %41 : vector<1x32xf32> to vector<64x32xf32>
    %43 = arith.addf %40, %42 : vector<64x32xf32>
    %44 = arith.addf %1, %43 : vector<64x32xf32>
    %c0_23 = arith.constant 0 : index
    %c0_24 = arith.constant 0 : index
    %c0_25 = arith.constant 0 : index
    %45 = vector.load %arg8[%c0_23, %c0_24, %c0_25] : memref<1x64x32xf32, #tpu.memory_space<vmem>>, vector<1x64x32xf32>
    %46 = vector.shape_cast %45 : vector<1x64x32xf32> to vector<64x32xf32>
    %47 = vector.shape_cast %44 : vector<64x32xf32> to vector<1x64x32xf32>
    tpu.vector_store %arg8[%c0_23, %c0_24, %c0_25], %47 {strides = array<i32>} : memref<1x64x32xf32, #tpu.memory_space<vmem>>, vector<1x64x32xf32>,
    return
  }
  func.func @transform_0(%arg0: i32) -> (i32, i32, i32) {
    %c0_i32 = arith.constant 0 : i32
    %c0_i32_0 = arith.constant 0 : i32
    %c0_i32_1 = arith.constant 0 : i32
    return %arg0, %c0_i32, %c0_i32_0 : i32, i32, i32
  }
  func.func @transform_1(%arg0: i32) -> (i32, i32) {
    %c0_i32 = arith.constant 0 : i32
    %c0_i32_0 = arith.constant 0 : i32
    %c0_i32_1 = arith.constant 0 : i32
    return %c0_i32, %c0_i32_0 : i32, i32
  }
  func.func @transform_2(%arg0: i32) -> (i32, i32) {
    %c0_i32 = arith.constant 0 : i32
    %c0_i32_0 = arith.constant 0 : i32
    %c0_i32_1 = arith.constant 0 : i32
    return %c0_i32, %c0_i32_0 : i32, i32
  }
  func.func @transform_3(%arg0: i32) -> (i32, i32) {
    %c0_i32 = arith.constant 0 : i32
    %c0_i32_0 = arith.constant 0 : i32
    %c0_i32_1 = arith.constant 0 : i32
    return %c0_i32, %c0_i32_0 : i32, i32
  }
  func.func @transform_4(%arg0: i32) -> (i32, i32) {
    %c0_i32 = arith.constant 0 : i32
    %c0_i32_0 = arith.constant 0 : i32
    %c0_i32_1 = arith.constant 0 : i32
    return %c0_i32, %c0_i32_0 : i32, i32
  }
  func.func @transform_5(%arg0: i32) -> (i32, i32) {
    %c0_i32 = arith.constant 0 : i32
    %c0_i32_0 = arith.constant 0 : i32
    %c0_i32_1 = arith.constant 0 : i32
    return %c0_i32, %c0_i32_0 : i32, i32
  }
  func.func @transform_6(%arg0: i32) -> (i32, i32) {
    %c0_i32 = arith.constant 0 : i32
    %c0_i32_0 = arith.constant 0 : i32
    %c0_i32_1 = arith.constant 0 : i32
    return %c0_i32, %c0_i32_0 : i32, i32
  }
  func.func @transform_7(%arg0: i32) -> (i32, i32, i32) {
    %c0_i32 = arith.constant 0 : i32
    %c0_i32_0 = arith.constant 0 : i32
    %c0_i32_1 = arith.constant 0 : i32
    return %arg0, %c0_i32, %c0_i32_0 : i32, i32, i32
  }
}

module attributes {stable_mosaic.version = 11 : i64} {
  func.func @_attn_block_kernel(%arg0: i32, %arg1: memref<1x64x32xf32, #tpu.memory_space<vmem>>, %arg2: memref<1x32xf32, #tpu.memory_space<vmem>>, %arg3: memref<1x32xf32, #tpu.memory_space<vmem>>, %arg4: memref<3x3x3x32xf32, #tpu.memory_space<vmem>>, %arg5: memref<3x32xf32, #tpu.memory_space<vmem>>, %arg6: memref<3x32x32xf32, #tpu.memory_space<vmem>>, %arg7: memref<3x32xf32, #tpu.memory_space<vmem>>, %arg8: memref<32x32xf32, #tpu.memory_space<vmem>>, %arg9: memref<1x32xf32, #tpu.memory_space<vmem>>, %arg10: memref<1x64x32xf32, #tpu.memory_space<vmem>>, %arg11: memref<10x24x32xf32, #tpu.memory_space<vmem>>) attributes {dimension_semantics = [#tpu.dimension_semantics<parallel>], iteration_bounds = array<i64: 2>, scalar_prefetch = 0 : i64, scratch_operands = 1 : i64, tpu.core_type = #tpu.core_type<tc>, window_params = [{transform_indices = @transform_0, window_bounds = array<i64: 1, 64, 32>}, {pipeline_mode = #tpu.pipeline_mode<synchronous>, transform_indices = @transform_1, window_bounds = array<i64: 1, 32>}, {pipeline_mode = #tpu.pipeline_mode<synchronous>, transform_indices = @transform_2, window_bounds = array<i64: 1, 32>}, {pipeline_mode = #tpu.pipeline_mode<synchronous>, transform_indices = @transform_3, window_bounds = array<i64: 3, 3, 3, 32>}, {pipeline_mode = #tpu.pipeline_mode<synchronous>, transform_indices = @transform_4, window_bounds = array<i64: 3, 32>}, {pipeline_mode = #tpu.pipeline_mode<synchronous>, transform_indices = @transform_5, window_bounds = array<i64: 3, 32, 32>}, {pipeline_mode = #tpu.pipeline_mode<synchronous>, transform_indices = @transform_6, window_bounds = array<i64: 3, 32>}, {pipeline_mode = #tpu.pipeline_mode<synchronous>, transform_indices = @transform_7, window_bounds = array<i64: 32, 32>}, {pipeline_mode = #tpu.pipeline_mode<synchronous>, transform_indices = @transform_8, window_bounds = array<i64: 1, 32>}, {transform_indices = @transform_9, window_bounds = array<i64: 1, 64, 32>}]} {
    %c0 = arith.constant 0 : index
    %c0_0 = arith.constant 0 : index
    %c0_1 = arith.constant 0 : index
    %0 = vector.load %arg1[%c0, %c0_0, %c0_1] : memref<1x64x32xf32, #tpu.memory_space<vmem>>, vector<1x64x32xf32>
    %1 = vector.shape_cast %0 : vector<1x64x32xf32> to vector<64x32xf32>
    %c0_2 = arith.constant 0 : index
    %c0_3 = arith.constant 0 : index
    %2 = vector.load %arg2[%c0_2, %c0_3] : memref<1x32xf32, #tpu.memory_space<vmem>>, vector<1x32xf32>
    %c0_4 = arith.constant 0 : index
    %c0_5 = arith.constant 0 : index
    %3 = vector.load %arg3[%c0_4, %c0_5] : memref<1x32xf32, #tpu.memory_space<vmem>>, vector<1x32xf32>
    %cst = arith.constant dense<0.000000e+00> : vector<64xf32>
    %4 = vector.multi_reduction <add>, %1, %cst [1] : vector<64x32xf32> to vector<64xf32>
    %5 = vector.shape_cast %4 : vector<64xf32> to vector<64x1xf32>
    %cst_6 = arith.constant 3.200000e+01 : f32
    %6 = vector.broadcast %cst_6 : f32 to vector<64x1xf32>
    %7 = arith.divf %5, %6 : vector<64x1xf32>
    %8 = vector.broadcast %7 : vector<64x1xf32> to vector<64x32xf32>
    %9 = arith.subf %1, %8 : vector<64x32xf32>
    %10 = arith.mulf %9, %9 : vector<64x32xf32>
    %cst_7 = arith.constant dense<0.000000e+00> : vector<64xf32>
    %11 = vector.multi_reduction <add>, %10, %cst_7 [1] : vector<64x32xf32> to vector<64xf32>
    %12 = vector.shape_cast %11 : vector<64xf32> to vector<64x1xf32>
    %cst_8 = arith.constant 3.200000e+01 : f32
    %13 = vector.broadcast %cst_8 : f32 to vector<64x1xf32>
    %14 = arith.divf %12, %13 : vector<64x1xf32>
    %15 = vector.broadcast %7 : vector<64x1xf32> to vector<64x32xf32>
    %16 = arith.subf %1, %15 : vector<64x32xf32>
    %cst_9 = arith.constant 9.99999974E-6 : f32
    %17 = vector.broadcast %cst_9 : f32 to vector<64x1xf32>
    %18 = arith.addf %14, %17 : vector<64x1xf32>
    %19 = math.rsqrt %18 : vector<64x1xf32>
    %20 = vector.broadcast %19 : vector<64x1xf32> to vector<64x32xf32>
    %21 = arith.mulf %16, %20 : vector<64x32xf32>
    %22 = vector.broadcast %2 : vector<1x32xf32> to vector<64x32xf32>
    %23 = arith.mulf %21, %22 : vector<64x32xf32>
    %24 = vector.broadcast %3 : vector<1x32xf32> to vector<64x32xf32>
    %25 = arith.addf %23, %24 : vector<64x32xf32>
    %cst_10 = arith.constant 0.000000e+00 : f32
    %26 = vector.broadcast %cst_10 : f32 to vector<10x24x32xf32>
    %c0_11 = arith.constant 0 : index
    %c0_12 = arith.constant 0 : index
    %c0_13 = arith.constant 0 : index
    %27 = vector.load %arg11[%c0_11, %c0_12, %c0_13] : memref<10x24x32xf32, #tpu.memory_space<vmem>>, vector<10x24x32xf32>
    tpu.vector_store %arg11[%c0_11, %c0_12, %c0_13], %26 {strides = array<i32>} : memref<10x24x32xf32, #tpu.memory_space<vmem>>, vector<10x24x32xf32>,
    %28 = vector.shape_cast %25 : vector<64x32xf32> to vector<8x8x32xf32>
    %c1 = arith.constant 1 : index
    %c8 = arith.constant 8 : index
    %c0_14 = arith.constant 0 : index
    %29 = vector.load %arg11[%c1, %c8, %c0_14] : memref<10x24x32xf32, #tpu.memory_space<vmem>>, vector<8x8x32xf32>
    tpu.vector_store %arg11[%c1, %c8, %c0_14], %28 {strides = array<i32>} : memref<10x24x32xf32, #tpu.memory_space<vmem>>, vector<8x8x32xf32>,
    %c0_15 = arith.constant 0 : index
    %c0_16 = arith.constant 0 : index
    %c0_17 = arith.constant 0 : index
    %30 = vector.load %arg11[%c0_15, %c0_16, %c0_17] : memref<10x24x32xf32, #tpu.memory_space<vmem>>, vector<10x24x32xf32>
    %c0_18 = arith.constant 0 : index
    %c0_19 = arith.constant 0 : index
    %c0_20 = arith.constant 0 : index
    %c0_21 = arith.constant 0 : index
    %31 = vector.load %arg4[%c0_18, %c0_19, %c0_20, %c0_21] : memref<3x3x3x32xf32, #tpu.memory_space<vmem>>, vector<3x3x3x32xf32>
    %c0_22 = arith.constant 0 : index
    %c0_23 = arith.constant 0 : index
    %32 = vector.load %arg5[%c0_22, %c0_23] : memref<3x32xf32, #tpu.memory_space<vmem>>, vector<3x32xf32>
    %cst_24 = arith.constant 0.000000e+00 : f32
    %33 = vector.broadcast %cst_24 : f32 to vector<8x8x32xf32>
    %cst_25 = arith.constant 0.000000e+00 : f32
    %34 = vector.broadcast %cst_25 : f32 to vector<8x8x32xf32>
    %cst_26 = arith.constant 0.000000e+00 : f32
    %35 = vector.broadcast %cst_26 : f32 to vector<8x8x32xf32>
    %36 = vector.extract_strided_slice %30 {offsets = [0, 7, 0], sizes = [8, 8, 32], strides = [1, 1, 1]} : vector<10x24x32xf32> to vector<8x8x32xf32>
    %37 = vector.extract_strided_slice %31 {offsets = [0, 0, 0, 0], sizes = [1, 1, 1, 32], strides = [1, 1, 1, 1]} : vector<3x3x3x32xf32> to vector<1x1x1x32xf32>
    %38 = vector.shape_cast %37 : vector<1x1x1x32xf32> to vector<32xf32>
    %39 = vector.shape_cast %38 : vector<32xf32> to vector<1x1x32xf32>
    %40 = vector.broadcast %39 : vector<1x1x32xf32> to vector<8x8x32xf32>
    %41 = arith.mulf %36, %40 : vector<8x8x32xf32>
    %42 = arith.addf %33, %41 : vector<8x8x32xf32>
    %43 = vector.extract_strided_slice %31 {offsets = [1, 0, 0, 0], sizes = [1, 1, 1, 32], strides = [1, 1, 1, 1]} : vector<3x3x3x32xf32> to vector<1x1x1x32xf32>
    %44 = vector.shape_cast %43 : vector<1x1x1x32xf32> to vector<32xf32>
    %45 = vector.shape_cast %44 : vector<32xf32> to vector<1x1x32xf32>
    %46 = vector.broadcast %45 : vector<1x1x32xf32> to vector<8x8x32xf32>
    %47 = arith.mulf %36, %46 : vector<8x8x32xf32>
    %48 = arith.addf %34, %47 : vector<8x8x32xf32>
    %49 = vector.extract_strided_slice %31 {offsets = [2, 0, 0, 0], sizes = [1, 1, 1, 32], strides = [1, 1, 1, 1]} : vector<3x3x3x32xf32> to vector<1x1x1x32xf32>
    %50 = vector.shape_cast %49 : vector<1x1x1x32xf32> to vector<32xf32>
    %51 = vector.shape_cast %50 : vector<32xf32> to vector<1x1x32xf32>
    %52 = vector.broadcast %51 : vector<1x1x32xf32> to vector<8x8x32xf32>
    %53 = arith.mulf %36, %52 : vector<8x8x32xf32>
    %54 = arith.addf %35, %53 : vector<8x8x32xf32>
    %55 = vector.extract_strided_slice %30 {offsets = [0, 8, 0], sizes = [8, 8, 32], strides = [1, 1, 1]} : vector<10x24x32xf32> to vector<8x8x32xf32>
    %56 = vector.extract_strided_slice %31 {offsets = [0, 0, 1, 0], sizes = [1, 1, 1, 32], strides = [1, 1, 1, 1]} : vector<3x3x3x32xf32> to vector<1x1x1x32xf32>
    %57 = vector.shape_cast %56 : vector<1x1x1x32xf32> to vector<32xf32>
    %58 = vector.shape_cast %57 : vector<32xf32> to vector<1x1x32xf32>
    %59 = vector.broadcast %58 : vector<1x1x32xf32> to vector<8x8x32xf32>
    %60 = arith.mulf %55, %59 : vector<8x8x32xf32>
    %61 = arith.addf %42, %60 : vector<8x8x32xf32>
    %62 = vector.extract_strided_slice %31 {offsets = [1, 0, 1, 0], sizes = [1, 1, 1, 32], strides = [1, 1, 1, 1]} : vector<3x3x3x32xf32> to vector<1x1x1x32xf32>
    %63 = vector.shape_cast %62 : vector<1x1x1x32xf32> to vector<32xf32>
    %64 = vector.shape_cast %63 : vector<32xf32> to vector<1x1x32xf32>
    %65 = vector.broadcast %64 : vector<1x1x32xf32> to vector<8x8x32xf32>
    %66 = arith.mulf %55, %65 : vector<8x8x32xf32>
    %67 = arith.addf %48, %66 : vector<8x8x32xf32>
    %68 = vector.extract_strided_slice %31 {offsets = [2, 0, 1, 0], sizes = [1, 1, 1, 32], strides = [1, 1, 1, 1]} : vector<3x3x3x32xf32> to vector<1x1x1x32xf32>
    %69 = vector.shape_cast %68 : vector<1x1x1x32xf32> to vector<32xf32>
    %70 = vector.shape_cast %69 : vector<32xf32> to vector<1x1x32xf32>
    %71 = vector.broadcast %70 : vector<1x1x32xf32> to vector<8x8x32xf32>
    %72 = arith.mulf %55, %71 : vector<8x8x32xf32>
    %73 = arith.addf %54, %72 : vector<8x8x32xf32>
    %74 = vector.extract_strided_slice %30 {offsets = [0, 9, 0], sizes = [8, 8, 32], strides = [1, 1, 1]} : vector<10x24x32xf32> to vector<8x8x32xf32>
    %75 = vector.extract_strided_slice %31 {offsets = [0, 0, 2, 0], sizes = [1, 1, 1, 32], strides = [1, 1, 1, 1]} : vector<3x3x3x32xf32> to vector<1x1x1x32xf32>
    %76 = vector.shape_cast %75 : vector<1x1x1x32xf32> to vector<32xf32>
    %77 = vector.shape_cast %76 : vector<32xf32> to vector<1x1x32xf32>
    %78 = vector.broadcast %77 : vector<1x1x32xf32> to vector<8x8x32xf32>
    %79 = arith.mulf %74, %78 : vector<8x8x32xf32>
    %80 = arith.addf %61, %79 : vector<8x8x32xf32>
    %81 = vector.extract_strided_slice %31 {offsets = [1, 0, 2, 0], sizes = [1, 1, 1, 32], strides = [1, 1, 1, 1]} : vector<3x3x3x32xf32> to vector<1x1x1x32xf32>
    %82 = vector.shape_cast %81 : vector<1x1x1x32xf32> to vector<32xf32>
    %83 = vector.shape_cast %82 : vector<32xf32> to vector<1x1x32xf32>
    %84 = vector.broadcast %83 : vector<1x1x32xf32> to vector<8x8x32xf32>
    %85 = arith.mulf %74, %84 : vector<8x8x32xf32>
    %86 = arith.addf %67, %85 : vector<8x8x32xf32>
    %87 = vector.extract_strided_slice %31 {offsets = [2, 0, 2, 0], sizes = [1, 1, 1, 32], strides = [1, 1, 1, 1]} : vector<3x3x3x32xf32> to vector<1x1x1x32xf32>
    %88 = vector.shape_cast %87 : vector<1x1x1x32xf32> to vector<32xf32>
    %89 = vector.shape_cast %88 : vector<32xf32> to vector<1x1x32xf32>
    %90 = vector.broadcast %89 : vector<1x1x32xf32> to vector<8x8x32xf32>
    %91 = arith.mulf %74, %90 : vector<8x8x32xf32>
    %92 = arith.addf %73, %91 : vector<8x8x32xf32>
    %93 = vector.extract_strided_slice %30 {offsets = [1, 7, 0], sizes = [8, 8, 32], strides = [1, 1, 1]} : vector<10x24x32xf32> to vector<8x8x32xf32>
    %94 = vector.extract_strided_slice %31 {offsets = [0, 1, 0, 0], sizes = [1, 1, 1, 32], strides = [1, 1, 1, 1]} : vector<3x3x3x32xf32> to vector<1x1x1x32xf32>
    %95 = vector.shape_cast %94 : vector<1x1x1x32xf32> to vector<32xf32>
    %96 = vector.shape_cast %95 : vector<32xf32> to vector<1x1x32xf32>
    %97 = vector.broadcast %96 : vector<1x1x32xf32> to vector<8x8x32xf32>
    %98 = arith.mulf %93, %97 : vector<8x8x32xf32>
    %99 = arith.addf %80, %98 : vector<8x8x32xf32>
    %100 = vector.extract_strided_slice %31 {offsets = [1, 1, 0, 0], sizes = [1, 1, 1, 32], strides = [1, 1, 1, 1]} : vector<3x3x3x32xf32> to vector<1x1x1x32xf32>
    %101 = vector.shape_cast %100 : vector<1x1x1x32xf32> to vector<32xf32>
    %102 = vector.shape_cast %101 : vector<32xf32> to vector<1x1x32xf32>
    %103 = vector.broadcast %102 : vector<1x1x32xf32> to vector<8x8x32xf32>
    %104 = arith.mulf %93, %103 : vector<8x8x32xf32>
    %105 = arith.addf %86, %104 : vector<8x8x32xf32>
    %106 = vector.extract_strided_slice %31 {offsets = [2, 1, 0, 0], sizes = [1, 1, 1, 32], strides = [1, 1, 1, 1]} : vector<3x3x3x32xf32> to vector<1x1x1x32xf32>
    %107 = vector.shape_cast %106 : vector<1x1x1x32xf32> to vector<32xf32>
    %108 = vector.shape_cast %107 : vector<32xf32> to vector<1x1x32xf32>
    %109 = vector.broadcast %108 : vector<1x1x32xf32> to vector<8x8x32xf32>
    %110 = arith.mulf %93, %109 : vector<8x8x32xf32>
    %111 = arith.addf %92, %110 : vector<8x8x32xf32>
    %112 = vector.extract_strided_slice %30 {offsets = [1, 8, 0], sizes = [8, 8, 32], strides = [1, 1, 1]} : vector<10x24x32xf32> to vector<8x8x32xf32>
    %113 = vector.extract_strided_slice %31 {offsets = [0, 1, 1, 0], sizes = [1, 1, 1, 32], strides = [1, 1, 1, 1]} : vector<3x3x3x32xf32> to vector<1x1x1x32xf32>
    %114 = vector.shape_cast %113 : vector<1x1x1x32xf32> to vector<32xf32>
    %115 = vector.shape_cast %114 : vector<32xf32> to vector<1x1x32xf32>
    %116 = vector.broadcast %115 : vector<1x1x32xf32> to vector<8x8x32xf32>
    %117 = arith.mulf %112, %116 : vector<8x8x32xf32>
    %118 = arith.addf %99, %117 : vector<8x8x32xf32>
    %119 = vector.extract_strided_slice %31 {offsets = [1, 1, 1, 0], sizes = [1, 1, 1, 32], strides = [1, 1, 1, 1]} : vector<3x3x3x32xf32> to vector<1x1x1x32xf32>
    %120 = vector.shape_cast %119 : vector<1x1x1x32xf32> to vector<32xf32>
    %121 = vector.shape_cast %120 : vector<32xf32> to vector<1x1x32xf32>
    %122 = vector.broadcast %121 : vector<1x1x32xf32> to vector<8x8x32xf32>
    %123 = arith.mulf %112, %122 : vector<8x8x32xf32>
    %124 = arith.addf %105, %123 : vector<8x8x32xf32>
    %125 = vector.extract_strided_slice %31 {offsets = [2, 1, 1, 0], sizes = [1, 1, 1, 32], strides = [1, 1, 1, 1]} : vector<3x3x3x32xf32> to vector<1x1x1x32xf32>
    %126 = vector.shape_cast %125 : vector<1x1x1x32xf32> to vector<32xf32>
    %127 = vector.shape_cast %126 : vector<32xf32> to vector<1x1x32xf32>
    %128 = vector.broadcast %127 : vector<1x1x32xf32> to vector<8x8x32xf32>
    %129 = arith.mulf %112, %128 : vector<8x8x32xf32>
    %130 = arith.addf %111, %129 : vector<8x8x32xf32>
    %131 = vector.extract_strided_slice %30 {offsets = [1, 9, 0], sizes = [8, 8, 32], strides = [1, 1, 1]} : vector<10x24x32xf32> to vector<8x8x32xf32>
    %132 = vector.extract_strided_slice %31 {offsets = [0, 1, 2, 0], sizes = [1, 1, 1, 32], strides = [1, 1, 1, 1]} : vector<3x3x3x32xf32> to vector<1x1x1x32xf32>
    %133 = vector.shape_cast %132 : vector<1x1x1x32xf32> to vector<32xf32>
    %134 = vector.shape_cast %133 : vector<32xf32> to vector<1x1x32xf32>
    %135 = vector.broadcast %134 : vector<1x1x32xf32> to vector<8x8x32xf32>
    %136 = arith.mulf %131, %135 : vector<8x8x32xf32>
    %137 = arith.addf %118, %136 : vector<8x8x32xf32>
    %138 = vector.extract_strided_slice %31 {offsets = [1, 1, 2, 0], sizes = [1, 1, 1, 32], strides = [1, 1, 1, 1]} : vector<3x3x3x32xf32> to vector<1x1x1x32xf32>
    %139 = vector.shape_cast %138 : vector<1x1x1x32xf32> to vector<32xf32>
    %140 = vector.shape_cast %139 : vector<32xf32> to vector<1x1x32xf32>
    %141 = vector.broadcast %140 : vector<1x1x32xf32> to vector<8x8x32xf32>
    %142 = arith.mulf %131, %141 : vector<8x8x32xf32>
    %143 = arith.addf %124, %142 : vector<8x8x32xf32>
    %144 = vector.extract_strided_slice %31 {offsets = [2, 1, 2, 0], sizes = [1, 1, 1, 32], strides = [1, 1, 1, 1]} : vector<3x3x3x32xf32> to vector<1x1x1x32xf32>
    %145 = vector.shape_cast %144 : vector<1x1x1x32xf32> to vector<32xf32>
    %146 = vector.shape_cast %145 : vector<32xf32> to vector<1x1x32xf32>
    %147 = vector.broadcast %146 : vector<1x1x32xf32> to vector<8x8x32xf32>
    %148 = arith.mulf %131, %147 : vector<8x8x32xf32>
    %149 = arith.addf %130, %148 : vector<8x8x32xf32>
    %150 = vector.extract_strided_slice %30 {offsets = [2, 7, 0], sizes = [8, 8, 32], strides = [1, 1, 1]} : vector<10x24x32xf32> to vector<8x8x32xf32>
    %151 = vector.extract_strided_slice %31 {offsets = [0, 2, 0, 0], sizes = [1, 1, 1, 32], strides = [1, 1, 1, 1]} : vector<3x3x3x32xf32> to vector<1x1x1x32xf32>
    %152 = vector.shape_cast %151 : vector<1x1x1x32xf32> to vector<32xf32>
    %153 = vector.shape_cast %152 : vector<32xf32> to vector<1x1x32xf32>
    %154 = vector.broadcast %153 : vector<1x1x32xf32> to vector<8x8x32xf32>
    %155 = arith.mulf %150, %154 : vector<8x8x32xf32>
    %156 = arith.addf %137, %155 : vector<8x8x32xf32>
    %157 = vector.extract_strided_slice %31 {offsets = [1, 2, 0, 0], sizes = [1, 1, 1, 32], strides = [1, 1, 1, 1]} : vector<3x3x3x32xf32> to vector<1x1x1x32xf32>
    %158 = vector.shape_cast %157 : vector<1x1x1x32xf32> to vector<32xf32>
    %159 = vector.shape_cast %158 : vector<32xf32> to vector<1x1x32xf32>
    %160 = vector.broadcast %159 : vector<1x1x32xf32> to vector<8x8x32xf32>
    %161 = arith.mulf %150, %160 : vector<8x8x32xf32>
    %162 = arith.addf %143, %161 : vector<8x8x32xf32>
    %163 = vector.extract_strided_slice %31 {offsets = [2, 2, 0, 0], sizes = [1, 1, 1, 32], strides = [1, 1, 1, 1]} : vector<3x3x3x32xf32> to vector<1x1x1x32xf32>
    %164 = vector.shape_cast %163 : vector<1x1x1x32xf32> to vector<32xf32>
    %165 = vector.shape_cast %164 : vector<32xf32> to vector<1x1x32xf32>
    %166 = vector.broadcast %165 : vector<1x1x32xf32> to vector<8x8x32xf32>
    %167 = arith.mulf %150, %166 : vector<8x8x32xf32>
    %168 = arith.addf %149, %167 : vector<8x8x32xf32>
    %169 = vector.extract_strided_slice %30 {offsets = [2, 8, 0], sizes = [8, 8, 32], strides = [1, 1, 1]} : vector<10x24x32xf32> to vector<8x8x32xf32>
    %170 = vector.extract_strided_slice %31 {offsets = [0, 2, 1, 0], sizes = [1, 1, 1, 32], strides = [1, 1, 1, 1]} : vector<3x3x3x32xf32> to vector<1x1x1x32xf32>
    %171 = vector.shape_cast %170 : vector<1x1x1x32xf32> to vector<32xf32>
    %172 = vector.shape_cast %171 : vector<32xf32> to vector<1x1x32xf32>
    %173 = vector.broadcast %172 : vector<1x1x32xf32> to vector<8x8x32xf32>
    %174 = arith.mulf %169, %173 : vector<8x8x32xf32>
    %175 = arith.addf %156, %174 : vector<8x8x32xf32>
    %176 = vector.extract_strided_slice %31 {offsets = [1, 2, 1, 0], sizes = [1, 1, 1, 32], strides = [1, 1, 1, 1]} : vector<3x3x3x32xf32> to vector<1x1x1x32xf32>
    %177 = vector.shape_cast %176 : vector<1x1x1x32xf32> to vector<32xf32>
    %178 = vector.shape_cast %177 : vector<32xf32> to vector<1x1x32xf32>
    %179 = vector.broadcast %178 : vector<1x1x32xf32> to vector<8x8x32xf32>
    %180 = arith.mulf %169, %179 : vector<8x8x32xf32>
    %181 = arith.addf %162, %180 : vector<8x8x32xf32>
    %182 = vector.extract_strided_slice %31 {offsets = [2, 2, 1, 0], sizes = [1, 1, 1, 32], strides = [1, 1, 1, 1]} : vector<3x3x3x32xf32> to vector<1x1x1x32xf32>
    %183 = vector.shape_cast %182 : vector<1x1x1x32xf32> to vector<32xf32>
    %184 = vector.shape_cast %183 : vector<32xf32> to vector<1x1x32xf32>
    %185 = vector.broadcast %184 : vector<1x1x32xf32> to vector<8x8x32xf32>
    %186 = arith.mulf %169, %185 : vector<8x8x32xf32>
    %187 = arith.addf %168, %186 : vector<8x8x32xf32>
    %188 = vector.extract_strided_slice %30 {offsets = [2, 9, 0], sizes = [8, 8, 32], strides = [1, 1, 1]} : vector<10x24x32xf32> to vector<8x8x32xf32>
    %189 = vector.extract_strided_slice %31 {offsets = [0, 2, 2, 0], sizes = [1, 1, 1, 32], strides = [1, 1, 1, 1]} : vector<3x3x3x32xf32> to vector<1x1x1x32xf32>
    %190 = vector.shape_cast %189 : vector<1x1x1x32xf32> to vector<32xf32>
    %191 = vector.shape_cast %190 : vector<32xf32> to vector<1x1x32xf32>
    %192 = vector.broadcast %191 : vector<1x1x32xf32> to vector<8x8x32xf32>
    %193 = arith.mulf %188, %192 : vector<8x8x32xf32>
    %194 = arith.addf %175, %193 : vector<8x8x32xf32>
    %195 = vector.extract_strided_slice %31 {offsets = [1, 2, 2, 0], sizes = [1, 1, 1, 32], strides = [1, 1, 1, 1]} : vector<3x3x3x32xf32> to vector<1x1x1x32xf32>
    %196 = vector.shape_cast %195 : vector<1x1x1x32xf32> to vector<32xf32>
    %197 = vector.shape_cast %196 : vector<32xf32> to vector<1x1x32xf32>
    %198 = vector.broadcast %197 : vector<1x1x32xf32> to vector<8x8x32xf32>
    %199 = arith.mulf %188, %198 : vector<8x8x32xf32>
    %200 = arith.addf %181, %199 : vector<8x8x32xf32>
    %201 = vector.extract_strided_slice %31 {offsets = [2, 2, 2, 0], sizes = [1, 1, 1, 32], strides = [1, 1, 1, 1]} : vector<3x3x3x32xf32> to vector<1x1x1x32xf32>
    %202 = vector.shape_cast %201 : vector<1x1x1x32xf32> to vector<32xf32>
    %203 = vector.shape_cast %202 : vector<32xf32> to vector<1x1x32xf32>
    %204 = vector.broadcast %203 : vector<1x1x32xf32> to vector<8x8x32xf32>
    %205 = arith.mulf %188, %204 : vector<8x8x32xf32>
    %206 = arith.addf %187, %205 : vector<8x8x32xf32>
    %207 = vector.shape_cast %194 : vector<8x8x32xf32> to vector<64x32xf32>
    %208 = vector.extract_strided_slice %32 {offsets = [0, 0], sizes = [1, 32], strides = [1, 1]} : vector<3x32xf32> to vector<1x32xf32>
    %209 = vector.shape_cast %208 : vector<1x32xf32> to vector<32xf32>
    %210 = vector.shape_cast %209 : vector<32xf32> to vector<1x32xf32>
    %211 = vector.broadcast %210 : vector<1x32xf32> to vector<64x32xf32>
    %212 = arith.addf %207, %211 : vector<64x32xf32>
    %213 = vector.shape_cast %200 : vector<8x8x32xf32> to vector<64x32xf32>
    %214 = vector.extract_strided_slice %32 {offsets = [1, 0], sizes = [1, 32], strides = [1, 1]} : vector<3x32xf32> to vector<1x32xf32>
    %215 = vector.shape_cast %214 : vector<1x32xf32> to vector<32xf32>
    %216 = vector.shape_cast %215 : vector<32xf32> to vector<1x32xf32>
    %217 = vector.broadcast %216 : vector<1x32xf32> to vector<64x32xf32>
    %218 = arith.addf %213, %217 : vector<64x32xf32>
    %219 = vector.shape_cast %206 : vector<8x8x32xf32> to vector<64x32xf32>
    %220 = vector.extract_strided_slice %32 {offsets = [2, 0], sizes = [1, 32], strides = [1, 1]} : vector<3x32xf32> to vector<1x32xf32>
    %221 = vector.shape_cast %220 : vector<1x32xf32> to vector<32xf32>
    %222 = vector.shape_cast %221 : vector<32xf32> to vector<1x32xf32>
    %223 = vector.broadcast %222 : vector<1x32xf32> to vector<64x32xf32>
    %224 = arith.addf %219, %223 : vector<64x32xf32>
    %c0_27 = arith.constant 0 : index
    %c0_28 = arith.constant 0 : index
    %225 = vector.load %arg7[%c0_27, %c0_28] : memref<3x32xf32, #tpu.memory_space<vmem>>, vector<3x32xf32>
    %c0_29 = arith.constant 0 : index
    %c0_30 = arith.constant 0 : index
    %c0_31 = arith.constant 0 : index
    %226 = vector.load %arg6[%c0_29, %c0_30, %c0_31] : memref<3x32x32xf32, #tpu.memory_space<vmem>>, vector<1x32x32xf32>
    %227 = vector.shape_cast %226 : vector<1x32x32xf32> to vector<32x32xf32>
    %cst_32 = arith.constant dense<0.000000e+00> : vector<64x32xf32>
    %228 = tpu.matmul %212, %227, %cst_32 {dimension_numbers = #tpu.dot_dimension_numbers<[1], [0], [0], [1], [0, 0, 1, 1], [], []>} : vector<64x32xf32>, vector<32x32xf32>, vector<64x32xf32> -> vector<64x32xf32>
    %229 = vector.extract_strided_slice %225 {offsets = [0, 0], sizes = [1, 32], strides = [1, 1]} : vector<3x32xf32> to vector<1x32xf32>
    %230 = vector.shape_cast %229 : vector<1x32xf32> to vector<32xf32>
    %231 = vector.shape_cast %230 : vector<32xf32> to vector<1x32xf32>
    %232 = vector.broadcast %231 : vector<1x32xf32> to vector<64x32xf32>
    %233 = arith.addf %228, %232 : vector<64x32xf32>
    %c1_33 = arith.constant 1 : index
    %c0_34 = arith.constant 0 : index
    %c0_35 = arith.constant 0 : index
    %234 = vector.load %arg6[%c1_33, %c0_34, %c0_35] : memref<3x32x32xf32, #tpu.memory_space<vmem>>, vector<1x32x32xf32>
    %235 = vector.shape_cast %234 : vector<1x32x32xf32> to vector<32x32xf32>
    %cst_36 = arith.constant dense<0.000000e+00> : vector<64x32xf32>
    %236 = tpu.matmul %218, %235, %cst_36 {dimension_numbers = #tpu.dot_dimension_numbers<[1], [0], [0], [1], [0, 0, 1, 1], [], []>} : vector<64x32xf32>, vector<32x32xf32>, vector<64x32xf32> -> vector<64x32xf32>
    %237 = vector.extract_strided_slice %225 {offsets = [1, 0], sizes = [1, 32], strides = [1, 1]} : vector<3x32xf32> to vector<1x32xf32>
    %238 = vector.shape_cast %237 : vector<1x32xf32> to vector<32xf32>
    %239 = vector.shape_cast %238 : vector<32xf32> to vector<1x32xf32>
    %240 = vector.broadcast %239 : vector<1x32xf32> to vector<64x32xf32>
    %241 = arith.addf %236, %240 : vector<64x32xf32>
    %c2 = arith.constant 2 : index
    %c0_37 = arith.constant 0 : index
    %c0_38 = arith.constant 0 : index
    %242 = vector.load %arg6[%c2, %c0_37, %c0_38] : memref<3x32x32xf32, #tpu.memory_space<vmem>>, vector<1x32x32xf32>
    %243 = vector.shape_cast %242 : vector<1x32x32xf32> to vector<32x32xf32>
    %cst_39 = arith.constant dense<0.000000e+00> : vector<64x32xf32>
    %244 = tpu.matmul %224, %243, %cst_39 {dimension_numbers = #tpu.dot_dimension_numbers<[1], [0], [0], [1], [0, 0, 1, 1], [], []>} : vector<64x32xf32>, vector<32x32xf32>, vector<64x32xf32> -> vector<64x32xf32>
    %245 = vector.extract_strided_slice %225 {offsets = [2, 0], sizes = [1, 32], strides = [1, 1]} : vector<3x32xf32> to vector<1x32xf32>
    %246 = vector.shape_cast %245 : vector<1x32xf32> to vector<32xf32>
    %247 = vector.shape_cast %246 : vector<32xf32> to vector<1x32xf32>
    %248 = vector.broadcast %247 : vector<1x32xf32> to vector<64x32xf32>
    %249 = arith.addf %244, %248 : vector<64x32xf32>
    %c0_40 = arith.constant 0 : index
    %c0_41 = arith.constant 0 : index
    %250 = vector.load %arg8[%c0_40, %c0_41] : memref<32x32xf32, #tpu.memory_space<vmem>>, vector<32x32xf32>
    %cst_42 = arith.constant 0.000000e+00 : f32
    %251 = vector.broadcast %cst_42 : f32 to vector<64x32xf32>
    %252 = vector.extract_strided_slice %233 {offsets = [0, 0], sizes = [64, 8], strides = [1, 1]} : vector<64x32xf32> to vector<64x8xf32>
    %253 = vector.extract_strided_slice %241 {offsets = [0, 0], sizes = [64, 8], strides = [1, 1]} : vector<64x32xf32> to vector<64x8xf32>
    %254 = vector.extract_strided_slice %249 {offsets = [0, 0], sizes = [64, 8], strides = [1, 1]} : vector<64x32xf32> to vector<64x8xf32>
    %cst_43 = arith.constant dense<0.000000e+00> : vector<64x64xf32>
    %255 = tpu.matmul %252, %253, %cst_43 {dimension_numbers = #tpu.dot_dimension_numbers<[1], [1], [0], [0], [0, 0, 1, 0], [], []>} : vector<64x8xf32>, vector<64x8xf32>, vector<64x64xf32> -> vector<64x64xf32>
    %cst_44 = arith.constant 0.353553385 : f32
    %256 = vector.broadcast %cst_44 : f32 to vector<64x64xf32>
    %257 = arith.mulf %255, %256 : vector<64x64xf32>
    %cst_45 = arith.constant dense<0xFF800000> : vector<64xf32>
    %258 = vector.multi_reduction <maximumf>, %257, %cst_45 [1] : vector<64x64xf32> to vector<64xf32>
    %259 = vector.shape_cast %258 : vector<64xf32> to vector<64x1xf32>
    %260 = vector.broadcast %259 : vector<64x1xf32> to vector<64x64xf32>
    %261 = arith.subf %257, %260 : vector<64x64xf32>
    %262 = math.exp %261 : vector<64x64xf32>
    %cst_46 = arith.constant dense<0.000000e+00> : vector<64xf32>
    %263 = vector.multi_reduction <add>, %262, %cst_46 [1] : vector<64x64xf32> to vector<64xf32>
    %264 = vector.shape_cast %263 : vector<64xf32> to vector<64x1xf32>
    %265 = tpu.reciprocal %264 {approx = true} : vector<64x1xf32> -> vector<64x1xf32>
    %266 = vector.broadcast %265 : vector<64x1xf32> to vector<64x64xf32>
    %267 = arith.mulf %262, %266 : vector<64x64xf32>
    %cst_47 = arith.constant dense<0.000000e+00> : vector<64x8xf32>
    %268 = tpu.matmul %267, %254, %cst_47 {dimension_numbers = #tpu.dot_dimension_numbers<[1], [0], [0], [1], [0, 0, 1, 1], [], []>} : vector<64x64xf32>, vector<64x8xf32>, vector<64x8xf32> -> vector<64x8xf32>
    %269 = vector.extract_strided_slice %250 {offsets = [0, 0], sizes = [8, 32], strides = [1, 1]} : vector<32x32xf32> to vector<8x32xf32>
    %cst_48 = arith.constant dense<0.000000e+00> : vector<64x32xf32>
    %270 = tpu.matmul %268, %269, %cst_48 {dimension_numbers = #tpu.dot_dimension_numbers<[1], [0], [0], [1], [0, 0, 1, 1], [], []>} : vector<64x8xf32>, vector<8x32xf32>, vector<64x32xf32> -> vector<64x32xf32>
    %271 = arith.addf %251, %270 : vector<64x32xf32>
    %272 = vector.extract_strided_slice %233 {offsets = [0, 8], sizes = [64, 8], strides = [1, 1]} : vector<64x32xf32> to vector<64x8xf32>
    %273 = vector.extract_strided_slice %241 {offsets = [0, 8], sizes = [64, 8], strides = [1, 1]} : vector<64x32xf32> to vector<64x8xf32>
    %274 = vector.extract_strided_slice %249 {offsets = [0, 8], sizes = [64, 8], strides = [1, 1]} : vector<64x32xf32> to vector<64x8xf32>
    %cst_49 = arith.constant dense<0.000000e+00> : vector<64x64xf32>
    %275 = tpu.matmul %272, %273, %cst_49 {dimension_numbers = #tpu.dot_dimension_numbers<[1], [1], [0], [0], [0, 0, 1, 0], [], []>} : vector<64x8xf32>, vector<64x8xf32>, vector<64x64xf32> -> vector<64x64xf32>
    %cst_50 = arith.constant 0.353553385 : f32
    %276 = vector.broadcast %cst_50 : f32 to vector<64x64xf32>
    %277 = arith.mulf %275, %276 : vector<64x64xf32>
    %cst_51 = arith.constant dense<0xFF800000> : vector<64xf32>
    %278 = vector.multi_reduction <maximumf>, %277, %cst_51 [1] : vector<64x64xf32> to vector<64xf32>
    %279 = vector.shape_cast %278 : vector<64xf32> to vector<64x1xf32>
    %280 = vector.broadcast %279 : vector<64x1xf32> to vector<64x64xf32>
    %281 = arith.subf %277, %280 : vector<64x64xf32>
    %282 = math.exp %281 : vector<64x64xf32>
    %cst_52 = arith.constant dense<0.000000e+00> : vector<64xf32>
    %283 = vector.multi_reduction <add>, %282, %cst_52 [1] : vector<64x64xf32> to vector<64xf32>
    %284 = vector.shape_cast %283 : vector<64xf32> to vector<64x1xf32>
    %285 = tpu.reciprocal %284 {approx = true} : vector<64x1xf32> -> vector<64x1xf32>
    %286 = vector.broadcast %285 : vector<64x1xf32> to vector<64x64xf32>
    %287 = arith.mulf %282, %286 : vector<64x64xf32>
    %cst_53 = arith.constant dense<0.000000e+00> : vector<64x8xf32>
    %288 = tpu.matmul %287, %274, %cst_53 {dimension_numbers = #tpu.dot_dimension_numbers<[1], [0], [0], [1], [0, 0, 1, 1], [], []>} : vector<64x64xf32>, vector<64x8xf32>, vector<64x8xf32> -> vector<64x8xf32>
    %289 = vector.extract_strided_slice %250 {offsets = [8, 0], sizes = [8, 32], strides = [1, 1]} : vector<32x32xf32> to vector<8x32xf32>
    %cst_54 = arith.constant dense<0.000000e+00> : vector<64x32xf32>
    %290 = tpu.matmul %288, %289, %cst_54 {dimension_numbers = #tpu.dot_dimension_numbers<[1], [0], [0], [1], [0, 0, 1, 1], [], []>} : vector<64x8xf32>, vector<8x32xf32>, vector<64x32xf32> -> vector<64x32xf32>
    %291 = arith.addf %271, %290 : vector<64x32xf32>
    %292 = vector.extract_strided_slice %233 {offsets = [0, 16], sizes = [64, 8], strides = [1, 1]} : vector<64x32xf32> to vector<64x8xf32>
    %293 = vector.extract_strided_slice %241 {offsets = [0, 16], sizes = [64, 8], strides = [1, 1]} : vector<64x32xf32> to vector<64x8xf32>
    %294 = vector.extract_strided_slice %249 {offsets = [0, 16], sizes = [64, 8], strides = [1, 1]} : vector<64x32xf32> to vector<64x8xf32>
    %cst_55 = arith.constant dense<0.000000e+00> : vector<64x64xf32>
    %295 = tpu.matmul %292, %293, %cst_55 {dimension_numbers = #tpu.dot_dimension_numbers<[1], [1], [0], [0], [0, 0, 1, 0], [], []>} : vector<64x8xf32>, vector<64x8xf32>, vector<64x64xf32> -> vector<64x64xf32>
    %cst_56 = arith.constant 0.353553385 : f32
    %296 = vector.broadcast %cst_56 : f32 to vector<64x64xf32>
    %297 = arith.mulf %295, %296 : vector<64x64xf32>
    %cst_57 = arith.constant dense<0xFF800000> : vector<64xf32>
    %298 = vector.multi_reduction <maximumf>, %297, %cst_57 [1] : vector<64x64xf32> to vector<64xf32>
    %299 = vector.shape_cast %298 : vector<64xf32> to vector<64x1xf32>
    %300 = vector.broadcast %299 : vector<64x1xf32> to vector<64x64xf32>
    %301 = arith.subf %297, %300 : vector<64x64xf32>
    %302 = math.exp %301 : vector<64x64xf32>
    %cst_58 = arith.constant dense<0.000000e+00> : vector<64xf32>
    %303 = vector.multi_reduction <add>, %302, %cst_58 [1] : vector<64x64xf32> to vector<64xf32>
    %304 = vector.shape_cast %303 : vector<64xf32> to vector<64x1xf32>
    %305 = tpu.reciprocal %304 {approx = true} : vector<64x1xf32> -> vector<64x1xf32>
    %306 = vector.broadcast %305 : vector<64x1xf32> to vector<64x64xf32>
    %307 = arith.mulf %302, %306 : vector<64x64xf32>
    %cst_59 = arith.constant dense<0.000000e+00> : vector<64x8xf32>
    %308 = tpu.matmul %307, %294, %cst_59 {dimension_numbers = #tpu.dot_dimension_numbers<[1], [0], [0], [1], [0, 0, 1, 1], [], []>} : vector<64x64xf32>, vector<64x8xf32>, vector<64x8xf32> -> vector<64x8xf32>
    %309 = vector.extract_strided_slice %250 {offsets = [16, 0], sizes = [8, 32], strides = [1, 1]} : vector<32x32xf32> to vector<8x32xf32>
    %cst_60 = arith.constant dense<0.000000e+00> : vector<64x32xf32>
    %310 = tpu.matmul %308, %309, %cst_60 {dimension_numbers = #tpu.dot_dimension_numbers<[1], [0], [0], [1], [0, 0, 1, 1], [], []>} : vector<64x8xf32>, vector<8x32xf32>, vector<64x32xf32> -> vector<64x32xf32>
    %311 = arith.addf %291, %310 : vector<64x32xf32>
    %312 = vector.extract_strided_slice %233 {offsets = [0, 24], sizes = [64, 8], strides = [1, 1]} : vector<64x32xf32> to vector<64x8xf32>
    %313 = vector.extract_strided_slice %241 {offsets = [0, 24], sizes = [64, 8], strides = [1, 1]} : vector<64x32xf32> to vector<64x8xf32>
    %314 = vector.extract_strided_slice %249 {offsets = [0, 24], sizes = [64, 8], strides = [1, 1]} : vector<64x32xf32> to vector<64x8xf32>
    %cst_61 = arith.constant dense<0.000000e+00> : vector<64x64xf32>
    %315 = tpu.matmul %312, %313, %cst_61 {dimension_numbers = #tpu.dot_dimension_numbers<[1], [1], [0], [0], [0, 0, 1, 0], [], []>} : vector<64x8xf32>, vector<64x8xf32>, vector<64x64xf32> -> vector<64x64xf32>
    %cst_62 = arith.constant 0.353553385 : f32
    %316 = vector.broadcast %cst_62 : f32 to vector<64x64xf32>
    %317 = arith.mulf %315, %316 : vector<64x64xf32>
    %cst_63 = arith.constant dense<0xFF800000> : vector<64xf32>
    %318 = vector.multi_reduction <maximumf>, %317, %cst_63 [1] : vector<64x64xf32> to vector<64xf32>
    %319 = vector.shape_cast %318 : vector<64xf32> to vector<64x1xf32>
    %320 = vector.broadcast %319 : vector<64x1xf32> to vector<64x64xf32>
    %321 = arith.subf %317, %320 : vector<64x64xf32>
    %322 = math.exp %321 : vector<64x64xf32>
    %cst_64 = arith.constant dense<0.000000e+00> : vector<64xf32>
    %323 = vector.multi_reduction <add>, %322, %cst_64 [1] : vector<64x64xf32> to vector<64xf32>
    %324 = vector.shape_cast %323 : vector<64xf32> to vector<64x1xf32>
    %325 = tpu.reciprocal %324 {approx = true} : vector<64x1xf32> -> vector<64x1xf32>
    %326 = vector.broadcast %325 : vector<64x1xf32> to vector<64x64xf32>
    %327 = arith.mulf %322, %326 : vector<64x64xf32>
    %cst_65 = arith.constant dense<0.000000e+00> : vector<64x8xf32>
    %328 = tpu.matmul %327, %314, %cst_65 {dimension_numbers = #tpu.dot_dimension_numbers<[1], [0], [0], [1], [0, 0, 1, 1], [], []>} : vector<64x64xf32>, vector<64x8xf32>, vector<64x8xf32> -> vector<64x8xf32>
    %329 = vector.extract_strided_slice %250 {offsets = [24, 0], sizes = [8, 32], strides = [1, 1]} : vector<32x32xf32> to vector<8x32xf32>
    %cst_66 = arith.constant dense<0.000000e+00> : vector<64x32xf32>
    %330 = tpu.matmul %328, %329, %cst_66 {dimension_numbers = #tpu.dot_dimension_numbers<[1], [0], [0], [1], [0, 0, 1, 1], [], []>} : vector<64x8xf32>, vector<8x32xf32>, vector<64x32xf32> -> vector<64x32xf32>
    %331 = arith.addf %311, %330 : vector<64x32xf32>
    %c0_67 = arith.constant 0 : index
    %c0_68 = arith.constant 0 : index
    %332 = vector.load %arg9[%c0_67, %c0_68] : memref<1x32xf32, #tpu.memory_space<vmem>>, vector<1x32xf32>
    %333 = vector.broadcast %332 : vector<1x32xf32> to vector<64x32xf32>
    %334 = arith.addf %331, %333 : vector<64x32xf32>
    %335 = arith.addf %1, %334 : vector<64x32xf32>
    %c0_69 = arith.constant 0 : index
    %c0_70 = arith.constant 0 : index
    %c0_71 = arith.constant 0 : index
    %336 = vector.load %arg10[%c0_69, %c0_70, %c0_71] : memref<1x64x32xf32, #tpu.memory_space<vmem>>, vector<1x64x32xf32>
    %337 = vector.shape_cast %336 : vector<1x64x32xf32> to vector<64x32xf32>
    %338 = vector.shape_cast %335 : vector<64x32xf32> to vector<1x64x32xf32>
    tpu.vector_store %arg10[%c0_69, %c0_70, %c0_71], %338 {strides = array<i32>} : memref<1x64x32xf32, #tpu.memory_space<vmem>>, vector<1x64x32xf32>,
    return
  }
  func.func @transform_0(%arg0: i32) -> (i32, i32, i32) {
    %c0_i32 = arith.constant 0 : i32
    %c0_i32_0 = arith.constant 0 : i32
    %c0_i32_1 = arith.constant 0 : i32
    return %arg0, %c0_i32, %c0_i32_0 : i32, i32, i32
  }
  func.func @transform_1(%arg0: i32) -> (i32, i32) {
    %c0_i32 = arith.constant 0 : i32
    %c0_i32_0 = arith.constant 0 : i32
    %c0_i32_1 = arith.constant 0 : i32
    return %c0_i32, %c0_i32_0 : i32, i32
  }
  func.func @transform_2(%arg0: i32) -> (i32, i32) {
    %c0_i32 = arith.constant 0 : i32
    %c0_i32_0 = arith.constant 0 : i32
    %c0_i32_1 = arith.constant 0 : i32
    return %c0_i32, %c0_i32_0 : i32, i32
  }
  func.func @transform_3(%arg0: i32) -> (i32, i32, i32, i32) {
    %c0_i32 = arith.constant 0 : i32
    %c0_i32_0 = arith.constant 0 : i32
    %c0_i32_1 = arith.constant 0 : i32
    %c0_i32_2 = arith.constant 0 : i32
    %c0_i32_3 = arith.constant 0 : i32
    return %c0_i32, %c0_i32_0, %c0_i32_1, %c0_i32_2 : i32, i32, i32, i32
  }
  func.func @transform_4(%arg0: i32) -> (i32, i32) {
    %c0_i32 = arith.constant 0 : i32
    %c0_i32_0 = arith.constant 0 : i32
    %c0_i32_1 = arith.constant 0 : i32
    return %c0_i32, %c0_i32_0 : i32, i32
  }
  func.func @transform_5(%arg0: i32) -> (i32, i32, i32) {
    %c0_i32 = arith.constant 0 : i32
    %c0_i32_0 = arith.constant 0 : i32
    %c0_i32_1 = arith.constant 0 : i32
    %c0_i32_2 = arith.constant 0 : i32
    return %c0_i32, %c0_i32_0, %c0_i32_1 : i32, i32, i32
  }
  func.func @transform_6(%arg0: i32) -> (i32, i32) {
    %c0_i32 = arith.constant 0 : i32
    %c0_i32_0 = arith.constant 0 : i32
    %c0_i32_1 = arith.constant 0 : i32
    return %c0_i32, %c0_i32_0 : i32, i32
  }
  func.func @transform_7(%arg0: i32) -> (i32, i32) {
    %c0_i32 = arith.constant 0 : i32
    %c0_i32_0 = arith.constant 0 : i32
    %c0_i32_1 = arith.constant 0 : i32
    return %c0_i32, %c0_i32_0 : i32, i32
  }
  func.func @transform_8(%arg0: i32) -> (i32, i32) {
    %c0_i32 = arith.constant 0 : i32
    %c0_i32_0 = arith.constant 0 : i32
    %c0_i32_1 = arith.constant 0 : i32
    return %c0_i32, %c0_i32_0 : i32, i32
  }
  func.func @transform_9(%arg0: i32) -> (i32, i32, i32) {
    %c0_i32 = arith.constant 0 : i32
    %c0_i32_0 = arith.constant 0 : i32
    %c0_i32_1 = arith.constant 0 : i32
    return %arg0, %c0_i32, %c0_i32_0 : i32, i32, i32
  }
}

</mosaic_0001>

<bundles_post_ra>
// kernel: transformer_forward.5
= control target key start
LH: loop header
LB: loop body
LE: loop exit
PB: predicated region body
PF: predicated region fallthrough
CT: control target
= control target key end

     0   :  { %s1048_s24 = smov 0   ;;  %s1240_s0 = inlined_call_operand.vmem [shape: f32[2,64,32], index: 0, kind: input, shape index: {}]   ;;  %s1241_s1 = inlined_call_operand.vmem [shape: f32[1,32], index: 1, kind: input, shape index: {}]   ;;  %s1242_s2 = inlined_call_operand.vmem [shape: f32[1,32], index: 2, kind: input, shape index: {}]   ;;  %s1243_s3 = inlined_call_operand.vmem [shape: f32[32,64], index: 3, kind: input, shape index: {}]   ;;  %s1244_s4 = inlined_call_operand.vmem [shape: f32[1,64], index: 4, kind: input, shape index: {}]   ;;  %s1245_s5 = inlined_call_operand.vmem [shape: f32[64,32], index: 5, kind: input, shape index: {}]   ;;  %s1246_s6 = inlined_call_operand.vmem [shape: f32[1,32], index: 6, kind: input, shape index: {}]   ;;  %s1247_s7 = inlined_call_operand.vmem [shape: f32[2,64,32], index: 7, kind: output, shape index: {}]  }
   0x1 LB: > { %s819_s25 = sadd.s32 4294967295, %s1006_s24   ;;  %p823_p0 = scmp.ge.s32.totalorder %s1006_s24, 1  ;;  %s1006_s24 = sphi %s1048_s24, %s17_s24  }
   0x2   : > { %p237_p1 = scmp.lt.s32.totalorder %s1006_s24, 3 }
   0x4   : > { %p238_p2 = pnand %p823_p0, %p237_p1 }
   0x5   : > { %p269_p3 = scmp.lt.s32.totalorder (!%p238_p2), %s819_s25, 1  ;;  %vm289_vm0 = vcmask (!%p238_p2), 261120   ;;  %v423_v56 = vld [vmem:[%s1243_s3] sm:$0xff] (!%p238_p2)  ;;  %v424_v57 = vld [vmem:[%s1243_s3 + $0x8] sm:$0xff] (!%p238_p2)  ;;  %v425_v59 = vld [vmem:[%s1243_s3 + $0x10] sm:$0xff] (!%p238_p2)  ;;  %vm618_vm1 = vcmask (!%p238_p2), 523264  }
   0x6   : > { %241 = sbr.rel (%p238_p2) target bundleno = 797 (0x31d), region = 48  ;;  %v928_v58 = vpack.c.bf16 (!%p238_p2), %v424_v57, %v423_v56  ;;  %v426_v60 = vld [vmem:[%s1243_s3 + $0x18] sm:$0xff] (!%p238_p2) }
   0x7   : > { %v932_v61 = vpack.c.bf16 (!%p238_p2), %v426_v60, %v425_v59 }
   0x8   : > { %929 = vmatprep.subr.bf16.mxu0 (!%p238_p2), %v928_v58 }
   0x9   : > { %931 = vmatpush3.bf16.msra.mxu0 (!%p238_p2), %v928_v58 }
   0xa   : > { %933 = vmatprep.subr.bf16.mxu0 (!%p238_p2), %v932_v61 }
   0xd   : > { %s1249_s25 = smov (!%p269_p3, %s819_s25), 1  ;;  %935 = vmatpush3.bf16.msra.mxu0 %v932_v61 }
   0xe   : > { %s850_s26 = sshll.u32 %s1249_s25, 6 }
   0xf   : > { %s273_s29 = scalar_lea.vmem %s1240_s0, %s850_s26  ;;  %s278_s21 = scalar_lea.vmem %s1247_s7, %s850_s26 }
  0x10   : > { %v1064_v0 = vld [vmem:[%s273_s29] sm:$0xff]  ;;  %v1066_v1 = vld [vmem:[%s273_s29 + $0x10] sm:$0xff]  ;;  %v1068_v2 = vld [vmem:[%s273_s29 + $0x8] sm:$0xff] }
  0x11   : > { %v290_v3 = vsel %vm289_vm0, %v1064_v0, 0.0  ;;  %v296_v4 = vsel %vm289_vm0, %v1066_v1, 0.0  ;;  %v1074_v5 = vld [vmem:[%s273_s29 + $0x18] sm:$0xff]  ;;  %v293_v6 = vsel %vm289_vm0, %v1068_v2, 0.0  ;;  %v1080_v8 = vld [vmem:[%s273_s29 + $0x20] sm:$0xff]  ;;  %v1082_v9 = vld [vmem:[%s273_s29 + $0x28] sm:$0xff] }
  0x12   : > { %291 = vadd.xlane.f32.xlu0 %v290_v3  ;;  %297 = vadd.xlane.f32.xlu1 %v296_v4  ;;  %v299_v7 = vsel %vm289_vm0, %v1074_v5, 0.0  ;;  %v302_v10 = vsel %vm289_vm0, %v1080_v8, 0.0  ;;  %v305_v11 = vsel %vm289_vm0, %v1082_v9, 0.0  ;;  %v1088_v12 = vld [vmem:[%s273_s29 + $0x30] sm:$0xff]  ;;  %v1090_v13 = vld [vmem:[%s273_s29 + $0x38] sm:$0xff] }
  0x13   : > { %v308_v14 = vsel %vm289_vm0, %v1088_v12, 0.0  ;;  %v311_v15 = vsel %vm289_vm0, %v1090_v13, 0.0 }
  0x16   : > { %294 = vadd.xlane.f32.xlu0 %v293_v6  ;;  %300 = vadd.xlane.f32.xlu1 %v299_v7 }
  0x1a   : > { %303 = vadd.xlane.f32.xlu0 %v302_v10  ;;  %306 = vadd.xlane.f32.xlu1 %v305_v11 }
  0x1e   : > { %309 = vadd.xlane.f32.xlu0 %v308_v14  ;;  %312 = vadd.xlane.f32.xlu1 %v311_v15 }
  0x9f   : > { %v292_v16 = vpop.xlane.xlu0 %291  ;;  %v298_v17 = vpop.xlane.xlu1 %297 }
  0xa0   : > { %v315_v18 = vmul.f32 0.03125, %v292_v16  ;;  %v317_v19 = vmul.f32 0.03125, %v298_v17 }
  0xa2   : > { %v1097_v20 = vsub.f32 %v1064_v0, %v315_v18  ;;  %v1100_v21 = vsub.f32 %v1066_v1, %v317_v19 }
  0xa3   : > { %v295_v22 = vpop.xlane.xlu0 %294  ;;  %v301_v23 = vpop.xlane.xlu1 %300 }
  0xa4   : > { %v316_v24 = vmul.f32 0.03125, %v295_v22  ;;  %v318_v25 = vmul.f32 0.03125, %v301_v23  ;;  %v331_v26 = vmul.f32 %v1097_v20, %v1097_v20  ;;  %v333_v27 = vmul.f32 %v1100_v21, %v1100_v21 }
  0xa6   : > { %v1107_v28 = vsub.f32 %v1068_v2, %v316_v24  ;;  %v1110_v29 = vsub.f32 %v1074_v5, %v318_v25  ;;  %v339_v30 = vsel %vm289_vm0, %v331_v26, 0.0  ;;  %v345_v33 = vsel %vm289_vm0, %v333_v27, 0.0 }
  0xa7   : > { %340 = vadd.xlane.f32.xlu0 %v339_v30  ;;  %v304_v31 = vpop.xlane.xlu0 %303  ;;  %v307_v32 = vpop.xlane.xlu1 %306 }
  0xa8   : > { %v319_v34 = vmul.f32 0.03125, %v304_v31  ;;  %v320_v35 = vmul.f32 0.03125, %v307_v32  ;;  %v332_v36 = vmul.f32 %v1107_v28, %v1107_v28  ;;  %v334_v37 = vmul.f32 %v1110_v29, %v1110_v29  ;;  %v828_v32 = vld [vmem:[%s1241_s1] ss:$0 sm:$0xff] }
  0xaa   : > { %v1119_v38 = vsub.f32 %v1080_v8, %v319_v34  ;;  %v1122_v39 = vsub.f32 %v1082_v9, %v320_v35  ;;  %v342_v40 = vsel %vm289_vm0, %v332_v36, 0.0  ;;  %v348_v43 = vsel %vm289_vm0, %v334_v37, 0.0  ;;  %v829_v36 = vld [vmem:[%s1242_s2] ss:$0 sm:$0xff] }
  0xab   : > { %346 = vadd.xlane.f32.xlu0 %v345_v33  ;;  %343 = vadd.xlane.f32.xlu1 %v342_v40  ;;  %v310_v41 = vpop.xlane.xlu0 %309  ;;  %v313_v42 = vpop.xlane.xlu1 %312 }
  0xac   : > { %v321_v44 = vmul.f32 0.03125, %v310_v41  ;;  %v322_v45 = vmul.f32 0.03125, %v313_v42  ;;  %v335_v46 = vmul.f32 %v1119_v38, %v1119_v38  ;;  %v336_v47 = vmul.f32 %v1122_v39, %v1122_v39 }
  0xae   : > { %v1131_v48 = vsub.f32 %v1088_v12, %v321_v44  ;;  %v1134_v49 = vsub.f32 %v1090_v13, %v322_v45  ;;  %v351_v50 = vsel %vm289_vm0, %v335_v46, 0.0  ;;  %v354_v51 = vsel %vm289_vm0, %v336_v47, 0.0 }
  0xaf   : > { %349 = vadd.xlane.f32.xlu1 %v348_v43  ;;  %352 = vadd.xlane.f32.xlu0 %v351_v50 }
  0xb0   : > { %v337_v52 = vmul.f32 %v1131_v48, %v1131_v48  ;;  %v338_v53 = vmul.f32 %v1134_v49, %v1134_v49 }
  0xb2   : > { %v357_v54 = vsel %vm289_vm0, %v337_v52, 0.0  ;;  %v360_v55 = vsel %vm289_vm0, %v338_v53, 0.0 }
  0xb3   : > { %355 = vadd.xlane.f32.xlu1 %v354_v51  ;;  %358 = vadd.xlane.f32.xlu0 %v357_v54 }
  0xb7   : > { %361 = vadd.xlane.f32.xlu1 %v360_v55 }
 0x134   : > { %v341_v62 = vpop.xlane.xlu0 %340 }
 0x135   : > { %v363_v63 = vmul.f32 0.03125, %v341_v62 }
 0x137   : > { %v371_v3 = vadd.f32 1e-05, %v363_v63 }
 0x138   : > { %v344_v4 = vpop.xlane.xlu1 %343  ;;  %v347_v6 = vpop.xlane.xlu0 %346 }
 0x139   : > { %968 = vrsqrt.f32 %v371_v3  ;;  %v364_v7 = vmul.f32 0.03125, %v344_v4  ;;  %v365_v10 = vmul.f32 0.03125, %v347_v6  ;;  %v604_v6 = vld [vmem:[%s1245_s5 + $0x8] sm:$0xff] }
 0x13b   : > { %v372_v11 = vadd.f32 1e-05, %v364_v7  ;;  %v373_v14 = vadd.f32 1e-05, %v365_v10  ;;  %v606_v10 = vld [vmem:[%s1245_s5 + $0x18] sm:$0xff] }
 0x13c   : > { %v350_v15 = vpop.xlane.xlu1 %349  ;;  %v353_v16 = vpop.xlane.xlu0 %352 }
 0x13d   : > { %970 = vrsqrt.f32 %v372_v11  ;;  %v366_v17 = vmul.f32 0.03125, %v350_v15  ;;  %v367_v18 = vmul.f32 0.03125, %v353_v16  ;;  %v608_v15 = vld [vmem:[%s1245_s5 + $0x28] sm:$0xff] }
 0x13e   : > { %972 = vrsqrt.f32 %v373_v14  ;;  %v607_v14 = vld [vmem:[%s1245_s5 + $0x20] sm:$0xff] }
 0x13f   : > { %v374_v19 = vadd.f32 1e-05, %v366_v17  ;;  %v375_v22 = vadd.f32 1e-05, %v367_v18  ;;  %v944_v16 = vpack.c.bf16 %v608_v15, %v607_v14  ;;  %v609_v17 = vld [vmem:[%s1245_s5 + $0x30] sm:$0xff]  ;;  %v610_v18 = vld [vmem:[%s1245_s5 + $0x38] sm:$0xff] }
 0x140   : > { %v356_v23 = vpop.xlane.xlu1 %355  ;;  %v359_v24 = vpop.xlane.xlu0 %358 }
 0x141   : > { %974 = vrsqrt.f32 %v374_v19  ;;  %v368_v25 = vmul.f32 0.03125, %v356_v23  ;;  %v369_v26 = vmul.f32 0.03125, %v359_v24  ;;  %v948_v19 = vpack.c.bf16 %v610_v18, %v609_v17 }
 0x142   : > { %976 = vrsqrt.f32 %v375_v22  ;;  %v830_v22 = vld [vmem:[%s1244_s4] ss:$0 sm:$0xff] }
 0x143   : > { %v969_v27 = vpop.eup %968  ;;  %v376_v30 = vadd.f32 1e-05, %v368_v25  ;;  %v377_v31 = vadd.f32 1e-05, %v369_v26 }
 0x144   : > { %v362_v33 = vpop.xlane.xlu1 %361  ;;  %v387_v34 = vmul.f32 %v969_v27, %v1097_v20 }
 0x145   : > { %978 = vrsqrt.f32 %v376_v30  ;;  %v370_v35 = vmul.f32 0.03125, %v362_v33 }
 0x146   : > { %980 = vrsqrt.f32 %v377_v31  ;;  %v401_v37 = vmul.f32 %v828_v32, %v387_v34 }
 0x147   : > { %v971_v40 = vpop.eup %970  ;;  %v378_v41 = vadd.f32 1e-05, %v370_v35 }
 0x148   : > { %v973_v42 = vpop.eup %972  ;;  %v415_v43 = vadd.f32 %v829_v36, %v401_v37  ;;  %v388_v44 = vmul.f32 %v971_v40, %v1107_v28 }
 0x149   : > { %982 = vrsqrt.f32 %v378_v41  ;;  %v389_v45 = vmul.f32 %v973_v42, %v1100_v21 }
 0x14a   : > { %888 = vmatprep.mubr.msk.f32.mxu0 %vm289_vm0, %v415_v43  ;;  %v402_v20 = vmul.f32 %v828_v32, %v388_v44 }
 0x14b   : > { %v975_v46 = vpop.eup %974  ;;  %v403_v47 = vmul.f32 %v828_v32, %v389_v45 }
 0x14c   : > { %v977_v50 = vpop.eup %976  ;;  %v416_v51 = vadd.f32 %v829_v36, %v402_v20  ;;  %v390_v52 = vmul.f32 %v975_v46, %v1110_v29 }
 0x14d   : > { %v417_v53 = vadd.f32 %v829_v36, %v403_v47  ;;  %v391_v54 = vmul.f32 %v977_v50, %v1119_v38 }
 0x14e   : > { %889 = vmatmul.mubr.msk.f32.vlgmr.msra.gmra.mrb[0].mxu0 %vm289_vm0, %v416_v51  ;;  %v404_v55 = vmul.f32 %v828_v32, %v390_v52 }
 0x14f   : > { %v979_v56 = vpop.eup %978  ;;  %891 = vmatprep.mubr.msk.f32.mxu0 %vm289_vm0, %v417_v53  ;;  %v405_v28 = vmul.f32 %v828_v32, %v391_v54 }
 0x150   : > { %v981_v21 = vpop.eup %980  ;;  %v418_v57 = vadd.f32 %v829_v36, %v404_v55  ;;  %v392_v58 = vmul.f32 %v979_v56, %v1122_v39 }
 0x151   : > { %v419_v59 = vadd.f32 %v829_v36, %v405_v28  ;;  %v393_v60 = vmul.f32 %v981_v21, %v1131_v48  ;;  %v603_v48 = vld [vmem:[%s1245_s5] sm:$0xff] }
 0x152   : > { %892 = vmatmul.mubr.msk.f32.gmra.mrb[2].mxu0 %vm289_vm0, %v418_v57  ;;  %v406_v29 = vmul.f32 %v828_v32, %v392_v58  ;;  %v936_v7 = vpack.c.bf16 %v604_v6, %v603_v48 }
 0x153   : > { %v983_v61 = vpop.eup %982  ;;  %894 = vmatprep.mubr.msk.f32.mxu0 %vm289_vm0, %v419_v59  ;;  %v407_v38 = vmul.f32 %v828_v32, %v393_v60 }
 0x154   : > { %v420_v62 = vadd.f32 %v829_v36, %v406_v29  ;;  %v394_v63 = vmul.f32 %v983_v61, %v1134_v49  ;;  %937 = vmatprep.subr.bf16.mxu0 %v936_v7  ;;  %952 = vmatprep.subr.bf16.mxu1 %v936_v7  ;;  %v605_v49 = vld [vmem:[%s1245_s5 + $0x10] sm:$0xff] }
 0x155   : > { %v421_v3 = vadd.f32 %v829_v36, %v407_v38  ;;  %939 = vmatpush3.bf16.msra.mxu0 %v936_v7  ;;  %956 = vmatpush3.bf16.msra.mxu1 %v936_v7  ;;  %v940_v11 = vpack.c.bf16 %v606_v10, %v605_v49 }
 0x156   : > { %895 = vmatmul.mubr.msk.f32.gmra.mrb[4].mxu0 %vm289_vm0, %v420_v62  ;;  %v408_v4 = vmul.f32 %v828_v32, %v394_v63 }
 0x157   : > { %897 = vmatprep.mubr.msk.f32.mxu0 %vm289_vm0, %v421_v3  ;;  %941 = vmatprep.subr.bf16.mxu0 %v940_v11 }
 0x158   : > { %v422_v39 = vadd.f32 %v829_v36, %v408_v4  ;;  %953 = vmatprep.subr.bf16.mxu1 %v940_v11 }
 0x159   : > { %943 = vmatpush3.bf16.msra.mxu0 %v940_v11  ;;  %957 = vmatpush3.bf16.msra.mxu1 %v940_v11 }
 0x15a   : > { %898 = vmatmul.mubr.msk.f32.gmra.mrb[6].mxu0 %vm289_vm0, %v422_v39  ;;  %945 = vmatprep.subr.bf16.mxu0 %v944_v16 }
 0x15b   : > { %954 = vmatprep.subr.bf16.mxu1 %v944_v16 }
 0x15d   : > { %947 = vmatpush3.bf16.msra.mxu0 %v944_v16  ;;  %958 = vmatpush3.bf16.msra.mxu1 %v944_v16 }
 0x15e   : > { %949 = vmatprep.subr.bf16.mxu0 %v948_v19  ;;  %955 = vmatprep.subr.bf16.mxu1 %v948_v19 }
 0x161   : > { %951 = vmatpush3.bf16.msra.mxu0 %v948_v19  ;;  %959 = vmatpush3.bf16.msra.mxu1 %v948_v19 }
 0x221   : > { %v890_v23 = vpop.f32.mrb[0].mxu0 }
 0x222   : > { %v530_v24 = vadd.f32 %v890_v23, %v830_v22  ;;  %v524_v25 = vpop.f32.mrb[1].mxu0  ;;  %v839_v23 = vld [vmem:[%s1246_s6] ss:$0 sm:$0xff] }
 0x223   : > { %v525_v26 = vadd.f32 %v830_v22, %v524_v25 }
 0x224   : > { %v572_v27 = vmul.f32 0.70710677, %v530_v24  ;;  %v564_v28 = vmul.f32 0.5, %v530_v24 }
 0x225   : > { %v571_v30 = vmul.f32 0.70710677, %v525_v26  ;;  %v893_v31 = vpop.f32.mrb[2].mxu0  ;;  %v563_v55 = vmul.f32 0.5, %v525_v26 }
 0x226   : > { %984 = verf.f32 %v572_v27  ;;  %v540_v32 = vadd.f32 %v893_v31, %v830_v22  ;;  %v534_v33 = vpop.f32.mrb[3].mxu0 }
 0x227   : > { %986 = verf.f32 %v571_v30  ;;  %v535_v34 = vadd.f32 %v830_v22, %v534_v33 }
 0x228   : > { %v574_v35 = vmul.f32 0.70710677, %v540_v32  ;;  %v566_v38 = vmul.f32 0.5, %v540_v32 }
 0x229   : > { %v573_v36 = vmul.f32 0.70710677, %v535_v34  ;;  %v896_v37 = vpop.f32.mrb[4].mxu0  ;;  %v565_v29 = vmul.f32 0.5, %v535_v34 }
 0x22a   : > { %988 = verf.f32 %v574_v35  ;;  %v550_v40 = vadd.f32 %v896_v37, %v830_v22  ;;  %v544_v41 = vpop.f32.mrb[5].mxu0 }
 0x22b   : > { %990 = verf.f32 %v573_v36  ;;  %v545_v42 = vadd.f32 %v830_v22, %v544_v41 }
 0x22c   : > { %v576_v43 = vmul.f32 0.70710677, %v550_v40  ;;  %v568_v7 = vmul.f32 0.5, %v550_v40 }
 0x22d   : > { %v575_v44 = vmul.f32 0.70710677, %v545_v42  ;;  %v899_v45 = vpop.f32.mrb[6].mxu0  ;;  %v567_v48 = vmul.f32 0.5, %v545_v42 }
 0x22e   : > { %992 = verf.f32 %v576_v43  ;;  %v560_v20 = vadd.f32 %v899_v45, %v830_v22  ;;  %v554_v46 = vpop.f32.mrb[7].mxu0 }
 0x22f   : > { %994 = verf.f32 %v575_v44  ;;  %v555_v47 = vadd.f32 %v830_v22, %v554_v46 }
 0x230   : > { %v985_v50 = vpop.eup %984  ;;  %v578_v51 = vmul.f32 0.70710677, %v560_v20  ;;  %v570_v18 = vmul.f32 0.5, %v560_v20 }
 0x231   : > { %v987_v52 = vpop.eup %986  ;;  %v588_v53 = vadd.f32 1.0, %v985_v50  ;;  %v577_v54 = vmul.f32 0.70710677, %v555_v47  ;;  %v569_v16 = vmul.f32 0.5, %v555_v47 }
 0x232   : > { %v587_v56 = vadd.f32 1.0, %v987_v52  ;;  %996 = verf.f32 %v578_v51 }
 0x233   : > { %998 = verf.f32 %v577_v54  ;;  %v596_v59 = vmul.f32 %v588_v53, %v564_v28 }
 0x234   : > { %v989_v21 = vpop.eup %988  ;;  %v595_v57 = vmul.f32 %v587_v56, %v563_v55 }
 0x235   : > { %v991_v58 = vpop.eup %990  ;;  %v590_v60 = vadd.f32 1.0, %v989_v21 }
 0x236   : > { %916 = vmatprep.mubr.msk.f32.mxu0 %vm618_vm1, %v595_v57  ;;  %v589_v61 = vadd.f32 1.0, %v991_v58 }
 0x237   : > { %917 = vmatmul.mubr.msk.f32.vlgmr.msra.gmra.mrb[8].mxu0 %vm618_vm1, %v596_v59  ;;  %v598_v4 = vmul.f32 %v590_v60, %v566_v38 }
 0x238   : > { %v993_v62 = vpop.eup %992  ;;  %v597_v63 = vmul.f32 %v589_v61, %v565_v29 }
 0x239   : > { %v995_v3 = vpop.eup %994  ;;  %v592_v39 = vadd.f32 1.0, %v993_v62 }
 0x23a   : > { %v591_v6 = vadd.f32 1.0, %v995_v3  ;;  %919 = vmatprep.mubr.msk.f32.mxu1 %vm618_vm1, %v597_v63 }
 0x23b   : > { %920 = vmatmul.mubr.msk.f32.vlgmr.msra.gmra.mrb[0].mxu1 %vm618_vm1, %v598_v4  ;;  %v600_v14 = vmul.f32 %v592_v39, %v568_v7 }
 0x23c   : > { %v997_v49 = vpop.eup %996  ;;  %v599_v10 = vmul.f32 %v591_v6, %v567_v48 }
 0x23d   : > { %v999_v11 = vpop.eup %998  ;;  %v594_v15 = vadd.f32 1.0, %v997_v49 }
 0x23e   : > { %v593_v17 = vadd.f32 1.0, %v999_v11  ;;  %922 = vmatprep.mubr.msk.f32.mxu1 %vm618_vm1, %v599_v10 }
 0x23f   : > { %923 = vmatmul.mubr.msk.f32.gmra.mrb[2].mxu1 %vm618_vm1, %v600_v14  ;;  %v602_v22 = vmul.f32 %v594_v15, %v570_v18 }
 0x240   : > { %v601_v19 = vmul.f32 %v593_v17, %v569_v16 }
 0x242   : > { %925 = vmatprep.mubr.msk.f32.mxu1 %vm618_vm1, %v601_v19 }
 0x243   : > { %926 = vmatmul.mubr.msk.f32.gmra.mrb[4].mxu1 %vm618_vm1, %v602_v22 }
 0x30a   : > { %v918_v24 = vpop.f32.mrb[8].mxu0 }
 0x30b   : > { %v715_v25 = vadd.f32 %v918_v24, %v839_v23  ;;  %v709_v26 = vpop.f32.mrb[9].mxu0 }
 0x30c   : > { %v710_v27 = vadd.f32 %v839_v23, %v709_v26 }
 0x30d   : > { %v749_v30 = vadd.f32 %v715_v25, %v1068_v2 }
 0x30e   : > { %v748_v31 = vadd.f32 %v710_v27, %v1064_v0  ;;  %v921_v32 = vpop.f32.mrb[0].mxu1 }
 0x30f   : > { %757 = vst.msk [vmem:[%s278_s21 + $0x8] sm:$0xff] %vm289_vm0, %v749_v30  ;;  %v725_v33 = vadd.f32 %v921_v32, %v839_v23  ;;  %v719_v34 = vpop.f32.mrb[1].mxu1 }
 0x310   : > { %756 = vst.msk [vmem:[%s278_s21] sm:$0xff] %vm289_vm0, %v748_v31  ;;  %v720_v35 = vadd.f32 %v839_v23, %v719_v34 }
 0x311   : > { %v751_v36 = vadd.f32 %v725_v33, %v1074_v5 }
 0x312   : > { %v750_v37 = vadd.f32 %v720_v35, %v1066_v1  ;;  %v924_v40 = vpop.f32.mrb[2].mxu1 }
 0x313   : > { %759 = vst.msk [vmem:[%s278_s21 + $0x18] sm:$0xff] %vm289_vm0, %v751_v36  ;;  %v735_v41 = vadd.f32 %v924_v40, %v839_v23  ;;  %v729_v42 = vpop.f32.mrb[3].mxu1 }
 0x314   : > { %758 = vst.msk [vmem:[%s278_s21 + $0x10] sm:$0xff] %vm289_vm0, %v750_v37  ;;  %v730_v0 = vadd.f32 %v839_v23, %v729_v42 }
 0x315   : > { %v753_v2 = vadd.f32 %v735_v41, %v1082_v9 }
 0x316   : > { %v752_v43 = vadd.f32 %v730_v0, %v1080_v8  ;;  %v927_v44 = vpop.f32.mrb[4].mxu1 }
 0x317   : > { %761 = vst.msk [vmem:[%s278_s21 + $0x28] sm:$0xff] %vm289_vm0, %v753_v2  ;;  %v745_v45 = vadd.f32 %v927_v44, %v839_v23  ;;  %v739_v20 = vpop.f32.mrb[5].mxu1 }
 0x318   : > { %760 = vst.msk [vmem:[%s278_s21 + $0x20] sm:$0xff] %vm289_vm0, %v752_v43  ;;  %v740_v1 = vadd.f32 %v839_v23, %v739_v20 }
 0x319   : > { %v755_v5 = vadd.f32 %v745_v45, %v1090_v13 }
 0x31a   : > { %v754_v46 = vadd.f32 %v740_v1, %v1088_v12 }
 0x31b   : > { %763 = vst.msk [vmem:[%s278_s21 + $0x38] sm:$0xff] %vm289_vm0, %v755_v5 }
 0x31c   : > { %762 = vst.msk [vmem:[%s278_s21 + $0x30] sm:$0xff] %vm289_vm0, %v754_v46 }
 0x31d PF: > { %s17_s24 = sadd.s32 1, %s1006_s24  }
 0x31e   : > { %p14_p4 = scmp.ge.s32.totalorder %s17_s24, 4  }
 0x320   :  { %16 = sbr.rel (!%p14_p4) target bundleno = 1 (0x1), region = 78 }

// kernel: transformer_forward.4
= control target key start
LH: loop header
LB: loop body
LE: loop exit
PB: predicated region body
PF: predicated region fallthrough
CT: control target
= control target key end

     0   :  { %s6339_s30 = smov 0   ;;  %s8585_s0 = inlined_call_operand.vmem [shape: f32[2,64,32], index: 0, kind: input, shape index: {}]   ;;  %s8586_s1 = inlined_call_operand.vmem [shape: f32[1,32], index: 1, kind: input, shape index: {}]   ;;  %s8587_s2 = inlined_call_operand.vmem [shape: f32[1,32], index: 2, kind: input, shape index: {}]   ;;  %s8588_s3 = inlined_call_operand.vmem [shape: f32[3,3,3,32], index: 3, kind: input, shape index: {}]   ;;  %s8589_s4 = inlined_call_operand.vmem [shape: f32[3,32], index: 4, kind: input, shape index: {}]   ;;  %s8590_s5 = inlined_call_operand.vmem [shape: f32[3,32,32], index: 5, kind: input, shape index: {}]   ;;  %s8591_s6 = inlined_call_operand.vmem [shape: f32[3,32], index: 6, kind: input, shape index: {}]   ;;  %s8592_s7 = inlined_call_operand.vmem [shape: f32[32,32], index: 7, kind: input, shape index: {}]   ;;  %s8593_s8 = inlined_call_operand.vmem [shape: f32[1,32], index: 8, kind: input, shape index: {}]   ;;  %s8594_s9 = inlined_call_operand.vmem [shape: f32[2,64,32], index: 9, kind: output, shape index: {}]  }
   0x1 LB: > { %s5036_s10 = sadd.s32 4294967295, %s6283_s30   ;;  %p5040_p0 = scmp.ge.s32.totalorder %s6283_s30, 1  ;;  %s6283_s30 = sphi %s6339_s30, %s19_s30  }
   0x2   : > { %p287_p1 = scmp.lt.s32.totalorder %s6283_s30, 3 }
   0x4   : > { %p288_p2 = pnand %p5040_p0, %p287_p1 }
   0x6   : > { %291 = sbr.rel (%p288_p2) target bundleno = 2954 (0xb8a), region = 56 }
   0xd   : > { %p323_p3 = scmp.lt.s32.totalorder %s5036_s10, 1  ;;  %vm343_vm0 = vcmask 261120   ;;  %v6285_v16 = vmov 0.0   ;;  %v2359_v57 = vld [vmem:[%s8590_s5] sm:$0xff]  ;;  %v2360_v58 = vld [vmem:[%s8590_s5 + $0x8] sm:$0xff]  ;;  %v2361_v63 = vld [vmem:[%s8590_s5 + $0x10] sm:$0xff] }
   0xe   : > { %481 = vst.msk [vmem:[#allocation2 + $0x20] sm:$0xff] %vm343_vm0, %v6285_v16  ;;  %477 = vst.msk [vmem:[#allocation2] sm:$0xff] %vm343_vm0, %v6285_v16  ;;  %v5055_v59 = vld [vmem:[%s8590_s5 + $0x20] sm:$0xff]  ;;  %v5752_v60 = vpack.c.bf16 %v2360_v58, %v2359_v57  ;;  %v5056_v61 = vld [vmem:[%s8590_s5 + $0x28] sm:$0xff]  ;;  %vm856_vm1 = vcmask 1045504   ;;  %vm2193_vm2 = vcmask 1040384  }
   0xf   : > { %s8848_s10 = smov (!%p323_p3, %s5036_s10), 1  ;;  %478 = vst.msk [vmem:[#allocation2 + $0x8] sm:$0xff] %vm343_vm0, %v6285_v16  ;;  %479 = vst.msk [vmem:[#allocation2 + $0x10] sm:$0xff] %vm343_vm0, %v6285_v16  ;;  %v5760_v62 = vpack.c.bf16 %v5056_v61, %v5055_v59  ;;  %vm2776_vm3 = vcmask 64512   ;;  %vm2938_vm5 = vcmask 523264   ;;  %s6286_s16 = smov 120  }
  0x10   : > { %s5210_s11 = sshll.u32 %s8848_s10, 6  ;;  %480 = vst.msk [vmem:[#allocation2 + $0x18] sm:$0xff] %vm343_vm0, %v6285_v16  ;;  %482 = vst.msk [vmem:[#allocation2 + $0x28] sm:$0xff] %vm343_vm0, %v6285_v16  ;;  %5753 = vmatprep.subr.bf16.mxu0 %v5752_v60  ;;  %s6287_s17 = smov 112  }
  0x11   : > { %s6355_s14 = scalar_lea.vmem %s8585_s0, %s5210_s11  ;;  %483 = vst.msk [vmem:[#allocation2 + $0x30] sm:$0xff] %vm343_vm0, %v6285_v16  ;;  %484 = vst.msk [vmem:[#allocation2 + $0x38] sm:$0xff] %vm343_vm0, %v6285_v16  ;;  %5761 = vmatprep.subr.bf16.mxu1 %v5760_v62  ;;  %5755 = vmatpush3.bf16.msra.mxu0 %v5752_v60  ;;  %s6288_s18 = smov 104  }
  0x12   : > { %v333_v0 = vld [vmem:[%s6355_s14] sm:$0xff]  ;;  %v335_v1 = vld [vmem:[%s6355_s14 + $0x10] sm:$0xff]  ;;  %v6360_v2 = vld [vmem:[%s6355_s14 + $0x8] sm:$0xff]  ;;  %485 = vst.msk [vmem:[#allocation2 + $0x40] sm:$0xff] %vm343_vm0, %v6285_v16  ;;  %5763 = vmatpush3.bf16.msra.mxu1 %v5760_v62  ;;  %s8556_s13 = scalar_lea.vmem %s8594_s9, %s5210_s11 }
  0x13   : > { %v344_v3 = vsel %vm343_vm0, %v333_v0, 0.0  ;;  %v350_v4 = vsel %vm343_vm0, %v335_v1, 0.0  ;;  %v6365_v5 = vld [vmem:[%s6355_s14 + $0x18] sm:$0xff]  ;;  %v347_v6 = vsel %vm343_vm0, %v6360_v2, 0.0  ;;  %v6372_v8 = vld [vmem:[%s6355_s14 + $0x20] sm:$0xff]  ;;  %v6375_v9 = vld [vmem:[%s6355_s14 + $0x28] sm:$0xff] }
  0x14   : > { %345 = vadd.xlane.f32.xlu0 %v344_v3  ;;  %351 = vadd.xlane.f32.xlu1 %v350_v4  ;;  %v353_v7 = vsel %vm343_vm0, %v6365_v5, 0.0  ;;  %v356_v10 = vsel %vm343_vm0, %v6372_v8, 0.0  ;;  %v359_v11 = vsel %vm343_vm0, %v6375_v9, 0.0  ;;  %v6382_v12 = vld [vmem:[%s6355_s14 + $0x30] sm:$0xff]  ;;  %v6385_v13 = vld [vmem:[%s6355_s14 + $0x38] sm:$0xff]  ;;  %486 = vst.msk [vmem:[#allocation2 + $0x48] sm:$0xff] %vm343_vm0, %v6285_v16  ;;  %vm7927_vm4 = vmpackc.low %vm2776_vm3, %vm2776_vm3 }
  0x15   : > { %v362_v14 = vsel %vm343_vm0, %v6382_v12, 0.0  ;;  %v365_v15 = vsel %vm343_vm0, %v6385_v13, 0.0  ;;  %487 = vst.msk [vmem:[#allocation2 + $0x50] sm:$0xff] %vm343_vm0, %v6285_v16  ;;  %488 = vst.msk [vmem:[#allocation2 + $0x58] sm:$0xff] %vm343_vm0, %v6285_v16  ;;  %v5058_v3 = vld [vmem:[%s8590_s5 + $0x38] sm:$0xff] }
  0x16   : > { %489 = vst.msk [vmem:[#allocation2 + $0x60] sm:$0xff] %vm343_vm0, %v6285_v16  ;;  %490 = vst.msk [vmem:[#allocation2 + $0x68] sm:$0xff] %vm343_vm0, %v6285_v16 }
  0x17   : > { %491 = vst.msk [vmem:[#allocation2 + $0x70] sm:$0xff] %vm343_vm0, %v6285_v16  ;;  %492 = vst.msk [vmem:[#allocation2 + $0x78] sm:$0xff] %vm343_vm0, %v6285_v16 }
  0x18   : > { %348 = vadd.xlane.f32.xlu0 %v347_v6  ;;  %354 = vadd.xlane.f32.xlu1 %v353_v7  ;;  %493 = vst.msk [vmem:[#allocation2 + $0x80] sm:$0xff] %vm343_vm0, %v6285_v16  ;;  %494 = vst.msk [vmem:[#allocation2 + $0x88] sm:$0xff] %vm343_vm0, %v6285_v16 }
  0x19   : > { %495 = vst.msk [vmem:[#allocation2 + $0x90] sm:$0xff] %vm343_vm0, %v6285_v16  ;;  %496 = vst.msk [vmem:[#allocation2 + $0x98] sm:$0xff] %vm343_vm0, %v6285_v16  ;;  %v524_v60 = vld [vmem:[#allocation2 + $0x40] sm:$0xff] }
  0x1a   : > { %497 = vst.msk [vmem:[#allocation2 + $0xa0] sm:$0xff] %vm343_vm0, %v6285_v16  ;;  %498 = vst.msk [vmem:[#allocation2 + $0xa8] sm:$0xff] %vm343_vm0, %v6285_v16 }
  0x1b   : > { %499 = vst.msk [vmem:[#allocation2 + $0xb0] sm:$0xff] %vm343_vm0, %v6285_v16  ;;  %500 = vst.msk [vmem:[#allocation2 + $0xb8] sm:$0xff] %vm343_vm0, %v6285_v16 }
  0x1c   : > { %357 = vadd.xlane.f32.xlu0 %v356_v10  ;;  %360 = vadd.xlane.f32.xlu1 %v359_v11  ;;  %501 = vst.msk [vmem:[#allocation2 + $0xc0] sm:$0xff] %vm343_vm0, %v6285_v16  ;;  %502 = vst.msk [vmem:[#allocation2 + $0xc8] sm:$0xff] %vm343_vm0, %v6285_v16 }
  0x1d   : > { %503 = vst.msk [vmem:[#allocation2 + $0xd0] sm:$0xff] %vm343_vm0, %v6285_v16  ;;  %504 = vst.msk [vmem:[#allocation2 + $0xd8] sm:$0xff] %vm343_vm0, %v6285_v16 }
  0x1e   : > { %505 = vst.msk [vmem:[#allocation2 + $0xe0] sm:$0xff] %vm343_vm0, %v6285_v16  ;;  %506 = vst.msk [vmem:[#allocation2 + $0xe8] sm:$0xff] %vm343_vm0, %v6285_v16 }
  0x20   : > { %363 = vadd.xlane.f32.xlu0 %v362_v14  ;;  %366 = vadd.xlane.f32.xlu1 %v365_v15 }
  0xa1   : > { %v346_v17 = vpop.xlane.xlu0 %345  ;;  %v352_v18 = vpop.xlane.xlu1 %351 }
  0xa2   : > { %v369_v19 = vmul.f32 0.03125, %v346_v17  ;;  %v371_v20 = vmul.f32 0.03125, %v352_v18  ;;  %v516_v17 = vld [vmem:[#allocation2] sm:$0xff]  ;;  %v518_v18 = vld [vmem:[#allocation2 + $0x10] sm:$0xff] }
  0xa4   : > { %v6421_v21 = vsub.f32 %v333_v0, %v369_v19  ;;  %v6423_v22 = vsub.f32 %v335_v1, %v371_v20  ;;  %v2362_v0 = vld [vmem:[%s8590_s5 + $0x18] sm:$0xff]  ;;  %v5057_v1 = vld [vmem:[%s8590_s5 + $0x30] sm:$0xff] }
  0xa5   : > { %v349_v23 = vpop.xlane.xlu0 %348  ;;  %v355_v24 = vpop.xlane.xlu1 %354  ;;  %v5764_v4 = vpack.c.bf16 %v5058_v3, %v5057_v1 }
  0xa6   : > { %v370_v25 = vmul.f32 0.03125, %v349_v23  ;;  %v372_v26 = vmul.f32 0.03125, %v355_v24  ;;  %v385_v27 = vmul.f32 %v6421_v21, %v6421_v21  ;;  %v387_v28 = vmul.f32 %v6423_v22, %v6423_v22  ;;  %v6525_v23 = vld [vmem:[%s8588_s3 + $0x18] sm:$0x7] }
  0xa7   : > { %5765 = vmatprep.subr.bf16.mxu1 %v5764_v4 }
  0xa8   : > { %v6430_v29 = vsub.f32 %v6360_v2, %v370_v25  ;;  %v6433_v30 = vsub.f32 %v6365_v5, %v372_v26  ;;  %v393_v31 = vsel %vm343_vm0, %v385_v27, 0.0  ;;  %v399_v34 = vsel %vm343_vm0, %v387_v28, 0.0  ;;  %5767 = vmatpush3.bf16.msra.mxu1 %v5764_v4 }
  0xa9   : > { %394 = vadd.xlane.f32.xlu0 %v393_v31  ;;  %v358_v32 = vpop.xlane.xlu0 %357  ;;  %v361_v33 = vpop.xlane.xlu1 %360  ;;  %v5756_v2 = vpack.c.bf16 %v2362_v0, %v2361_v63  ;;  %v556_v5 = vlaneseq }
  0xaa   : > { %v373_v35 = vmul.f32 0.03125, %v358_v32  ;;  %v374_v36 = vmul.f32 0.03125, %v361_v33  ;;  %v386_v37 = vmul.f32 %v6430_v29, %v6430_v29  ;;  %v388_v38 = vmul.f32 %v6433_v30, %v6433_v30  ;;  %v547_v32 = vld [vmem:[%s8588_s3 + $0x4] sm:$0x7] }
  0xab   : > { %5757 = vmatprep.subr.bf16.mxu0 %v5756_v2  ;;  %v557_v6 = vshrl.u32 %v556_v5, 7 }
  0xac   : > { %v6442_v39 = vsub.f32 %v6372_v8, %v373_v35  ;;  %v6445_v40 = vsub.f32 %v6375_v9, %v374_v36  ;;  %v396_v41 = vsel %vm343_vm0, %v386_v37, 0.0  ;;  %v402_v44 = vsel %vm343_vm0, %v388_v38, 0.0  ;;  %5759 = vmatpush3.bf16.msra.mxu0 %v5756_v2  ;;  %v546_v8 = vld [vmem:[%s8588_s3] sm:$0x7] }
  0xad   : > { %400 = vadd.xlane.f32.xlu0 %v399_v34  ;;  %397 = vadd.xlane.f32.xlu1 %v396_v41  ;;  %v364_v42 = vpop.xlane.xlu0 %363  ;;  %v367_v43 = vpop.xlane.xlu1 %366  ;;  %v6491_v7 = vsub.s32 1, %v557_v6  ;;  %v6496_v9 = vsub.s32 0, %v557_v6  ;;  %v6501_v11 = vsub.s32 2, %v557_v6  ;;  %v548_v41 = vld [vmem:[%s8588_s3 + $0x8] sm:$0x7] }
  0xae   : > { %v375_v45 = vmul.f32 0.03125, %v364_v42  ;;  %v376_v46 = vmul.f32 0.03125, %v367_v43  ;;  %v389_v47 = vmul.f32 %v6442_v39, %v6442_v39  ;;  %v390_v48 = vmul.f32 %v6445_v40, %v6445_v40 }
  0xaf   : > { %8646 = vst [vmem:[#allocation3_spill] sm:$0xff] %v6491_v7  ;;  %8647 = vst [vmem:[#allocation4_spill] sm:$0xff] %v6496_v9  ;;  %v6499_v10 = vrot.slane %v546_v8, %v6491_v7  ;;  %v6509_v14 = vrot.slane %v546_v8, %v6496_v9  ;;  %v6514_v16 = vrot.slane %v546_v8, %v6501_v11 }
  0xb0   : > { %v6454_v49 = vsub.f32 %v6382_v12, %v375_v45  ;;  %v6457_v50 = vsub.f32 %v6385_v13, %v376_v46  ;;  %v405_v51 = vsel %vm343_vm0, %v389_v47, 0.0  ;;  %v408_v52 = vsel %vm343_vm0, %v390_v48, 0.0  ;;  %8648 = vst [vmem:[#allocation5_spill] sm:$0xff] %v6501_v11  ;;  %v6503_v12 = vld [vmem:[#allocation2 + $0x8] sm:$0xff]  ;;  %v550_v47 = vld [vmem:[%s8588_s3 + $0x10] sm:$0x7] }
  0xb1   : > { %403 = vadd.xlane.f32.xlu1 %v402_v44  ;;  %406 = vadd.xlane.f32.xlu0 %v405_v51  ;;  %v549_v13 = vld [vmem:[%s8588_s3 + $0xc] sm:$0x7]  ;;  %v668_v15 = vmul.f32 %v6499_v10, %v6503_v12  ;;  %v560_v24 = vmul.f32 %v6509_v14, %v516_v17  ;;  %v824_v26 = vmul.f32 %v6514_v16, %v6503_v12  ;;  %v519_v48 = vld [vmem:[#allocation2 + $0x18] sm:$0xff] }
  0xb2   : > { %v391_v53 = vmul.f32 %v6454_v49, %v6454_v49  ;;  %v392_v54 = vmul.f32 %v6457_v50, %v6457_v50  ;;  %v6517_v19 = vrot.slane %v549_v13, %v6491_v7  ;;  %v6520_v20 = vrot.slane %v549_v13, %v6496_v9  ;;  %v521_v51 = vld [vmem:[#allocation2 + $0x28] sm:$0xff] }
  0xb3   : > { %v684_v25 = vrot.slane %v668_v15, 1  ;;  %v825_v27 = vmul.f32 %v6514_v16, %v518_v18  ;;  %v6534_v31 = vrot.slane %v549_v13, %v6501_v11  ;;  %v561_v33 = vmul.f32 %v6509_v14, %v6503_v12  ;;  %v522_v15 = vld [vmem:[#allocation2 + $0x30] sm:$0xff] }
  0xb4   : > { %v411_v55 = vsel %vm343_vm0, %v391_v53, 0.0  ;;  %v414_v56 = vsel %vm343_vm0, %v392_v54, 0.0  ;;  %8649 = vst [vmem:[#allocation6_spill] sm:$0xff] %v6517_v19  ;;  %v720_v28 = vmul.f32 %v6517_v19, %v6503_v12  ;;  %v6543_v34 = vrot.slane %v6525_v23, %v6501_v11 }
  0xb5   : > { %409 = vadd.xlane.f32.xlu1 %v408_v52  ;;  %412 = vadd.xlane.f32.xlu0 %v411_v55  ;;  %v700_v35 = vadd.f32 %v684_v25, %v560_v24  ;;  %v857_v36 = vrot.slane %v824_v26, 2  ;;  %v858_v37 = vrot.slane %v825_v27, 2  ;;  %v596_v38 = vmul.f32 %v6520_v20, %v516_v17  ;;  %v551_v55 = vld [vmem:[%s8588_s3 + $0x14] sm:$0x7] }
  0xb6   : > { %8650 = vst [vmem:[#allocation7_spill] sm:$0xff] %v6543_v34  ;;  %v736_v42 = vrot.slane %v720_v28, 1  ;;  %v917_v43 = vmul.f32 %v6534_v31, %v6503_v12  ;;  %v918_v44 = vmul.f32 %v6534_v31, %v518_v18  ;;  %v6553_v45 = vrot.slane %v547_v32, %v6496_v9 }
  0xb7   : > { %v6556_v46 = vrot.slane %v547_v32, %v6501_v11  ;;  %v6563_v52 = vrot.slane %v6525_v23, %v6496_v9  ;;  %v701_v53 = vadd.f32 %v684_v25, %v561_v33  ;;  %v6566_v54 = vmul.f32 %v6543_v34, %v518_v18 }
  0xb8   : > { %v897_v57 = vadd.f32 %v857_v36, %v700_v35  ;;  %v6573_v58 = vrot.slane %v548_v41, %v6501_v11  ;;  %v597_v59 = vmul.f32 %v6520_v20, %v6503_v12  ;;  %v752_v61 = vadd.f32 %v736_v42, %v596_v38  ;;  %v527_v38 = vld [vmem:[#allocation2 + $0x58] sm:$0xff] }
  0xb9   : > { %415 = vadd.xlane.f32.xlu1 %v414_v56  ;;  %8651 = vst [vmem:[#allocation8_spill] sm:$0xff] %v6563_v52  ;;  %8652 = vst [vmem:[#allocation9_spill] sm:$0xff] %v6566_v54  ;;  %v859_v56 = vsel %vm856_vm1, %v857_v36, %v858_v37  ;;  %v949_v62 = vrot.slane %v917_v43, 2  ;;  %v950_v63 = vrot.slane %v918_v44, 2  ;;  %v6578_v0 = vrot.slane %v550_v47, %v6496_v9 }
  0xba   : > { %v1101_v1 = vmul.f32 %v6553_v45, %v519_v48  ;;  %v6582_v2 = vmul.f32 %v6556_v46, %v521_v51  ;;  %v6585_v3 = vrot.slane %v550_v47, %v6501_v11  ;;  %v6588_v4 = vrot.slane %v551_v55, %v6501_v11 }
  0xbb   : > { %v6591_v5 = vmul.f32 %v6563_v52, %v516_v17  ;;  %v6593_v6 = vadd.f32 %v859_v56, %v701_v53  ;;  %v6597_v13 = vrot.slane %v547_v32, %v6491_v7  ;;  %v6600_v18 = vmul.f32 %v6563_v52, %v519_v48  ;;  %v555_v56 = vld [vmem:[%s8589_s4] sm:$0x7] }
  0xbc   : > { %v6603_v24 = vmul.f32 %v6543_v34, %v521_v51  ;;  %v6606_v25 = vmul.f32 %v6573_v58, %v524_v60  ;;  %v753_v26 = vadd.f32 %v736_v42, %v597_v59  ;;  %v6609_v17 = vrot.slane %v548_v41, %v6496_v9 }
  0xbd   : > { %8653 = vst [vmem:[#allocation10_spill] sm:$0xff] %v6600_v18  ;;  %v951_v27 = vsel %vm856_vm1, %v949_v62, %v950_v63  ;;  %v989_v28 = vadd.f32 %v949_v62, %v752_v61  ;;  %v1137_v32 = vmul.f32 %v6578_v0, %v519_v48  ;;  %v6613_v33 = vadd.f32 %v1101_v1, %v897_v57 }
  0xbe   : > { %8654 = vst [vmem:[#allocation11_spill] sm:$0xff] %v6603_v24  ;;  %v6617_v36 = vmul.f32 %v6585_v3, %v521_v51  ;;  %v6620_v37 = vmul.f32 %v6588_v4, %v524_v60  ;;  %v6623_v42 = vmul.f32 %v6609_v17, %v522_v15  ;;  %v6626_v43 = vrot.slane %v548_v41, %v6491_v7 }
  0xbf   : > { %v6629_v44 = vrot.slane %v550_v47, %v6491_v7  ;;  %v6632_v53 = vmul.f32 %v6514_v16, %v521_v51  ;;  %v6638_v59 = vadd.f32 %v951_v27, %v753_v26  ;;  %v6641_v61 = vrot.slane %v551_v55, %v6496_v9 }
  0xc0   : > { %v6644_v41 = vmul.f32 %v6556_v46, %v524_v60  ;;  %v6646_v62 = vadd.f32 %v1137_v32, %v989_v28  ;;  %v6649_v47 = vrot.slane %v551_v55, %v6491_v7  ;;  %v6652_v63 = vmul.f32 %v6509_v14, %v519_v48  ;;  %v6665_v28 = vld [vmem:[#allocation2 + $0x70] sm:$0xff]  ;;  %v525_v32 = vld [vmem:[#allocation2 + $0x48] sm:$0xff] }
  0xc1   : > { %8655 = vst [vmem:[#allocation12_spill] sm:$0xff] %v6632_v53  ;;  %v6655_v1 = vmul.f32 %v6573_v58, %v527_v38  ;;  %v6659_v27 = vmul.f32 %v6641_v61, %v522_v15  ;;  %v6663_v57 = vmul.f32 %v6534_v31, %v521_v51  ;;  %v6668_v55 = vrot.slane %v555_v56, %v6496_v9 }
  0xc2   : > { %8656 = vst [vmem:[#allocation13_spill] sm:$0xff] %v6644_v41  ;;  %v6672_v35 = vmul.f32 %v6585_v3, %v524_v60  ;;  %v6675_v26 = vmul.f32 %v6588_v4, %v527_v38  ;;  %v6678_v18 = vmul.f32 %v6553_v45, %v522_v15  ;;  %v6682_v51 = vmul.f32 %v6520_v20, %v519_v48 }
  0xc3   : > { %8657 = vst [vmem:[#allocation14_spill] sm:$0xff] %v6655_v1  ;;  %8658 = vst [vmem:[#allocation15_spill] sm:$0xff] %v6663_v57  ;;  %v6685_v11 = vmul.f32 %v6514_v16, %v524_v60  ;;  %v6688_v24 = vrot.slane %v555_v56, %v6491_v7  ;;  %v6692_v54 = vmul.f32 %v6556_v46, %v527_v38  ;;  %v528_v1 = vld [vmem:[#allocation2 + $0x60] sm:$0xff] }
  0xc4   : > { %8659 = vst [vmem:[#allocation16_spill] sm:$0xff] %v6668_v55  ;;  %8660 = vst [vmem:[#allocation17_spill] sm:$0xff] %v6672_v35  ;;  %v6696_v19 = vmul.f32 %v6573_v58, %v6665_v28  ;;  %v6699_v8 = vmul.f32 %v6609_v17, %v525_v32  ;;  %v6706_v56 = vmul.f32 %v6534_v31, %v524_v60 }
  0xc5   : > { %8661 = vst [vmem:[#allocation18_spill] sm:$0xff] %v6675_v26  ;;  %8662 = vst [vmem:[#allocation19_spill] sm:$0xff] %v6678_v18  ;;  %v6714_v41 = vmul.f32 %v6585_v3, %v527_v38  ;;  %v6716_v18 = vld [vmem:[#allocation2 + $0x88] sm:$0xff]  ;;  %v6719_v48 = vmul.f32 %v6641_v61, %v525_v32  ;;  %v6724_v60 = vmul.f32 %v6588_v4, %v6665_v28 }
  0xc6   : > { %8663 = vst [vmem:[#allocation20_spill] sm:$0xff] %v6682_v51  ;;  %8664 = vst [vmem:[#allocation21_spill] sm:$0xff] %v6685_v11  ;;  %v6703_v51 = vmul.f32 %v6578_v0, %v522_v15  ;;  %v6727_v9 = vmul.f32 %v6514_v16, %v527_v38  ;;  %v6735_v57 = vmul.f32 %v6520_v20, %v522_v15 }
  0xc7   : > { %8665 = vst [vmem:[#allocation22_spill] sm:$0xff] %v6688_v24  ;;  %8666 = vst [vmem:[#allocation23_spill] sm:$0xff] %v6692_v54  ;;  %v6711_v24 = vmul.f32 %v6509_v14, %v522_v15  ;;  %v6750_v26 = vmul.f32 %v6578_v0, %v525_v32  ;;  %v6754_v15 = vmul.f32 %v6509_v14, %v525_v32 }
  0xc8   : > { %8667 = vst [vmem:[#allocation24_spill] sm:$0xff] %v6696_v19  ;;  %8668 = vst [vmem:[#allocation25_spill] sm:$0xff] %v6699_v8  ;;  %v6747_v8 = vmul.f32 %v6573_v58, %v6716_v18  ;;  %v6763_v19 = vmul.f32 %v6585_v3, %v6665_v28  ;;  %v6815_v54 = vmul.f32 %v6509_v14, %v528_v1 }
  0xc9   : > { %8669 = vst [vmem:[#allocation26_spill] sm:$0xff] %v6703_v51  ;;  %8670 = vst [vmem:[#allocation27_spill] sm:$0xff] %v6706_v56  ;;  %v6738_v51 = vmul.f32 %v6609_v17, %v528_v1  ;;  %v6776_v56 = vmul.f32 %v6520_v20, %v525_v32 }
  0xca   : > { %8671 = vst [vmem:[#allocation28_spill] sm:$0xff] %v6711_v24  ;;  %8672 = vst [vmem:[#allocation29_spill] sm:$0xff] %v6714_v41  ;;  %v6730_v24 = vmul.f32 %v6553_v45, %v525_v32  ;;  %v6770_v41 = vmul.f32 %v6641_v61, %v528_v1  ;;  %v6795_v32 = vmul.f32 %v6556_v46, %v6716_v18 }
  0xcb   : > { %8673 = vst [vmem:[#allocation30_spill] sm:$0xff] %v6719_v48  ;;  %8674 = vst [vmem:[#allocation31_spill] sm:$0xff] %v6724_v60  ;;  %v6743_v48 = vmul.f32 %v6556_v46, %v6665_v28 }
  0xcc   : > { %8675 = vst [vmem:[#allocation32_spill] sm:$0xff] %v6727_v9  ;;  %8676 = vst [vmem:[#allocation33_spill] sm:$0xff] %v6730_v24 }
  0xcd   : > { %8677 = vst [vmem:[#allocation34_spill] sm:$0xff] %v6735_v57  ;;  %8678 = vst [vmem:[#allocation35_spill] sm:$0xff] %v6738_v51  ;;  %v6757_v57 = vmul.f32 %v6534_v31, %v527_v38  ;;  %v6773_v38 = vmul.f32 %v6553_v45, %v528_v1  ;;  %v6778_v51 = vld [vmem:[#allocation2 + $0xa0] sm:$0xff] }
  0xce   : > { %8679 = vst [vmem:[#allocation36_spill] sm:$0xff] %v6743_v48  ;;  %8680 = vst [vmem:[#allocation37_spill] sm:$0xff] %v6747_v8  ;;  %v6801_v8 = vmul.f32 %v6573_v58, %v6778_v51 }
  0xcf   : > { %8681 = vst [vmem:[#allocation38_spill] sm:$0xff] %v6750_v26  ;;  %8682 = vst [vmem:[#allocation39_spill] sm:$0xff] %v6754_v15  ;;  %v6767_v26 = vmul.f32 %v6588_v4, %v6716_v18  ;;  %v531_v15 = vld [vmem:[#allocation2 + $0x78] sm:$0xff] }
  0xd0   : > { %8683 = vst [vmem:[#allocation40_spill] sm:$0xff] %v6757_v57  ;;  %8684 = vst [vmem:[#allocation41_spill] sm:$0xff] %v6763_v19  ;;  %v6782_v60 = vmul.f32 %v6609_v17, %v531_v15  ;;  %v6809_v57 = vmul.f32 %v6585_v3, %v6716_v18  ;;  %v6812_v48 = vmul.f32 %v6641_v61, %v531_v15 }
  0xd1   : > { %8685 = vst [vmem:[#allocation42_spill] sm:$0xff] %v6767_v26  ;;  %8686 = vst [vmem:[#allocation43_spill] sm:$0xff] %v6770_v41  ;;  %v6819_v26 = vmul.f32 %v6553_v45, %v531_v15  ;;  %v6845_v53 = vmul.f32 %v6509_v14, %v531_v15 }
  0xd2   : > { %8687 = vst [vmem:[#allocation44_spill] sm:$0xff] %v6773_v38  ;;  %8688 = vst [vmem:[#allocation45_spill] sm:$0xff] %v6776_v56  ;;  %v6791_v38 = vmul.f32 %v6578_v0, %v528_v1 }
  0xd3   : > { %8689 = vst [vmem:[#allocation46_spill] sm:$0xff] %v6782_v60  ;;  %8691 = vst [vmem:[#allocation48_spill] sm:$0xff] %v6795_v32  ;;  %v6831_v60 = vld [vmem:[#allocation2 + $0xb8] sm:$0xff]  ;;  %v6869_v32 = vmul.f32 %v6585_v3, %v6778_v51 }
  0xd4   : > { %8690 = vst [vmem:[#allocation47_spill] sm:$0xff] %v6791_v38  ;;  %8692 = vst [vmem:[#allocation49_spill] sm:$0xff] %v6801_v8 }
  0xd5   : > { %8694 = vst [vmem:[#allocation51_spill] sm:$0xff] %v6809_v57  ;;  %8695 = vst [vmem:[#allocation52_spill] sm:$0xff] %v6812_v48  ;;  %v6874_v57 = vld [vmem:[%s8586_s1] ss:$0 sm:$0xff] }
  0xd6   : > { %8696 = vst [vmem:[#allocation53_spill] sm:$0xff] %v6815_v54  ;;  %8697 = vst [vmem:[#allocation54_spill] sm:$0xff] %v6819_v26  ;;  %v6829_v54 = vmul.f32 %v6588_v4, %v6778_v51 }
  0xd7   : > { %8702 = vst [vmem:[#allocation59_spill] sm:$0xff] %v6845_v53  ;;  %v6861_v53 = vmul.f32 %v6520_v20, %v531_v15  ;;  %8708 = vst [vmem:[#allocation65_spill] sm:$0xff] %v6869_v32 }
  0xd8   : > { %8699 = vst [vmem:[#allocation56_spill] sm:$0xff] %v6829_v54 }
  0xd9   : > { %8706 = vst [vmem:[#allocation63_spill] sm:$0xff] %v6861_v53  ;;  %v6885_v53 = vld [vmem:[#allocation2 + $0xa8] sm:$0xff] }
  0xda   : > { %v6895_v26 = vmul.f32 %v6609_v17, %v6885_v53  ;;  %v6972_v32 = vmul.f32 %v6509_v14, %v6885_v53 }
  0xdc   : > { %8711 = vst [vmem:[#allocation68_spill] sm:$0xff] %v6895_v26  ;;  %v6919_v26 = vmul.f32 %v6556_v46, %v6831_v60  ;;  %8718 = vst [vmem:[#allocation75_spill] sm:$0xff] %v6972_v32  ;;  %v6987_v32 = vmul.f32 %v6543_v34, %v6503_v12 }
  0xde   : > { %8720 = vst [vmem:[#allocation77_spill] sm:$0xff] %v6987_v32 }
 0x136   : > { %v395_v11 = vpop.xlane.xlu0 %394 }
 0x137   : > { %v417_v35 = vmul.f32 0.03125, %v395_v11  ;;  %v6787_v11 = vmul.f32 %v6514_v16, %v6665_v28 }
 0x139   : > { %v425_v41 = vadd.f32 1e-05, %v417_v35  ;;  %v6805_v35 = vmul.f32 %v6534_v31, %v6665_v28 }
 0x13a   : > { %v398_v9 = vpop.xlane.xlu1 %397  ;;  %v401_v56 = vpop.xlane.xlu0 %400 }
 0x13b   : > { %8693 = vst [vmem:[#allocation50_spill] sm:$0xff] %v6805_v35  ;;  %6100 = vrsqrt.f32 %v425_v41  ;;  %v418_v24 = vmul.f32 0.03125, %v398_v9  ;;  %v419_v38 = vmul.f32 0.03125, %v401_v56  ;;  %v6823_v41 = vmul.f32 %v6520_v20, %v528_v1  ;;  %v6837_v9 = vld [vmem:[#allocation2 + $0x90] sm:$0xff] }
 0x13c   : > { %v6842_v48 = vmul.f32 %v6609_v17, %v6837_v9  ;;  %v6849_v35 = vmul.f32 %v6556_v46, %v6778_v51 }
 0x13d   : > { %v426_v28 = vadd.f32 1e-05, %v418_v24  ;;  %v427_v19 = vadd.f32 1e-05, %v419_v38  ;;  %8698 = vst [vmem:[#allocation55_spill] sm:$0xff] %v6823_v41  ;;  %v6835_v24 = vmul.f32 %v6514_v16, %v6716_v18 }
 0x13e   : > { %v404_v56 = vpop.xlane.xlu1 %403  ;;  %v407_v55 = vpop.xlane.xlu0 %406  ;;  %8701 = vst [vmem:[#allocation58_spill] sm:$0xff] %v6842_v48  ;;  %8703 = vst [vmem:[#allocation60_spill] sm:$0xff] %v6849_v35  ;;  %v542_v35 = vld [vmem:[#allocation2 + $0xd0] sm:$0xff] }
 0x13f   : > { %8700 = vst [vmem:[#allocation57_spill] sm:$0xff] %v6835_v24  ;;  %6102 = vrsqrt.f32 %v426_v28  ;;  %v420_v38 = vmul.f32 0.03125, %v404_v56  ;;  %v421_v1 = vmul.f32 0.03125, %v407_v55  ;;  %v6852_v55 = vmul.f32 %v6578_v0, %v531_v15 }
 0x140   : > { %6104 = vrsqrt.f32 %v427_v19  ;;  %v6856_v56 = vmul.f32 %v6573_v58, %v6831_v60  ;;  %v6878_v15 = vmul.f32 %v6641_v61, %v6837_v9 }
 0x141   : > { %v428_v8 = vadd.f32 1e-05, %v420_v38  ;;  %v429_v28 = vadd.f32 1e-05, %v421_v1  ;;  %8704 = vst [vmem:[#allocation61_spill] sm:$0xff] %v6852_v55  ;;  %v6865_v38 = vmul.f32 %v6534_v31, %v6716_v18  ;;  %v6882_v18 = vmul.f32 %v6553_v45, %v6837_v9 }
 0x142   : > { %8705 = vst [vmem:[#allocation62_spill] sm:$0xff] %v6856_v56  ;;  %v410_v19 = vpop.xlane.xlu1 %409  ;;  %v413_v41 = vpop.xlane.xlu0 %412  ;;  %8709 = vst [vmem:[#allocation66_spill] sm:$0xff] %v6878_v15 }
 0x143   : > { %8707 = vst [vmem:[#allocation64_spill] sm:$0xff] %v6865_v38  ;;  %6106 = vrsqrt.f32 %v428_v8  ;;  %v422_v1 = vmul.f32 0.03125, %v410_v19  ;;  %v423_v55 = vmul.f32 0.03125, %v413_v41  ;;  %8710 = vst [vmem:[#allocation67_spill] sm:$0xff] %v6882_v18  ;;  %v6915_v38 = vmul.f32 %v6509_v14, %v6837_v9 }
 0x144   : > { %6108 = vrsqrt.f32 %v429_v28  ;;  %v6890_v28 = vmul.f32 %v6588_v4, %v6831_v60  ;;  %v6923_v18 = vmul.f32 %v6573_v58, %v542_v35 }
 0x145   : > { %v6101_v41 = vpop.eup %6100  ;;  %v430_v19 = vadd.f32 1e-05, %v422_v1  ;;  %v431_v48 = vadd.f32 1e-05, %v423_v55  ;;  %v6900_v55 = vmul.f32 %v6514_v16, %v6778_v51  ;;  %v6905_v1 = vld [vmem:[%s8587_s2] ss:$0 sm:$0xff] }
 0x146   : > { %v441_v54 = vmul.f32 %v6101_v41, %v6421_v21  ;;  %v416_v15 = vpop.xlane.xlu1 %415  ;;  %v6909_v21 = vmul.f32 %v6578_v0, %v6837_v9  ;;  %8713 = vst [vmem:[#allocation70_spill] sm:$0xff] %v6915_v38  ;;  %v6927_v41 = vmul.f32 %v6534_v31, %v6778_v51  ;;  %v6943_v51 = vrot.slane %v6525_v23, %v6491_v7 }
 0x147   : > { %6110 = vrsqrt.f32 %v430_v19  ;;  %v424_v24 = vmul.f32 0.03125, %v416_v15  ;;  %v6939_v15 = vmul.f32 %v6641_v61, %v6885_v53  ;;  %v633_v23 = vmul.f32 %v6563_v52, %v6503_v12 }
 0x148   : > { %8712 = vst [vmem:[#allocation69_spill] sm:$0xff] %v6909_v21  ;;  %v455_v8 = vmul.f32 %v6874_v57, %v441_v54  ;;  %6112 = vrsqrt.f32 %v431_v48  ;;  %8714 = vst [vmem:[#allocation71_spill] sm:$0xff] %v6927_v41  ;;  %v6934_v21 = vmul.f32 %v6585_v3, %v6831_v60  ;;  %v540_v41 = vld [vmem:[#allocation2 + $0xc0] sm:$0xff] }
 0x149   : > { %v6103_v56 = vpop.eup %6102  ;;  %v432_v19 = vadd.f32 1e-05, %v424_v24  ;;  %8716 = vst [vmem:[#allocation73_spill] sm:$0xff] %v6943_v51 }
 0x14a   : > { %v6105_v54 = vpop.eup %6104  ;;  %v469_v48 = vadd.f32 %v6905_v1, %v455_v8  ;;  %v442_v38 = vmul.f32 %v6103_v56, %v6430_v29  ;;  %8715 = vst [vmem:[#allocation72_spill] sm:$0xff] %v6934_v21  ;;  %v6949_v56 = vmul.f32 %v6553_v45, %v6885_v53 }
 0x14b   : > { %v443_v24 = vmul.f32 %v6105_v54, %v6423_v22  ;;  %6114 = vrsqrt.f32 %v432_v19  ;;  %v6954_v22 = vmul.f32 %v6520_v20, %v6837_v9  ;;  %v5067_v9 = vld [vmem:[%s8590_s5 + $0x40] sm:$0xff] }
 0x14c   : > { %508 = vst.msk [vmem:[#allocation2 + $0x20] sm:$0xff] %vm343_vm0, %v469_v48  ;;  %v456_v29 = vmul.f32 %v6874_v57, %v442_v38  ;;  %8717 = vst [vmem:[#allocation74_spill] sm:$0xff] %v6949_v56  ;;  %v772_v38 = vmul.f32 %v6943_v51, %v6503_v12 }
 0x14d   : > { %v6107_v19 = vpop.eup %6106  ;;  %v457_v54 = vmul.f32 %v6874_v57, %v443_v24  ;;  %v5068_v24 = vld [vmem:[%s8590_s5 + $0x48] sm:$0xff] }
 0x14e   : > { %v6109_v48 = vpop.eup %6108  ;;  %v470_v7 = vadd.f32 %v6905_v1, %v456_v29  ;;  %v444_v56 = vmul.f32 %v6107_v19, %v6433_v30  ;;  %v6976_v51 = vpack.c.bf16 %v5068_v24, %v5067_v9  ;;  %v6979_v30 = vmul.f32 %v6588_v4, %v542_v35 }
 0x14f   : > { %v471_v8 = vadd.f32 %v6905_v1, %v457_v54  ;;  %v445_v29 = vmul.f32 %v6109_v48, %v6442_v39  ;;  %v788_v21 = vrot.slane %v772_v38, 1  ;;  %v6997_v35 = vmul.f32 %v6578_v0, %v6885_v53 }
 0x150   : > { %8719 = vst [vmem:[#allocation76_spill] sm:$0xff] %v6979_v30  ;;  %509 = vst.msk [vmem:[#allocation2 + $0x38] sm:$0xff] %vm343_vm0, %v470_v7  ;;  %v458_v19 = vmul.f32 %v6874_v57, %v444_v56  ;;  %5769 = vmatprep.subr.bf16.mxu0 %v6976_v51  ;;  %v6993_v7 = vmul.f32 %v6609_v17, %v540_v41 }
 0x151   : > { %v6111_v54 = vpop.eup %6110  ;;  %510 = vst.msk [vmem:[#allocation2 + $0x50] sm:$0xff] %vm343_vm0, %v471_v8  ;;  %v459_v39 = vmul.f32 %v6874_v57, %v445_v29  ;;  %v7004_v8 = vmul.f32 %v6514_v16, %v6831_v60  ;;  %v7007_v9 = vadd.f32 %v788_v21, %v6591_v5  ;;  %v7013_v29 = vadd.f32 %v788_v21, %v633_v23 }
 0x152   : > { %v6113_v38 = vpop.eup %6112  ;;  %v472_v12 = vadd.f32 %v6905_v1, %v458_v19  ;;  %v446_v48 = vmul.f32 %v6111_v54, %v6445_v40 }
 0x153   : > { %8721 = vst [vmem:[#allocation78_spill] sm:$0xff] %v7004_v8  ;;  %8722 = vst [vmem:[#allocation79_spill] sm:$0xff] %v7007_v9  ;;  %v7009_v41 = vld [vmem:[#allocation2 + $0x20] sm:$0xff]  ;;  %v473_v24 = vadd.f32 %v6905_v1, %v459_v39  ;;  %v447_v53 = vmul.f32 %v6113_v38, %v6454_v49 }
 0x154   : > { %8723 = vst [vmem:[#allocation80_spill] sm:$0xff] %v7013_v29  ;;  %511 = vst.msk [vmem:[#allocation2 + $0x68] sm:$0xff] %vm343_vm0, %v472_v12  ;;  %v460_v40 = vmul.f32 %v6874_v57, %v446_v48  ;;  %v1102_v60 = vmul.f32 %v6553_v45, %v7009_v41  ;;  %v1209_v5 = vmul.f32 %v6597_v13, %v7009_v41 }
 0x155   : > { %v1365_v19 = vmul.f32 %v6556_v46, %v7009_v41  ;;  %v6115_v54 = vpop.eup %6114  ;;  %512 = vst.msk [vmem:[#allocation2 + $0x80] sm:$0xff] %vm343_vm0, %v473_v24  ;;  %v461_v49 = vmul.f32 %v6874_v57, %v447_v53  ;;  %v1138_v21 = vmul.f32 %v6578_v0, %v7009_v41  ;;  %v1261_v23 = vmul.f32 %v6629_v44, %v7009_v41 }
 0x156   : > { %v1457_v39 = vmul.f32 %v6585_v3, %v7009_v41  ;;  %v474_v38 = vadd.f32 %v6905_v1, %v460_v40  ;;  %v448_v12 = vmul.f32 %v6115_v54, %v6457_v50  ;;  %v1118_v48 = vadd.f32 %v1102_v60, %v6593_v6 }
 0x157   : > { %v1225_v56 = vrot.slane %v1209_v5, 1  ;;  %v7035_v52 = vld [vmem:[#allocation2 + $0x38] sm:$0xff]  ;;  %v475_v24 = vadd.f32 %v6905_v1, %v461_v49  ;;  %v1397_v53 = vrot.slane %v1365_v19, 2  ;;  %v1154_v34 = vadd.f32 %v1138_v21, %v6638_v59 }
 0x158   : > { %v1277_v29 = vrot.slane %v1261_v23, 1  ;;  %513 = vst.msk [vmem:[#allocation2 + $0x98] sm:$0xff] %vm343_vm0, %v474_v38  ;;  %v462_v9 = vmul.f32 %v6874_v57, %v448_v12  ;;  %v1642_v50 = vmul.f32 %v6609_v17, %v7035_v52  ;;  %v8724_v6 = vrot.slane %v6582_v2, 2 }
 0x159   : > { %v1241_v32 = vadd.f32 %v1225_v56, %v6613_v33  ;;  %v1242_v40 = vadd.f32 %v1225_v56, %v1118_v48  ;;  %514 = vst.msk [vmem:[#allocation2 + $0xb0] sm:$0xff] %vm343_vm0, %v475_v24  ;;  %v1749_v59 = vmul.f32 %v6626_v43, %v7035_v52  ;;  %v1905_v5 = vmul.f32 %v6573_v58, %v7035_v52 }
 0x15a   : > { %v1399_v60 = vsel %vm856_vm1, %v1397_v53, %v8724_v6  ;;  %v1293_v57 = vadd.f32 %v1277_v29, %v6646_v62  ;;  %v476_v33 = vadd.f32 %v6905_v1, %v462_v9  ;;  %v1294_v54 = vadd.f32 %v1277_v29, %v1154_v34 }
 0x15b   : > { %v1437_v56 = vadd.f32 %v1397_v53, %v1241_v32  ;;  %v1438_v19 = vadd.f32 %v1399_v60, %v1242_v40  ;;  %v1765_v49 = vrot.slane %v1749_v59, 1  ;;  %v1937_v21 = vrot.slane %v1905_v5, 2 }
 0x15c   : > { %v1489_v23 = vrot.slane %v1457_v39, 2  ;;  %v1678_v2 = vmul.f32 %v6641_v61, %v7035_v52  ;;  %515 = vst.msk [vmem:[#allocation2 + $0xc8] sm:$0xff] %vm343_vm0, %v476_v33  ;;  %v1801_v48 = vmul.f32 %v6649_v47, %v7035_v52  ;;  %v1997_v62 = vmul.f32 %v6588_v4, %v7035_v52 }
 0x15d   : > { %v1657_v38 = vadd.f32 %v6623_v42, %v1437_v56  ;;  %v1658_v12 = vadd.f32 %v1642_v50, %v1438_v19  ;;  %v8725_v32 = vrot.slane %v6606_v25, 2  ;;  %v8726_v1 = vrot.slane %v6617_v36, 2 }
 0x15e   : > { %v1529_v29 = vadd.f32 %v1489_v23, %v1293_v57  ;;  %v563_v39 = vmul.f32 %v6509_v14, %v7009_v41  ;;  %v1817_v40 = vrot.slane %v1801_v48, 1  ;;  %v2029_v6 = vrot.slane %v1997_v62, 2  ;;  %v7082_v48 = vld [vmem:[#allocation2 + $0x50] sm:$0xff] }
 0x15f   : > { %v1939_v34 = vsel %vm856_vm1, %v1937_v21, %v8725_v32  ;;  %v1491_v9 = vsel %vm856_vm1, %v1489_v23, %v8726_v1  ;;  %v1781_v42 = vadd.f32 %v1765_v49, %v1657_v38  ;;  %v1782_v24 = vadd.f32 %v1765_v49, %v1658_v12  ;;  %v8728_v32 = vld [vmem:[#allocation12_spill] sm:$0xff] }
 0x160   : > { %v1530_v53 = vadd.f32 %v1491_v9, %v1294_v54  ;;  %v1693_v50 = vadd.f32 %v6659_v27, %v1529_v29  ;;  %v669_v25 = vmul.f32 %v6499_v10, %v7009_v41  ;;  %v826_v60 = vmul.f32 %v6514_v16, %v7009_v41 }
 0x161   : > { %v1977_v36 = vadd.f32 %v1937_v21, %v1781_v42  ;;  %v1978_v59 = vadd.f32 %v1939_v34, %v1782_v24  ;;  %v1104_v57 = vmul.f32 %v6553_v45, %v7035_v52  ;;  %v8727_v56 = vrot.slane %v6620_v37, 2  ;;  %v8730_v24 = vld [vmem:[#allocation16_spill] sm:$0xff] }
 0x162   : > { %v1694_v5 = vadd.f32 %v1678_v2, %v1530_v53  ;;  %v1833_v33 = vadd.f32 %v1817_v40, %v1693_v50  ;;  %v685_v54 = vrot.slane %v669_v25, 1  ;;  %v860_v27 = vrot.slane %v826_v60, 2 }
 0x163   : > { %v2031_v19 = vsel %vm856_vm1, %v2029_v6, %v8727_v56  ;;  %v2194_v49 = vrot.slane %v1977_v36, 7  ;;  %v2195_v23 = vrot.slane %v1978_v59, 7  ;;  %v1210_v12 = vmul.f32 %v6597_v13, %v7035_v52  ;;  %v8731_v36 = vld [vmem:[#allocation19_spill] sm:$0xff] }
 0x164   : > { %v1834_v38 = vadd.f32 %v1817_v40, %v1694_v5  ;;  %v2069_v21 = vadd.f32 %v2029_v6, %v1833_v33  ;;  %v702_v2 = vadd.f32 %v685_v54, %v6652_v63  ;;  %v703_v62 = vadd.f32 %v685_v54, %v563_v39  ;;  %v8732_v54 = vld [vmem:[#allocation13_spill] sm:$0xff] }
 0x165   : > { %v8729_v34 = vrot.slane %v8728_v32, 2  ;;  %v2196_v1 = vsel %vm2193_vm2, %v2194_v49, %v2195_v23  ;;  %v1226_v29 = vrot.slane %v1210_v12, 1  ;;  %v1367_v42 = vmul.f32 %v6556_v46, %v7035_v52 }
 0x166   : > { %v2070_v9 = vadd.f32 %v2031_v19, %v1834_v38  ;;  %v2230_v53 = vadd.f32 %v8730_v24, %v2196_v1  ;;  %v2254_v40 = vrot.slane %v2069_v21, 7  ;;  %v899_v50 = vadd.f32 %v860_v27, %v702_v2  ;;  %v8734_v38 = vld [vmem:[#allocation6_spill] sm:$0xff] }
 0x167   : > { %v862_v37 = vsel %vm856_vm1, %v860_v27, %v8729_v34  ;;  %v1400_v60 = vrot.slane %v1367_v42, 2  ;;  %v1644_v63 = vmul.f32 %v6609_v17, %v7082_v48  ;;  %v1750_v39 = vmul.f32 %v6626_v43, %v7082_v48  ;;  %v8735_v21 = vld [vmem:[#allocation22_spill] sm:$0xff] }
 0x168   : > { %v900_v25 = vadd.f32 %v862_v37, %v703_v62  ;;  %v2255_v6 = vrot.slane %v2070_v9, 7  ;;  %5420 = vmatprep.mubr.msk.f32.mxu0 %vm343_vm0, %v2230_v53  ;;  %v1119_v59 = vadd.f32 %v8731_v36, %v899_v50  ;;  %v1907_v33 = vmul.f32 %v6573_v58, %v7082_v48 }
 0x169   : > { %v599_v56 = vmul.f32 %v6520_v20, %v7009_v41  ;;  %v8733_v27 = vrot.slane %v8732_v54, 2  ;;  %v1766_v23 = vrot.slane %v1750_v39, 1  ;;  %v721_v12 = vmul.f32 %v8734_v38, %v7009_v41 }
 0x16a   : > { %v1120_v5 = vadd.f32 %v1104_v57, %v900_v25  ;;  %v2256_v19 = vsel %vm2193_vm2, %v2254_v40, %v2255_v6  ;;  %v1243_v62 = vadd.f32 %v1226_v29, %v1119_v59  ;;  %v1940_v32 = vrot.slane %v1907_v33, 2  ;;  %v8736_v40 = vld [vmem:[#allocation14_spill] sm:$0xff]  ;;  %v8738_v6 = vld [vmem:[#allocation20_spill] sm:$0xff] }
 0x16b   : > { %v1402_v49 = vsel %vm856_vm1, %v1400_v60, %v8733_v27  ;;  %v2290_v2 = vadd.f32 %v8735_v21, %v2256_v19  ;;  %v737_v34 = vrot.slane %v721_v12, 1  ;;  %v919_v37 = vmul.f32 %v6534_v31, %v7009_v41  ;;  %v8740_v27 = vld [vmem:[#allocation15_spill] sm:$0xff] }
 0x16c   : > { %v1244_v57 = vadd.f32 %v1226_v29, %v1120_v5  ;;  %v1140_v1 = vmul.f32 %v6578_v0, %v7035_v52  ;;  %v1262_v9 = vmul.f32 %v6629_v44, %v7035_v52  ;;  %v1439_v42 = vadd.f32 %v1400_v60, %v1243_v62  ;;  %v8739_v5 = vld [vmem:[#allocation25_spill] sm:$0xff] }
 0x16d   : > { %5440 = vmatprep.mubr.msk.f32.mxu1 %vm343_vm0, %v2290_v2  ;;  %v8737_v50 = vrot.slane %v8736_v40, 2  ;;  %v1459_v29 = vmul.f32 %v6585_v3, %v7035_v52  ;;  %v754_v39 = vadd.f32 %v737_v34, %v8738_v6  ;;  %v755_v41 = vadd.f32 %v737_v34, %v599_v56 }
 0x16e   : > { %v1440_v53 = vadd.f32 %v1402_v49, %v1244_v57  ;;  %v952_v36 = vrot.slane %v919_v37, 2  ;;  %v1278_v59 = vrot.slane %v1262_v9, 1  ;;  %v1659_v33 = vadd.f32 %v8739_v5, %v1439_v42  ;;  %v8742_v9 = vld [vmem:[#allocation17_spill] sm:$0xff] }
 0x16f   : > { %v1942_v25 = vsel %vm856_vm1, %v1940_v32, %v8737_v50  ;;  %v1492_v54 = vrot.slane %v1459_v29, 2  ;;  %v1680_v60 = vmul.f32 %v6641_v61, %v7082_v48  ;;  %v8741_v49 = vrot.slane %v8740_v27, 2 }
 0x170   : > { %v1660_v19 = vadd.f32 %v1644_v63, %v1440_v53  ;;  %v991_v2 = vadd.f32 %v952_v36, %v754_v39  ;;  %v1802_v62 = vmul.f32 %v6649_v47, %v7082_v48  ;;  %v1999_v56 = vmul.f32 %v6588_v4, %v7082_v48  ;;  %v8744_v53 = vld [vmem:[#allocation26_spill] sm:$0xff] }
 0x171   : > { %v954_v12 = vsel %vm856_vm1, %v952_v36, %v8741_v49  ;;  %v1783_v57 = vadd.f32 %v1766_v23, %v1659_v33  ;;  %v8743_v63 = vrot.slane %v8742_v9, 2  ;;  %v565_v6 = vmul.f32 %v6509_v14, %v7035_v52 }
 0x172   : > { %v1784_v34 = vadd.f32 %v1766_v23, %v1660_v19  ;;  %v992_v37 = vadd.f32 %v954_v12, %v755_v41  ;;  %v1155_v40 = vadd.f32 %v8744_v53, %v991_v2  ;;  %v1818_v50 = vrot.slane %v1802_v62, 1  ;;  %v8745_v23 = vld [vmem:[#allocation18_spill] sm:$0xff]  ;;  %v8747_v53 = vld [vmem:[#allocation28_spill] sm:$0xff] }
 0x173   : > { %v1494_v42 = vsel %vm856_vm1, %v1492_v54, %v8743_v63  ;;  %v2032_v29 = vrot.slane %v1999_v56, 2  ;;  %v1979_v39 = vadd.f32 %v1940_v32, %v1783_v57  ;;  %v670_v27 = vmul.f32 %v6499_v10, %v7035_v52 }
 0x174   : > { %v1980_v36 = vadd.f32 %v1942_v25, %v1784_v34  ;;  %v1156_v5 = vadd.f32 %v1140_v1, %v992_v37  ;;  %v1295_v33 = vadd.f32 %v1278_v59, %v1155_v40  ;;  %v8746_v41 = vrot.slane %v8745_v23, 2  ;;  %v7151_v37 = vld [vmem:[#allocation2 + $0x68] sm:$0xff] }
 0x175   : > { %v828_v49 = vmul.f32 %v6514_v16, %v7035_v52  ;;  %v1106_v12 = vmul.f32 %v6553_v45, %v7082_v48  ;;  %v2197_v2 = vrot.slane %v1979_v39, 7  ;;  %v686_v32 = vrot.slane %v670_v27, 1 }
 0x176   : > { %v2034_v19 = vsel %vm856_vm1, %v2032_v29, %v8746_v41  ;;  %v2198_v62 = vrot.slane %v1980_v36, 7  ;;  %v1296_v56 = vadd.f32 %v1278_v59, %v1156_v5  ;;  %v1531_v25 = vadd.f32 %v1492_v54, %v1295_v33  ;;  %v8748_v59 = vld [vmem:[#allocation30_spill] sm:$0xff]  ;;  %v8749_v54 = vld [vmem:[#allocation21_spill] sm:$0xff] }
 0x177   : > { %v863_v1 = vrot.slane %v828_v49, 2  ;;  %v1211_v57 = vmul.f32 %v6597_v13, %v7082_v48  ;;  %v1369_v34 = vmul.f32 %v6556_v46, %v7082_v48  ;;  %v704_v40 = vadd.f32 %v686_v32, %v8747_v53 }
 0x178   : > { %v2199_v9 = vsel %vm2193_vm2, %v2197_v2, %v2198_v62  ;;  %v1532_v63 = vadd.f32 %v1494_v42, %v1296_v56  ;;  %v705_v23 = vadd.f32 %v686_v32, %v565_v6  ;;  %v1695_v36 = vadd.f32 %v8748_v59, %v1531_v25  ;;  %v8751_v32 = vld [vmem:[#allocation33_spill] sm:$0xff] }
 0x179   : > { %v2231_v39 = vadd.f32 %v8730_v24, %v2199_v9  ;;  %v8750_v5 = vrot.slane %v8749_v54, 2  ;;  %v1227_v33 = vrot.slane %v1211_v57, 1  ;;  %v901_v49 = vadd.f32 %v863_v1, %v704_v40 }
 0x17a   : > { %v1696_v41 = vadd.f32 %v1680_v60, %v1532_v63  ;;  %v1403_v30 = vrot.slane %v1369_v34, 2  ;;  %v1835_v2 = vadd.f32 %v1818_v50, %v1695_v36  ;;  %v1646_v42 = vmul.f32 %v6609_v17, %v7151_v37  ;;  %v8752_v60 = vld [vmem:[#allocation23_spill] sm:$0xff] }
 0x17b   : > { %v865_v27 = vsel %vm856_vm1, %v863_v1, %v8750_v5  ;;  %5421 = vmatmul.mubr.msk.f32.vlgmr.msra.gmra.mrb[0].mxu0 %vm343_vm0, %v2231_v39  ;;  %v1751_v6 = vmul.f32 %v6626_v43, %v7151_v37  ;;  %v1909_v62 = vmul.f32 %v6573_v58, %v7151_v37  ;;  %v1121_v25 = vadd.f32 %v8751_v32, %v901_v49 }
 0x17c   : > { %v902_v8 = vadd.f32 %v865_v27, %v705_v23  ;;  %v1836_v56 = vadd.f32 %v1818_v50, %v1696_v41  ;;  %v8753_v1 = vrot.slane %v8752_v60, 2  ;;  %5771 = vmatpush3.bf16.msra.mxu0 %v6976_v51  ;;  %v2071_v9 = vadd.f32 %v2032_v29, %v1835_v2 }
 0x17d   : > { %v1767_v63 = vrot.slane %v1751_v6, 1  ;;  %v1943_v53 = vrot.slane %v1909_v62, 2  ;;  %v601_v40 = vmul.f32 %v6520_v20, %v7035_v52  ;;  %v1245_v39 = vadd.f32 %v1227_v33, %v1121_v25  ;;  %v8757_v25 = vld [vmem:[#allocation34_spill] sm:$0xff] }
 0x17e   : > { %v1122_v57 = vadd.f32 %v1106_v12, %v902_v8  ;;  %v1405_v34 = vsel %vm856_vm1, %v1403_v30, %v8753_v1  ;;  %v2072_v23 = vadd.f32 %v2034_v19, %v1836_v56  ;;  %v722_v50 = vmul.f32 %v8734_v38, %v7035_v52  ;;  %v8754_v8 = vld [vmem:[#allocation24_spill] sm:$0xff]  ;;  %v8758_v1 = vld [vmem:[#allocation27_spill] sm:$0xff] }
 0x17f   : > { %v2257_v36 = vrot.slane %v2071_v9, 7  ;;  %v8755_v12 = vrot.slane %v8754_v8, 2  ;;  %v921_v51 = vmul.f32 %v6534_v31, %v7035_v52  ;;  %v1142_v29 = vmul.f32 %v6578_v0, %v7082_v48  ;;  %v8756_v52 = vld [vmem:[#allocation35_spill] sm:$0xff] }
 0x180   : > { %v1246_v59 = vadd.f32 %v1227_v33, %v1122_v57  ;;  %v2258_v5 = vrot.slane %v2072_v23, 7  ;;  %v1441_v27 = vadd.f32 %v1403_v30, %v1245_v39  ;;  %v738_v19 = vrot.slane %v722_v50, 1 }
 0x181   : > { %v1945_v54 = vsel %vm856_vm1, %v1943_v53, %v8755_v12  ;;  %v955_v49 = vrot.slane %v921_v51, 2  ;;  %v1263_v33 = vmul.f32 %v6629_v44, %v7082_v48  ;;  %v1461_v2 = vmul.f32 %v6585_v3, %v7082_v48 }
 0x182   : > { %v1442_v41 = vadd.f32 %v1405_v34, %v1246_v59  ;;  %v1682_v6 = vmul.f32 %v6641_v61, %v7151_v37  ;;  %v2259_v62 = vsel %vm2193_vm2, %v2257_v36, %v2258_v5  ;;  %v1661_v56 = vadd.f32 %v8756_v52, %v1441_v27  ;;  %v8760_v27 = vld [vmem:[#allocation38_spill] sm:$0xff] }
 0x183   : > { %v756_v57 = vadd.f32 %v738_v19, %v8757_v25  ;;  %v2291_v30 = vadd.f32 %v8735_v21, %v2259_v62  ;;  %v757_v60 = vadd.f32 %v738_v19, %v601_v40  ;;  %v8759_v34 = vrot.slane %v8758_v1, 2  ;;  %v8761_v19 = vld [vmem:[#allocation29_spill] sm:$0xff] }
 0x184   : > { %v1662_v32 = vadd.f32 %v1646_v42, %v1442_v41  ;;  %v1279_v23 = vrot.slane %v1263_v33, 1  ;;  %v1785_v39 = vadd.f32 %v1767_v63, %v1661_v56  ;;  %v1495_v8 = vrot.slane %v1461_v2, 2 }
 0x185   : > { %v957_v9 = vsel %vm856_vm1, %v955_v49, %v8759_v34  ;;  %v993_v50 = vadd.f32 %v955_v49, %v756_v57  ;;  %5441 = vmatmul.mubr.msk.f32.vlgmr.msra.gmra.mrb[0].mxu1 %vm343_vm0, %v2291_v30  ;;  %v1803_v42 = vmul.f32 %v6649_v47, %v7151_v37  ;;  %v2001_v12 = vmul.f32 %v6588_v4, %v7151_v37  ;;  %v7216_v34 = vld [vmem:[#allocation2 + $0x80] sm:$0xff] }
 0x186   : > { %v1786_v59 = vadd.f32 %v1767_v63, %v1662_v32  ;;  %v994_v36 = vadd.f32 %v957_v9, %v757_v60  ;;  %v567_v40 = vmul.f32 %v6509_v14, %v7082_v48  ;;  %v1981_v51 = vadd.f32 %v1943_v53, %v1785_v39 }
 0x187   : > { %v1157_v41 = vadd.f32 %v8760_v27, %v993_v50  ;;  %v8762_v63 = vrot.slane %v8761_v19, 2  ;;  %v1819_v2 = vrot.slane %v1803_v42, 1  ;;  %v2035_v62 = vrot.slane %v2001_v12, 2  ;;  %v8765_v42 = vld [vmem:[#allocation39_spill] sm:$0xff] }
 0x188   : > { %v1982_v5 = vadd.f32 %v1945_v54, %v1786_v59  ;;  %v1158_v33 = vadd.f32 %v1142_v29, %v994_v36  ;;  %v671_v52 = vmul.f32 %v6499_v10, %v7082_v48  ;;  %v2200_v56 = vrot.slane %v1981_v51, 7  ;;  %v8763_v54 = vld [vmem:[#allocation31_spill] sm:$0xff] }
 0x189   : > { %v1497_v49 = vsel %vm856_vm1, %v1495_v8, %v8762_v63  ;;  %v1297_v25 = vadd.f32 %v1279_v23, %v1157_v41  ;;  %v830_v57 = vmul.f32 %v6514_v16, %v7082_v48  ;;  %v8764_v30 = vrot.slane %v8763_v54, 2  ;;  %v8767_v41 = vld [vmem:[#allocation32_spill] sm:$0xff] }
 0x18a   : > { %v2201_v32 = vrot.slane %v1982_v5, 7  ;;  %v1298_v53 = vadd.f32 %v1279_v23, %v1158_v33  ;;  %v687_v1 = vrot.slane %v671_v52, 1  ;;  %v1108_v29 = vmul.f32 %v6553_v45, %v7151_v37  ;;  %v8766_v5 = vld [vmem:[#allocation43_spill] sm:$0xff] }
 0x18b   : > { %v2037_v60 = vsel %vm856_vm1, %v2035_v62, %v8764_v30  ;;  %v1533_v39 = vadd.f32 %v1495_v8, %v1297_v25  ;;  %v866_v59 = vrot.slane %v830_v57, 2  ;;  %v1212_v50 = vmul.f32 %v6597_v13, %v7151_v37  ;;  %v8769_v30 = vld [vmem:[#allocation44_spill] sm:$0xff] }
 0x18c   : > { %v2202_v9 = vsel %vm2193_vm2, %v2200_v56, %v2201_v32  ;;  %v1534_v23 = vadd.f32 %v1497_v49, %v1298_v53  ;;  %v706_v12 = vadd.f32 %v687_v1, %v8765_v42  ;;  %v707_v51 = vadd.f32 %v687_v1, %v567_v40 }
 0x18d   : > { %v2232_v36 = vadd.f32 %v8730_v24, %v2202_v9  ;;  %v1697_v27 = vadd.f32 %v8766_v5, %v1533_v39  ;;  %v8768_v19 = vrot.slane %v8767_v41, 2  ;;  %v1228_v33 = vrot.slane %v1212_v50, 1  ;;  %v8772_v41 = vld [vmem:[#allocation37_spill] sm:$0xff] }
 0x18e   : > { %v1371_v8 = vmul.f32 %v6556_v46, %v7151_v37  ;;  %v1698_v52 = vadd.f32 %v1682_v6, %v1534_v23  ;;  %v903_v56 = vadd.f32 %v866_v59, %v706_v12  ;;  %v1648_v49 = vmul.f32 %v6609_v17, %v7216_v34 }
 0x18f   : > { %v868_v63 = vsel %vm856_vm1, %v866_v59, %v8768_v19  ;;  %5423 = vmatprep.mubr.msk.f32.mxu0 %vm343_vm0, %v2232_v36  ;;  %v1837_v25 = vadd.f32 %v1819_v2, %v1697_v27  ;;  %v1752_v57 = vmul.f32 %v6626_v43, %v7216_v34  ;;  %v1911_v53 = vmul.f32 %v6573_v58, %v7216_v34  ;;  %v8770_v59 = vld [vmem:[#allocation36_spill] sm:$0xff] }
 0x190   : > { %v904_v32 = vadd.f32 %v868_v63, %v707_v51  ;;  %v1406_v40 = vrot.slane %v1371_v8, 2  ;;  %v1838_v54 = vadd.f32 %v1819_v2, %v1698_v52  ;;  %v1123_v1 = vadd.f32 %v8769_v30, %v903_v56 }
 0x191   : > { %v603_v6 = vmul.f32 %v6520_v20, %v7082_v48  ;;  %v2073_v39 = vadd.f32 %v2035_v62, %v1837_v25  ;;  %v8771_v50 = vrot.slane %v8770_v59, 2  ;;  %v1768_v23 = vrot.slane %v1752_v57, 1  ;;  %v8776_v59 = vld [vmem:[#allocation40_spill] sm:$0xff] }
 0x192   : > { %v1124_v9 = vadd.f32 %v1108_v29, %v904_v32  ;;  %v1946_v42 = vrot.slane %v1911_v53, 2  ;;  %v2074_v12 = vadd.f32 %v2037_v60, %v1838_v54  ;;  %v1247_v51 = vadd.f32 %v1228_v33, %v1123_v1  ;;  %v8775_v1 = vld [vmem:[#allocation45_spill] sm:$0xff] }
 0x193   : > { %v1408_v36 = vsel %vm856_vm1, %v1406_v40, %v8771_v50  ;;  %v723_v27 = vmul.f32 %v8734_v38, %v7082_v48  ;;  %v2260_v2 = vrot.slane %v2073_v39, 7  ;;  %v8773_v19 = vrot.slane %v8772_v41, 2 }
 0x194   : > { %v1248_v5 = vadd.f32 %v1228_v33, %v1124_v9  ;;  %v923_v62 = vmul.f32 %v6534_v31, %v7082_v48  ;;  %v1144_v63 = vmul.f32 %v6578_v0, %v7151_v37  ;;  %v2261_v8 = vrot.slane %v2074_v12, 7  ;;  %v8774_v48 = vld [vmem:[#allocation46_spill] sm:$0xff] }
 0x195   : > { %v1948_v29 = vsel %vm856_vm1, %v1946_v42, %v8773_v19  ;;  %v1443_v52 = vadd.f32 %v1406_v40, %v1247_v51  ;;  %v739_v60 = vrot.slane %v723_v27, 1  ;;  %v1264_v33 = vmul.f32 %v6629_v44, %v7151_v37 }
 0x196   : > { %v1444_v56 = vadd.f32 %v1408_v36, %v1248_v5  ;;  %v958_v32 = vrot.slane %v923_v62, 2  ;;  %v1463_v25 = vmul.f32 %v6585_v3, %v7151_v37  ;;  %v1684_v57 = vmul.f32 %v6641_v61, %v7216_v34 }
 0x197   : > { %v2262_v53 = vsel %vm2193_vm2, %v2260_v2, %v2261_v8  ;;  %v1663_v54 = vadd.f32 %v8774_v48, %v1443_v52  ;;  %v758_v9 = vadd.f32 %v739_v60, %v8775_v1  ;;  %v759_v39 = vadd.f32 %v739_v60, %v603_v6  ;;  %v8778_v52 = vld [vmem:[#allocation47_spill] sm:$0xff]  ;;  %v8779_v60 = vld [vmem:[#allocation41_spill] sm:$0xff] }
 0x198   : > { %v1664_v30 = vadd.f32 %v1648_v49, %v1444_v56  ;;  %v2292_v40 = vadd.f32 %v8735_v21, %v2262_v53  ;;  %v8777_v50 = vrot.slane %v8776_v59, 2  ;;  %v1280_v12 = vrot.slane %v1264_v33, 1 }
 0x199   : > { %v1787_v51 = vadd.f32 %v1768_v23, %v1663_v54  ;;  %v995_v27 = vadd.f32 %v958_v32, %v758_v9  ;;  %v1498_v41 = vrot.slane %v1463_v25, 2  ;;  %v1804_v49 = vmul.f32 %v6649_v47, %v7216_v34 }
 0x19a   : > { %v960_v36 = vsel %vm856_vm1, %v958_v32, %v8777_v50  ;;  %v1788_v5 = vadd.f32 %v1768_v23, %v1664_v30  ;;  %5443 = vmatprep.mubr.msk.f32.mxu1 %vm343_vm0, %v2292_v40  ;;  %v2003_v19 = vmul.f32 %v6588_v4, %v7216_v34  ;;  %v569_v6 = vmul.f32 %v6509_v14, %v7151_v37  ;;  %v7284_v50 = vld [vmem:[#allocation2 + $0x98] sm:$0xff] }
 0x19b   : > { %v996_v2 = vadd.f32 %v960_v36, %v759_v39  ;;  %v1983_v62 = vadd.f32 %v1946_v42, %v1787_v51  ;;  %v1159_v56 = vadd.f32 %v8778_v52, %v995_v27  ;;  %v8780_v23 = vrot.slane %v8779_v60, 2 }
 0x19c   : > { %v1984_v8 = vadd.f32 %v1948_v29, %v1788_v5  ;;  %v1820_v25 = vrot.slane %v1804_v49, 1  ;;  %v2038_v53 = vrot.slane %v2003_v19, 2  ;;  %v672_v48 = vmul.f32 %v6499_v10, %v7151_v37  ;;  %v8781_v29 = vld [vmem:[#allocation42_spill] sm:$0xff]  ;;  %v8783_v49 = vld [vmem:[#allocation53_spill] sm:$0xff] }
 0x19d   : > { %v1500_v32 = vsel %vm856_vm1, %v1498_v41, %v8780_v23  ;;  %v1160_v33 = vadd.f32 %v1144_v63, %v996_v2  ;;  %v2203_v54 = vrot.slane %v1983_v62, 7  ;;  %v1299_v1 = vadd.f32 %v1280_v12, %v1159_v56 }
 0x19e   : > { %v2204_v30 = vrot.slane %v1984_v8, 7  ;;  %v832_v9 = vmul.f32 %v6514_v16, %v7151_v37  ;;  %v8782_v40 = vrot.slane %v8781_v29, 2  ;;  %v688_v59 = vrot.slane %v672_v48, 1  ;;  %v8784_v8 = vld [vmem:[#allocation52_spill] sm:$0xff] }
 0x19f   : > { %v1300_v42 = vadd.f32 %v1280_v12, %v1160_v33  ;;  %v1110_v63 = vmul.f32 %v6553_v45, %v7216_v34  ;;  %v1535_v51 = vadd.f32 %v1498_v41, %v1299_v1  ;;  %v1213_v27 = vmul.f32 %v6597_v13, %v7216_v34 }
 0x1a0   : > { %v2040_v39 = vsel %vm856_vm1, %v2038_v53, %v8782_v40  ;;  %v2205_v36 = vsel %vm2193_vm2, %v2203_v54, %v2204_v30  ;;  %v869_v5 = vrot.slane %v832_v9, 2  ;;  %v708_v19 = vadd.f32 %v688_v59, %v8783_v49 }
 0x1a1   : > { %v2233_v2 = vadd.f32 %v8730_v24, %v2205_v36  ;;  %v1536_v12 = vadd.f32 %v1500_v32, %v1300_v42  ;;  %v709_v62 = vadd.f32 %v688_v59, %v569_v6  ;;  %v1699_v52 = vadd.f32 %v8784_v8, %v1535_v51  ;;  %v8786_v42 = vld [vmem:[#allocation54_spill] sm:$0xff]  ;;  %v8787_v36 = vld [vmem:[#allocation48_spill] sm:$0xff]  ;;  %v8789_v8 = vld [vmem:[#allocation49_spill] sm:$0xff] }
 0x1a2   : > { %v8785_v56 = vrot.slane %v6787_v11, 2  ;;  %v1229_v23 = vrot.slane %v1213_v27, 1  ;;  %v1373_v41 = vmul.f32 %v6556_v46, %v7216_v34  ;;  %v905_v48 = vadd.f32 %v869_v5, %v708_v19 }
 0x1a3   : > { %5424 = vmatmul.mubr.msk.f32.gmra.mrb[2].mxu0 %vm343_vm0, %v2233_v2  ;;  %v1700_v33 = vadd.f32 %v1684_v57, %v1536_v12  ;;  %v1650_v32 = vmul.f32 %v6609_v17, %v7284_v50  ;;  %v1839_v30 = vadd.f32 %v1820_v25, %v1699_v52  ;;  %v1753_v1 = vmul.f32 %v6626_v43, %v7284_v50 }
 0x1a4   : > { %v871_v60 = vsel %vm856_vm1, %v869_v5, %v8785_v56  ;;  %v1409_v6 = vrot.slane %v1373_v41, 2  ;;  %v1913_v11 = vmul.f32 %v6573_v58, %v7284_v50  ;;  %v1125_v29 = vadd.f32 %v8786_v42, %v905_v48  ;;  %v8792_v42 = vld [vmem:[#allocation55_spill] sm:$0xff] }
 0x1a5   : > { %v906_v54 = vadd.f32 %v871_v60, %v709_v62  ;;  %v1840_v9 = vadd.f32 %v1820_v25, %v1700_v33  ;;  %v605_v57 = vmul.f32 %v6520_v20, %v7151_v37  ;;  %v2075_v59 = vadd.f32 %v2038_v53, %v1839_v30 }
 0x1a6   : > { %v8788_v51 = vrot.slane %v8787_v36, 2  ;;  %v1769_v27 = vrot.slane %v1753_v1, 1  ;;  %v1949_v2 = vrot.slane %v1913_v11, 2  ;;  %v1249_v49 = vadd.f32 %v1229_v23, %v1125_v29 }
 0x1a7   : > { %v1126_v40 = vadd.f32 %v1110_v63, %v906_v54  ;;  %v2076_v12 = vadd.f32 %v2040_v39, %v1840_v9  ;;  %v724_v62 = vmul.f32 %v8734_v38, %v7151_v37  ;;  %v2263_v25 = vrot.slane %v2075_v59, 7  ;;  %v8793_v59 = vld [vmem:[#allocation50_spill] sm:$0xff] }
 0x1a8   : > { %v1411_v5 = vsel %vm856_vm1, %v1409_v6, %v8788_v51  ;;  %v8790_v52 = vrot.slane %v8789_v8, 2  ;;  %v925_v53 = vmul.f32 %v6534_v31, %v7151_v37  ;;  %v1146_v56 = vmul.f32 %v6578_v0, %v7216_v34  ;;  %v8791_v37 = vld [vmem:[#allocation58_spill] sm:$0xff] }
 0x1a9   : > { %v1250_v19 = vadd.f32 %v1229_v23, %v1126_v40  ;;  %v2264_v60 = vrot.slane %v2076_v12, 7  ;;  %v1445_v41 = vadd.f32 %v1409_v6, %v1249_v49  ;;  %v740_v39 = vrot.slane %v724_v62, 1 }
 0x1aa   : > { %v1951_v63 = vsel %vm856_vm1, %v1949_v2, %v8790_v52  ;;  %v961_v48 = vrot.slane %v925_v53, 2  ;;  %v1265_v23 = vmul.f32 %v6629_v44, %v7216_v34  ;;  %v1465_v54 = vmul.f32 %v6585_v3, %v7216_v34 }
 0x1ab   : > { %v1446_v33 = vadd.f32 %v1411_v5, %v1250_v19  ;;  %v1686_v30 = vmul.f32 %v6641_v61, %v7284_v50  ;;  %v2265_v1 = vsel %vm2193_vm2, %v2263_v25, %v2264_v60  ;;  %v1665_v11 = vadd.f32 %v8791_v37, %v1445_v41  ;;  %v8795_v60 = vld [vmem:[#allocation61_spill] sm:$0xff] }
 0x1ac   : > { %v760_v29 = vadd.f32 %v740_v39, %v8792_v42  ;;  %v2293_v6 = vadd.f32 %v8735_v21, %v2265_v1  ;;  %v761_v40 = vadd.f32 %v740_v39, %v605_v57  ;;  %v8794_v36 = vrot.slane %v8793_v59, 2  ;;  %v7352_v59 = vld [vmem:[#allocation2 + $0xb0] sm:$0xff] }
 0x1ad   : > { %v1666_v9 = vadd.f32 %v1650_v32, %v1446_v33  ;;  %v1281_v5 = vrot.slane %v1265_v23, 1  ;;  %v1789_v12 = vadd.f32 %v1769_v27, %v1665_v11  ;;  %v1501_v62 = vrot.slane %v1465_v54, 2  ;;  %v8796_v33 = vld [vmem:[#allocation51_spill] sm:$0xff] }
 0x1ae   : > { %v963_v51 = vsel %vm856_vm1, %v961_v48, %v8794_v36  ;;  %v997_v19 = vadd.f32 %v961_v48, %v760_v29  ;;  %5444 = vmatmul.mubr.msk.f32.gmra.mrb[2].mxu1 %vm343_vm0, %v2293_v6  ;;  %v1805_v32 = vmul.f32 %v6649_v47, %v7284_v50  ;;  %v2005_v8 = vmul.f32 %v6588_v4, %v7284_v50 }
 0x1af   : > { %v1790_v49 = vadd.f32 %v1769_v27, %v1666_v9  ;;  %v998_v25 = vadd.f32 %v963_v51, %v761_v40  ;;  %v571_v57 = vmul.f32 %v6509_v14, %v7216_v34  ;;  %v1985_v52 = vadd.f32 %v1949_v2, %v1789_v12 }
 0x1b0   : > { %v1161_v41 = vadd.f32 %v8795_v60, %v997_v19  ;;  %v8797_v27 = vrot.slane %v8796_v33, 2  ;;  %v1821_v23 = vrot.slane %v1805_v32, 1  ;;  %v2041_v54 = vrot.slane %v2005_v8, 2  ;;  %v8802_v60 = vld [vmem:[#allocation57_spill] sm:$0xff] }
 0x1b1   : > { %v1986_v53 = vadd.f32 %v1951_v63, %v1790_v49  ;;  %v1162_v48 = vadd.f32 %v1146_v56, %v998_v25  ;;  %v673_v1 = vmul.f32 %v6499_v10, %v7216_v34  ;;  %v2206_v37 = vrot.slane %v1985_v52, 7  ;;  %v8798_v63 = vld [vmem:[#allocation56_spill] sm:$0xff]  ;;  %v8800_v25 = vld [vmem:[#allocation59_spill] sm:$0xff]  ;;  %v8801_v52 = vld [vmem:[#allocation66_spill] sm:$0xff] }
 0x1b2   : > { %v1503_v39 = vsel %vm856_vm1, %v1501_v62, %v8797_v27  ;;  %v1301_v9 = vadd.f32 %v1281_v5, %v1161_v41  ;;  %v834_v42 = vmul.f32 %v6514_v16, %v7216_v34  ;;  %v8799_v29 = vrot.slane %v8798_v63, 2  ;;  %v8804_v63 = vld [vmem:[#allocation67_spill] sm:$0xff] }
 0x1b3   : > { %v2207_v11 = vrot.slane %v1986_v53, 7  ;;  %v1302_v2 = vadd.f32 %v1281_v5, %v1162_v48  ;;  %v689_v40 = vrot.slane %v673_v1, 1  ;;  %v1112_v56 = vmul.f32 %v6553_v45, %v7284_v50 }
 0x1b4   : > { %v2043_v6 = vsel %vm856_vm1, %v2041_v54, %v8799_v29  ;;  %v1537_v51 = vadd.f32 %v1501_v62, %v1301_v9  ;;  %v872_v12 = vrot.slane %v834_v42, 2  ;;  %v1214_v49 = vmul.f32 %v6597_v13, %v7284_v50 }
 0x1b5   : > { %v2208_v36 = vsel %vm2193_vm2, %v2206_v37, %v2207_v11  ;;  %v1538_v5 = vadd.f32 %v1503_v39, %v1302_v2  ;;  %v710_v32 = vadd.f32 %v689_v40, %v8800_v25  ;;  %v711_v8 = vadd.f32 %v689_v40, %v571_v57 }
 0x1b6   : > { %v2234_v19 = vadd.f32 %v8730_v24, %v2208_v36  ;;  %v1701_v53 = vadd.f32 %v8801_v52, %v1537_v51  ;;  %v8803_v41 = vrot.slane %v8802_v60, 2  ;;  %v1230_v27 = vrot.slane %v1214_v49, 1  ;;  %v8805_v51 = vld [vmem:[#allocation60_spill] sm:$0xff] }
 0x1b7   : > { %v1375_v62 = vmul.f32 %v6556_v46, %v7284_v50  ;;  %v1702_v48 = vadd.f32 %v1686_v30, %v1538_v5  ;;  %v907_v1 = vadd.f32 %v872_v12, %v710_v32  ;;  %v1652_v39 = vmul.f32 %v6609_v17, %v7352_v59 }
 0x1b8   : > { %v874_v33 = vsel %vm856_vm1, %v872_v12, %v8803_v41  ;;  %5426 = vmatprep.mubr.msk.f32.mxu0 %vm343_vm0, %v2234_v19  ;;  %v1841_v11 = vadd.f32 %v1821_v23, %v1701_v53  ;;  %v1754_v9 = vmul.f32 %v6626_v43, %v7352_v59  ;;  %v1915_v42 = vmul.f32 %v6573_v58, %v7352_v59  ;;  %v8807_v53 = vld [vmem:[#allocation62_spill] sm:$0xff] }
 0x1b9   : > { %v908_v37 = vadd.f32 %v874_v33, %v711_v8  ;;  %v1412_v57 = vrot.slane %v1375_v62, 2  ;;  %v1842_v2 = vadd.f32 %v1821_v23, %v1702_v48  ;;  %v1127_v29 = vadd.f32 %v8804_v63, %v907_v1  ;;  %v8810_v63 = vld [vmem:[#allocation63_spill] sm:$0xff] }
 0x1ba   : > { %v607_v30 = vmul.f32 %v6520_v20, %v7216_v34  ;;  %v2077_v36 = vadd.f32 %v2041_v54, %v1841_v11  ;;  %v8806_v12 = vrot.slane %v8805_v51, 2  ;;  %v1770_v19 = vrot.slane %v1754_v9, 1 }
 0x1bb   : > { %v1128_v40 = vadd.f32 %v1112_v56, %v908_v37  ;;  %v1952_v5 = vrot.slane %v1915_v42, 2  ;;  %v2078_v25 = vadd.f32 %v2043_v6, %v1842_v2  ;;  %v1251_v32 = vadd.f32 %v1230_v27, %v1127_v29 }
 0x1bc   : > { %v1414_v49 = vsel %vm856_vm1, %v1412_v57, %v8806_v12  ;;  %v725_v52 = vmul.f32 %v8734_v38, %v7216_v34  ;;  %v2266_v23 = vrot.slane %v2077_v36, 7  ;;  %v8808_v60 = vrot.slane %v8807_v53, 2  ;;  %v8811_v36 = vld [vmem:[#allocation64_spill] sm:$0xff] }
 0x1bd   : > { %v1252_v8 = vadd.f32 %v1230_v27, %v1128_v40  ;;  %v927_v54 = vmul.f32 %v6534_v31, %v7216_v34  ;;  %v1148_v41 = vmul.f32 %v6578_v0, %v7284_v50  ;;  %v2267_v33 = vrot.slane %v2078_v25, 7  ;;  %v8809_v34 = vld [vmem:[#allocation68_spill] sm:$0xff] }
 0x1be   : > { %v1954_v56 = vsel %vm856_vm1, %v1952_v5, %v8808_v60  ;;  %v1447_v62 = vadd.f32 %v1412_v57, %v1251_v32  ;;  %v741_v6 = vrot.slane %v725_v52, 1  ;;  %v1266_v27 = vmul.f32 %v6629_v44, %v7284_v50 }
 0x1bf   : > { %v1448_v48 = vadd.f32 %v1414_v49, %v1252_v8  ;;  %v964_v1 = vrot.slane %v927_v54, 2  ;;  %v1467_v37 = vmul.f32 %v6585_v3, %v7284_v50  ;;  %v1688_v11 = vmul.f32 %v6641_v61, %v7352_v59 }
 0x1c0   : > { %v2268_v9 = vsel %vm2193_vm2, %v2266_v23, %v2267_v33  ;;  %v1667_v42 = vadd.f32 %v8809_v34, %v1447_v62  ;;  %v762_v29 = vadd.f32 %v741_v6, %v8810_v63  ;;  %v763_v40 = vadd.f32 %v741_v6, %v607_v30  ;;  %v8813_v33 = vld [vmem:[#allocation69_spill] sm:$0xff] }
 0x1c1   : > { %v1668_v2 = vadd.f32 %v1652_v39, %v1448_v48  ;;  %v2294_v57 = vadd.f32 %v8735_v21, %v2268_v9  ;;  %v8812_v51 = vrot.slane %v8811_v36, 2  ;;  %v1282_v49 = vrot.slane %v1266_v27, 1  ;;  %v8814_v48 = vld [vmem:[#allocation65_spill] sm:$0xff] }
 0x1c2   : > { %v1791_v25 = vadd.f32 %v1770_v19, %v1667_v42  ;;  %v999_v8 = vadd.f32 %v964_v1, %v762_v29  ;;  %v1504_v52 = vrot.slane %v1467_v37, 2  ;;  %v1806_v39 = vmul.f32 %v6649_v47, %v7352_v59 }
 0x1c3   : > { %v966_v12 = vsel %vm856_vm1, %v964_v1, %v8812_v51  ;;  %v1792_v32 = vadd.f32 %v1770_v19, %v1668_v2  ;;  %5446 = vmatprep.mubr.msk.f32.mxu1 %vm343_vm0, %v2294_v57  ;;  %v2007_v53 = vmul.f32 %v6588_v4, %v7352_v59  ;;  %v573_v30 = vmul.f32 %v6509_v14, %v7284_v50 }
 0x1c4   : > { %v1000_v23 = vadd.f32 %v966_v12, %v763_v40  ;;  %v1987_v60 = vadd.f32 %v1952_v5, %v1791_v25  ;;  %v1163_v62 = vadd.f32 %v8813_v33, %v999_v8  ;;  %v8815_v19 = vrot.slane %v8814_v48, 2  ;;  %v7420_v40 = vld [vmem:[#allocation2 + $0xc8] sm:$0xff] }
 0x1c5   : > { %v1988_v54 = vadd.f32 %v1954_v56, %v1792_v32  ;;  %v1822_v27 = vrot.slane %v1806_v39, 1  ;;  %v2044_v37 = vrot.slane %v2007_v53, 2  ;;  %v674_v9 = vmul.f32 %v6499_v10, %v7284_v50  ;;  %v8817_v8 = vld [vmem:[#allocation70_spill] sm:$0xff] }
 0x1c6   : > { %v1506_v6 = vsel %vm856_vm1, %v1504_v52, %v8815_v19  ;;  %v1164_v1 = vadd.f32 %v1148_v41, %v1000_v23  ;;  %v2209_v34 = vrot.slane %v1987_v60, 7  ;;  %v1303_v2 = vadd.f32 %v1282_v49, %v1163_v62 }
 0x1c7   : > { %v2210_v42 = vrot.slane %v1988_v54, 7  ;;  %v836_v63 = vmul.f32 %v6514_v16, %v7284_v50  ;;  %v8816_v56 = vrot.slane %v6890_v28, 2  ;;  %v690_v57 = vrot.slane %v674_v9, 1  ;;  %v8819_v9 = vld [vmem:[#allocation74_spill] sm:$0xff] }
 0x1c8   : > { %v1304_v5 = vadd.f32 %v1282_v49, %v1164_v1  ;;  %v1114_v41 = vmul.f32 %v6553_v45, %v7352_v59  ;;  %v1539_v51 = vadd.f32 %v1504_v52, %v1303_v2  ;;  %v1215_v25 = vmul.f32 %v6597_v13, %v7352_v59 }
 0x1c9   : > { %v2046_v29 = vsel %vm856_vm1, %v2044_v37, %v8816_v56  ;;  %v2211_v36 = vsel %vm2193_vm2, %v2209_v34, %v2210_v42  ;;  %v875_v12 = vrot.slane %v836_v63, 2  ;;  %v712_v28 = vadd.f32 %v690_v57, %v8817_v8 }
 0x1ca   : > { %v2235_v32 = vadd.f32 %v8730_v24, %v2211_v36  ;;  %v1540_v49 = vadd.f32 %v1506_v6, %v1304_v5  ;;  %v713_v23 = vadd.f32 %v690_v57, %v573_v30  ;;  %v1703_v39 = vadd.f32 %v6939_v15, %v1539_v51 }
 0x1cb   : > { %v8818_v53 = vrot.slane %v6900_v55, 2  ;;  %v1231_v54 = vrot.slane %v1215_v25, 1  ;;  %v1377_v52 = vmul.f32 %v6556_v46, %v7352_v59  ;;  %v909_v62 = vadd.f32 %v875_v12, %v712_v28 }
 0x1cc   : > { %5427 = vmatmul.mubr.msk.f32.gmra.mrb[4].mxu0 %vm343_vm0, %v2235_v32  ;;  %v1704_v33 = vadd.f32 %v1688_v11, %v1540_v49  ;;  %v1654_v19 = vmul.f32 %v6609_v17, %v7420_v40  ;;  %v1843_v6 = vadd.f32 %v1822_v27, %v1703_v39  ;;  %v1755_v15 = vmul.f32 %v6626_v43, %v7420_v40 }
 0x1cd   : > { %v877_v60 = vsel %vm856_vm1, %v875_v12, %v8818_v53  ;;  %v1415_v30 = vrot.slane %v1377_v52, 2  ;;  %v1917_v55 = vmul.f32 %v6573_v58, %v7420_v40  ;;  %v1129_v34 = vadd.f32 %v8819_v9, %v909_v62 }
 0x1ce   : > { %v910_v48 = vadd.f32 %v877_v60, %v713_v23  ;;  %v1844_v1 = vadd.f32 %v1822_v27, %v1704_v33  ;;  %v609_v11 = vmul.f32 %v6520_v20, %v7284_v50  ;;  %v2079_v2 = vadd.f32 %v2044_v37, %v1843_v6  ;;  %v8822_v6 = vld [vmem:[#allocation71_spill] sm:$0xff] }
 0x1cf   : > { %v8820_v63 = vrot.slane %v6919_v26, 2  ;;  %v1771_v56 = vrot.slane %v1755_v15, 1  ;;  %v1955_v57 = vrot.slane %v1917_v55, 2  ;;  %v1253_v51 = vadd.f32 %v1231_v54, %v1129_v34 }
 0x1d0   : > { %v1130_v42 = vadd.f32 %v1114_v41, %v910_v48  ;;  %v2080_v36 = vadd.f32 %v2046_v29, %v1844_v1  ;;  %v726_v25 = vmul.f32 %v8734_v38, %v7284_v50  ;;  %v2269_v27 = vrot.slane %v2079_v2, 7 }
 0x1d1   : > { %v1417_v5 = vsel %vm856_vm1, %v1415_v30, %v8820_v63  ;;  %v8821_v32 = vrot.slane %v6923_v18, 2  ;;  %v929_v37 = vmul.f32 %v6534_v31, %v7284_v50  ;;  %v1150_v26 = vmul.f32 %v6578_v0, %v7352_v59  ;;  %v7459_v18 = vld [vmem:[#allocation2 + $0xc0] sm:$0xff] }
 0x1d2   : > { %v1254_v12 = vadd.f32 %v1231_v54, %v1130_v42  ;;  %v2270_v49 = vrot.slane %v2080_v36, 7  ;;  %v1449_v8 = vadd.f32 %v1415_v30, %v1253_v51  ;;  %v742_v29 = vrot.slane %v726_v25, 1  ;;  %v8824_v36 = vld [vmem:[#allocation72_spill] sm:$0xff] }
 0x1d3   : > { %v1957_v41 = vsel %vm856_vm1, %v1955_v57, %v8821_v32  ;;  %v967_v23 = vrot.slane %v929_v37, 2  ;;  %v1267_v39 = vmul.f32 %v6629_v44, %v7352_v59  ;;  %v1469_v53 = vmul.f32 %v6585_v3, %v7352_v59 }
 0x1d4   : > { %v1450_v28 = vadd.f32 %v1417_v5, %v1254_v12  ;;  %v1689_v60 = vmul.f32 %v7459_v18, %v6641_v61  ;;  %v2271_v50 = vsel %vm2193_vm2, %v2269_v27, %v2270_v49  ;;  %v1669_v54 = vadd.f32 %v6993_v7, %v1449_v8 }
 0x1d5   : > { %v764_v33 = vadd.f32 %v742_v29, %v6954_v22  ;;  %v2295_v62 = vadd.f32 %v8735_v21, %v2271_v50  ;;  %v765_v48 = vadd.f32 %v742_v29, %v609_v11  ;;  %v8823_v30 = vrot.slane %v8822_v6, 2  ;;  %v7497_v6 = vld [vmem:[#allocation2 + $0xd8] sm:$0xff] }
 0x1d6   : > { %v1670_v52 = vadd.f32 %v1654_v19, %v1450_v28  ;;  %v1283_v55 = vrot.slane %v1267_v39, 1  ;;  %v1793_v1 = vadd.f32 %v1771_v56, %v1669_v54  ;;  %v1507_v42 = vrot.slane %v1469_v53, 2 }
 0x1d7   : > { %v969_v15 = vsel %vm856_vm1, %v967_v23, %v8823_v30  ;;  %v1001_v34 = vadd.f32 %v967_v23, %v764_v33  ;;  %5447 = vmatmul.mubr.msk.f32.gmra.mrb[4].mxu1 %vm343_vm0, %v2295_v62  ;;  %v1690_v7 = vmul.f32 %v6641_v61, %v7420_v40  ;;  %v1807_v22 = vmul.f32 %v6649_v47, %v7420_v40 }
 0x1d8   : > { %v1794_v9 = vadd.f32 %v1771_v56, %v1670_v52  ;;  %v1002_v2 = vadd.f32 %v969_v15, %v765_v48  ;;  %v2009_v19 = vmul.f32 %v6588_v4, %v7420_v40  ;;  %v1989_v11 = vadd.f32 %v1955_v57, %v1793_v1 }
 0x1d9   : > { %v1165_v5 = vadd.f32 %v6997_v35, %v1001_v34  ;;  %v8825_v56 = vrot.slane %v8824_v36, 2  ;;  %v1823_v25 = vrot.slane %v1807_v22, 1  ;;  %v575_v32 = vmul.f32 %v6509_v14, %v7352_v59 }
 0x1da   : > { %v1990_v63 = vadd.f32 %v1957_v41, %v1794_v9  ;;  %v1166_v12 = vadd.f32 %v1150_v26, %v1002_v2  ;;  %v2047_v27 = vrot.slane %v2009_v19, 2  ;;  %v2212_v37 = vrot.slane %v1989_v11, 7  ;;  %v8826_v41 = vld [vmem:[#allocation76_spill] sm:$0xff]  ;;  %v8828_v26 = vld [vmem:[#allocation78_spill] sm:$0xff]  ;;  %v7503_v9 = vld [vmem:[#allocation2 + $0xe0] sm:$0xff] }
 0x1db   : > { %v1509_v51 = vsel %vm856_vm1, %v1507_v42, %v8825_v56  ;;  %v1305_v8 = vadd.f32 %v1283_v55, %v1165_v5  ;;  %v675_v28 = vmul.f32 %v6499_v10, %v7352_v59  ;;  %v8827_v29 = vrot.slane %v8826_v41, 2 }
 0x1dc   : > { %v2213_v49 = vrot.slane %v1990_v63, 7  ;;  %v1306_v57 = vadd.f32 %v1283_v55, %v1166_v12  ;;  %v838_v23 = vmul.f32 %v6514_v16, %v7352_v59  ;;  %v879_v39 = vrot.slane %v8828_v26, 2  ;;  %v8829_v16 = vld [vmem:[#allocation75_spill] sm:$0xff]  ;;  %v7512_v63 = vld [vmem:[#allocation2 + $0xe8] sm:$0xff] }
 0x1dd   : > { %v2049_v35 = vsel %vm856_vm1, %v2047_v27, %v8827_v29  ;;  %v1541_v50 = vadd.f32 %v1507_v42, %v1305_v8  ;;  %v691_v14 = vrot.slane %v675_v28, 1  ;;  %v1115_v54 = vmul.f32 %v7459_v18, %v6553_v45  ;;  %v7525_v26 = vld [vmem:[#allocation2 + $0xa8] sm:$0xff] }
 0x1de   : > { %v2214_v53 = vsel %vm2193_vm2, %v2212_v37, %v2213_v49  ;;  %v1542_v10 = vadd.f32 %v1509_v51, %v1306_v57  ;;  %v878_v33 = vrot.slane %v838_v23, 2  ;;  %v1116_v62 = vmul.f32 %v6553_v45, %v7420_v40  ;;  %v7508_v45 = vld [vmem:[#allocation2 + $0xd0] sm:$0xff] }
 0x1df   : > { %v2236_v52 = vadd.f32 %v8730_v24, %v2214_v53  ;;  %v1705_v48 = vadd.f32 %v1689_v60, %v1541_v50  ;;  %v714_v30 = vadd.f32 %v691_v14, %v8829_v16  ;;  %v715_v15 = vadd.f32 %v691_v14, %v575_v32 }
 0x1e0   : > { %v1216_v55 = vmul.f32 %v6597_v13, %v7420_v40  ;;  %v1706_v1 = vadd.f32 %v1690_v7, %v1542_v10  ;;  %v880_v34 = vsel %vm856_vm1, %v878_v33, %v879_v39  ;;  %v1379_v42 = vmul.f32 %v6556_v46, %v7420_v40 }
 0x1e1   : > { %5429 = vmatprep.mubr.msk.f32.mxu0 %vm343_vm0, %v2236_v52  ;;  %v1380_v60 = vmul.f32 %v7508_v45, %v6556_v46  ;;  %v1845_v2 = vadd.f32 %v1823_v25, %v1705_v48  ;;  %v911_v22 = vadd.f32 %v878_v33, %v714_v30  ;;  %v912_v19 = vadd.f32 %v880_v34, %v715_v15 }
 0x1e2   : > { %v1232_v11 = vrot.slane %v1216_v55, 1  ;;  %v1846_v13 = vadd.f32 %v1823_v25, %v1706_v1  ;;  %v1418_v7 = vrot.slane %v1379_v42, 2  ;;  %v1655_v36 = vmul.f32 %v6609_v17, %v7497_v6 }
 0x1e3   : > { %v1419_v5 = vrot.slane %v1380_v60, 2  ;;  %v2081_v56 = vadd.f32 %v2047_v27, %v1845_v2  ;;  %v1131_v51 = vadd.f32 %v1115_v54, %v911_v22  ;;  %v1132_v12 = vadd.f32 %v1116_v62, %v912_v19  ;;  %v7536_v54 = vld [vmem:[#allocation2 + $0xb8] sm:$0xff] }
 0x1e4   : > { %v1656_v32 = vmul.f32 %v6609_v17, %v7503_v9  ;;  %v2082_v37 = vadd.f32 %v2049_v35, %v1846_v13  ;;  %v1756_v49 = vmul.f32 %v6626_v43, %v7503_v9  ;;  %v1919_v25 = vmul.f32 %v6573_v58, %v7503_v9 }
 0x1e5   : > { %v1420_v46 = vsel %vm856_vm1, %v1418_v7, %v1419_v5  ;;  %v2272_v8 = vrot.slane %v2081_v56, 7  ;;  %v1255_v28 = vadd.f32 %v1232_v11, %v1131_v51  ;;  %v1256_v57 = vadd.f32 %v1232_v11, %v1132_v12 }
 0x1e6   : > { %v1920_v27 = vmul.f32 %v6573_v58, %v7512_v63  ;;  %v2273_v41 = vrot.slane %v2082_v37, 7  ;;  %v1772_v29 = vrot.slane %v1756_v49, 1  ;;  %v1958_v23 = vrot.slane %v1919_v25, 2 }
 0x1e7   : > { %v610_v17 = vmul.f32 %v7525_v26, %v6520_v20  ;;  %v1451_v35 = vadd.f32 %v1418_v7, %v1255_v28  ;;  %v1452_v39 = vadd.f32 %v1420_v46, %v1256_v57  ;;  %v611_v53 = vmul.f32 %v6520_v20, %v7352_v59 }
 0x1e8   : > { %v1959_v43 = vrot.slane %v1920_v27, 2  ;;  %v2274_v50 = vsel %vm2193_vm2, %v2272_v8, %v2273_v41  ;;  %v727_v14 = vmul.f32 %v8734_v38, %v7352_v59  ;;  %v931_v58 = vmul.f32 %v6534_v31, %v7352_v59 }
 0x1e9   : > { %v932_v52 = vmul.f32 %v7536_v54, %v6534_v31  ;;  %v2296_v10 = vadd.f32 %v8735_v21, %v2274_v50  ;;  %v1671_v33 = vadd.f32 %v1655_v36, %v1451_v35  ;;  %v1672_v62 = vadd.f32 %v1656_v32, %v1452_v39  ;;  %v5070_v36 = vld [vmem:[%s8590_s5 + $0x58] sm:$0xff]  ;;  %v8830_v35 = vld [vmem:[#allocation9_spill] sm:$0xff] }
 0x1ea   : > { %v1960_v48 = vsel %vm856_vm1, %v1958_v23, %v1959_v43  ;;  %v743_v20 = vrot.slane %v727_v14, 1  ;;  %v970_v16 = vrot.slane %v931_v58, 2  ;;  %v1151_v38 = vmul.f32 %v7459_v18, %v6578_v0  ;;  %v8832_v43 = vld [vmem:[#allocation77_spill] sm:$0xff] }
 0x1eb   : > { %v971_v30 = vrot.slane %v932_v52, 2  ;;  %5449 = vmatprep.mubr.msk.f32.mxu1 %vm343_vm0, %v2296_v10  ;;  %v1795_v59 = vadd.f32 %v1772_v29, %v1671_v33  ;;  %v1796_v15 = vadd.f32 %v1772_v29, %v1672_v62  ;;  %v1152_v55 = vmul.f32 %v6578_v0, %v7420_v40  ;;  %v554_v10 = vld [vmem:[%s8588_s3 + $0x20] sm:$0x7]  ;;  %v8836_v33 = vld [vmem:[#allocation80_spill] sm:$0xff] }
 0x1ec   : > { %v1268_v31 = vmul.f32 %v6629_v44, %v7420_v40  ;;  %v766_v1 = vadd.f32 %v743_v20, %v610_v17  ;;  %v767_v34 = vadd.f32 %v743_v20, %v611_v53  ;;  %v1471_v60 = vmul.f32 %v6585_v3, %v7420_v40  ;;  %v5069_v44 = vld [vmem:[%s8590_s5 + $0x50] sm:$0xff] }
 0x1ed   : > { %v972_v42 = vsel %vm856_vm1, %v970_v16, %v971_v30  ;;  %v1991_v2 = vadd.f32 %v1958_v23, %v1795_v59  ;;  %v1992_v22 = vadd.f32 %v1960_v48, %v1796_v15  ;;  %v1472_v11 = vmul.f32 %v7508_v45, %v6585_v3  ;;  %v8837_v48 = vld [vmem:[#allocation4_spill] sm:$0xff]  ;;  %v8839_v59 = vld [vmem:[#allocation3_spill] sm:$0xff] }
 0x1ee   : > { %v1284_v19 = vrot.slane %v1268_v31, 1  ;;  %v1003_v13 = vadd.f32 %v970_v16, %v766_v1  ;;  %v1004_v7 = vadd.f32 %v972_v42, %v767_v34  ;;  %v1510_v5 = vrot.slane %v1471_v60, 2  ;;  %v8838_v16 = vld [vmem:[#allocation11_spill] sm:$0xff]  ;;  %v6248_v42 = vld [vmem:[#allocation2 + $0x18] sm:$0xff] }
 0x1ef   : > { %v1691_v0 = vmul.f32 %v6641_v61, %v7497_v6  ;;  %v2215_v56 = vrot.slane %v1991_v2, 7  ;;  %v2216_v51 = vrot.slane %v1992_v22, 7  ;;  %v1511_v12 = vrot.slane %v1472_v11, 2  ;;  %v6249_v2 = vld [vmem:[#allocation2 + $0x20] sm:$0xff] }
 0x1f0   : > { %v1692_v3 = vmul.f32 %v6641_v61, %v7503_v9  ;;  %v1167_v32 = vadd.f32 %v1151_v38, %v1003_v13  ;;  %v1168_v37 = vadd.f32 %v1152_v55, %v1004_v7  ;;  %v1808_v46 = vmul.f32 %v6649_v47, %v7503_v9  ;;  %v553_v61 = vld [vmem:[%s8588_s3 + $0x1c] sm:$0x7]  ;;  %v8840_v55 = vld [vmem:[#allocation5_spill] sm:$0xff]  ;;  %v6250_v13 = vld [vmem:[#allocation2 + $0x28] sm:$0xff] }
 0x1f1   : > { %v2011_v49 = vmul.f32 %v6588_v4, %v7503_v9  ;;  %v2217_v25 = vsel %vm2193_vm2, %v2215_v56, %v2216_v51  ;;  %v1512_v8 = vsel %vm856_vm1, %v1510_v5, %v1511_v12  ;;  %v2012_v28 = vmul.f32 %v6588_v4, %v7512_v63  ;;  %v8834_v4 = vld [vmem:[#allocation79_spill] sm:$0xff] }
 0x1f2   : > { %v5772_v57 = vpack.c.bf16 %v5070_v36, %v5069_v44  ;;  %v2237_v27 = vadd.f32 %v8730_v24, %v2217_v25  ;;  %v1307_v41 = vadd.f32 %v1284_v19, %v1167_v32  ;;  %v1308_v29 = vadd.f32 %v1284_v19, %v1168_v37  ;;  %v7608_v32 = vld [vmem:[#allocation2 + $0x30] sm:$0xff] }
 0x1f3   : > { %v1824_v47 = vrot.slane %v1808_v46, 1  ;;  %v2050_v23 = vrot.slane %v2011_v49, 2  ;;  %v2051_v17 = vrot.slane %v2012_v28, 2  ;;  %v8831_v39 = vrot.slane %v8830_v35, 2 }
 0x1f4   : > { %5773 = vmatprep.subr.bf16.mxu0 %v5772_v57  ;;  %v8833_v53 = vrot.slane %v8832_v43, 2  ;;  %5430 = vmatmul.mubr.msk.f32.gmra.mrb[6].mxu0 %vm343_vm0, %v2237_v27  ;;  %v1543_v52 = vadd.f32 %v1510_v5, %v1307_v41  ;;  %v1544_v24 = vadd.f32 %v1512_v8, %v1308_v29  ;;  %v7590_v20 = vrot.slane %v553_v61, %v8837_v48  ;;  %v7619_v27 = vld [vmem:[#allocation2 + $0x38] sm:$0xff]  ;;  %v6253_v43 = vld [vmem:[#allocation2 + $0x40] sm:$0xff] }
 0x1f5   : > { %v1045_v30 = vrot.slane %v8838_v16, 2  ;;  %v2052_v38 = vsel %vm856_vm1, %v2050_v23, %v2051_v17  ;;  %5775 = vmatpush3.bf16.msra.mxu0 %v5772_v57  ;;  %v7595_v15 = vrot.slane %v553_v61, %v8839_v59  ;;  %v7598_v31 = vrot.slane %v553_v61, %v8840_v55 }
 0x1f6   : > { %v1043_v50 = vsel %vm856_vm1, %v8833_v53, %v8831_v39  ;;  %v8835_v14 = vmov %v8833_v53  ;;  %v1707_v1 = vadd.f32 %v1691_v0, %v1543_v52  ;;  %v1708_v34 = vadd.f32 %v1692_v3, %v1544_v24  ;;  %v8842_v24 = vld [vmem:[#allocation7_spill] sm:$0xff] }
 0x1f7   : > { %v1081_v58 = vadd.f32 %v8835_v14, %v8834_v4  ;;  %v1082_v62 = vadd.f32 %v1043_v50, %v8836_v33  ;;  %v1173_v60 = vmul.f32 %v6248_v42, %v7590_v20  ;;  %v1174_v22 = vmul.f32 %v6249_v2, %v7590_v20  ;;  %v8841_v50 = vld [vmem:[#allocation73_spill] sm:$0xff] }
 0x1f8   : > { %v1313_v19 = vmul.f32 %v6249_v2, %v7595_v15  ;;  %v1549_v11 = vmul.f32 %v6249_v2, %v7598_v31  ;;  %v1550_v7 = vmul.f32 %v6250_v13, %v7598_v31  ;;  %v7606_v5 = vrot.slane %v554_v10, %v8837_v48 }
 0x1f9   : > { %v1847_v44 = vadd.f32 %v1824_v47, %v1707_v1  ;;  %v1848_v36 = vadd.f32 %v1824_v47, %v1708_v34  ;;  %v1189_v0 = vadd.f32 %v1173_v60, %v1081_v58  ;;  %v1190_v56 = vadd.f32 %v1174_v22, %v1082_v62  ;;  %v8843_v34 = vld [vmem:[#allocation8_spill] sm:$0xff] }
 0x1fa   : > { %v1329_v51 = vrot.slane %v1313_v19, 1  ;;  %v1581_v12 = vrot.slane %v1549_v11, 2  ;;  %v1582_v3 = vrot.slane %v1550_v7, 2  ;;  %v1713_v37 = vmul.f32 %v7608_v32, %v7606_v5 }
 0x1fb   : > { %v2083_v46 = vadd.f32 %v2050_v23, %v1847_v44  ;;  %v2084_v49 = vadd.f32 %v2052_v38, %v1848_v36  ;;  %v7613_v25 = vrot.slane %v554_v10, %v8839_v59  ;;  %v7616_v8 = vrot.slane %v554_v10, %v8840_v55 }
 0x1fc   : > { %v1345_v28 = vadd.f32 %v1329_v51, %v1189_v0  ;;  %v1346_v57 = vadd.f32 %v1329_v51, %v1190_v56  ;;  %v1583_v61 = vsel %vm856_vm1, %v1581_v12, %v1582_v3  ;;  %v1714_v41 = vmul.f32 %v7619_v27, %v7606_v5  ;;  %v6254_v51 = vld [vmem:[%s8589_s4] sm:$0x7] }
 0x1fd   : > { %v2275_v29 = vrot.slane %v2083_v46, 7  ;;  %v2276_v47 = vrot.slane %v2084_v49, 7  ;;  %v1853_v23 = vmul.f32 %v7619_v27, %v7613_v25  ;;  %v2089_v17 = vmul.f32 %v7619_v27, %v7616_v8 }
 0x1fe   : > { %v1621_v35 = vadd.f32 %v1581_v12, %v1345_v28  ;;  %v1622_v39 = vadd.f32 %v1583_v61, %v1346_v57  ;;  %v2090_v53 = vmul.f32 %v6253_v43, %v7616_v8  ;;  %v773_v4 = vmul.f32 %v6249_v2, %v8841_v50 }
 0x1ff   : > { %v2277_v14 = vsel %vm2193_vm2, %v2275_v29, %v2276_v47  ;;  %v1869_v58 = vrot.slane %v1853_v23, 1  ;;  %v2121_v52 = vrot.slane %v2089_v17, 2  ;;  %v1011_v10 = vmul.f32 %v6249_v2, %v8842_v24  ;;  %v7654_v17 = vld [vmem:[#allocation2 + $0x50] sm:$0xff] }
 0x200   : > { %v2297_v33 = vadd.f32 %v8735_v21, %v2277_v14  ;;  %v1729_v62 = vadd.f32 %v1713_v37, %v1621_v35  ;;  %v1730_v38 = vadd.f32 %v1714_v41, %v1622_v39  ;;  %v2122_v1 = vrot.slane %v2090_v53, 2  ;;  %v8844_v21 = vld [vmem:[#allocation10_spill] sm:$0xff] }
 0x201   : > { %v635_v42 = vmul.f32 %v6249_v2, %v8843_v34  ;;  %v789_v60 = vrot.slane %v773_v4, 1  ;;  %v1044_v22 = vrot.slane %v1011_v10, 2  ;;  %v1175_v19 = vmul.f32 %v7608_v32, %v7590_v20  ;;  %v7661_v4 = vld [vmem:[#allocation2 + $0x48] sm:$0xff] }
 0x202   : > { %5450 = vmatmul.mubr.msk.f32.gmra.mrb[6].mxu1 %vm343_vm0, %v2297_v33  ;;  %v1885_v11 = vadd.f32 %v1869_v58, %v1729_v62  ;;  %v1886_v13 = vadd.f32 %v1869_v58, %v1730_v38  ;;  %v2123_v7 = vsel %vm856_vm1, %v2121_v52, %v2122_v1  ;;  %v1314_v44 = vmul.f32 %v7619_v27, %v7595_v15 }
 0x203   : > { %v806_v36 = vadd.f32 %v789_v60, %v8844_v21  ;;  %v807_v0 = vadd.f32 %v789_v60, %v635_v42  ;;  %v1046_v2 = vsel %vm856_vm1, %v1044_v22, %v1045_v30  ;;  %v1551_v56 = vmul.f32 %v7619_v27, %v7598_v31 }
 0x204   : > { %v7649_v12 = vrot.slane %v6254_v51, %v8840_v55  ;;  %v2161_v3 = vadd.f32 %v2121_v52, %v1885_v11  ;;  %v2162_v37 = vadd.f32 %v2123_v7, %v1886_v13  ;;  %v1552_v46 = vmul.f32 %v6253_v43, %v7598_v31  ;;  %v7667_v52 = vld [vmem:[#allocation2 + $0x58] sm:$0xff] }
 0x205   : > { %v1083_v49 = vadd.f32 %v1044_v22, %v806_v36  ;;  %v1084_v28 = vadd.f32 %v1046_v2, %v807_v0  ;;  %v1176_v16 = vmul.f32 %v7619_v27, %v7590_v20  ;;  %v1584_v30 = vrot.slane %v1551_v56, 2 }
 0x206   : > { %v2314_v57 = vrot.slane %v2161_v3, 7  ;;  %v2315_v61 = vrot.slane %v2162_v37, 7  ;;  %v1330_v41 = vrot.slane %v1314_v44, 1  ;;  %v1585_v29 = vrot.slane %v1552_v46, 2 }
 0x207   : > { %v1191_v47 = vadd.f32 %v1175_v19, %v1083_v49  ;;  %v1192_v23 = vadd.f32 %v1176_v16, %v1084_v28  ;;  %v1854_v35 = vmul.f32 %v7654_v17, %v7613_v25  ;;  %v2091_v39 = vmul.f32 %v7654_v17, %v7616_v8 }
 0x208   : > { %v2316_v53 = vsel %vm2193_vm2, %v2314_v57, %v2315_v61  ;;  %v1715_v14 = vmul.f32 %v7661_v4, %v7606_v5  ;;  %v1716_v58 = vmul.f32 %v7654_v17, %v7606_v5  ;;  %v2092_v10 = vmul.f32 %v7667_v52, %v7616_v8 }
 0x209   : > { %v2350_v33 = vadd.f32 %v7649_v12, %v2316_v53  ;;  %v1347_v62 = vadd.f32 %v1330_v41, %v1191_v47  ;;  %v1348_v38 = vadd.f32 %v1330_v41, %v1192_v23  ;;  %v1586_v1 = vsel %vm856_vm1, %v1584_v30, %v1585_v29 }
 0x20a   : > { %v1870_v42 = vrot.slane %v1854_v35, 1  ;;  %v2124_v60 = vrot.slane %v2091_v39, 2  ;;  %v636_v22 = vmul.f32 %v7608_v32, %v8843_v34  ;;  %v774_v19 = vmul.f32 %v7619_v27, %v8841_v50 }
 0x20b   : > { %5460 = vmatprep.mubr.msk.f32.mxu0 %vm343_vm0, %v2350_v33  ;;  %v1623_v11 = vadd.f32 %v1584_v30, %v1347_v62  ;;  %v1624_v13 = vadd.f32 %v1586_v1, %v1348_v38  ;;  %v1013_v7 = vmul.f32 %v7619_v27, %v8842_v24  ;;  %v1014_v44 = vmul.f32 %v6253_v43, %v8842_v24  ;;  %v7699_v1 = vld [vmem:[#allocation2 + $0x60] sm:$0xff] }
 0x20c   : > { %v2125_v21 = vrot.slane %v2092_v10, 2  ;;  %v637_v36 = vmul.f32 %v7619_v27, %v8843_v34  ;;  %v790_v0 = vrot.slane %v774_v19, 1  ;;  %v1177_v32 = vmul.f32 %v7661_v4, %v7590_v20  ;;  %v7695_v10 = vld [vmem:[#allocation2 + $0x68] sm:$0xff] }
 0x20d   : > { %v1731_v2 = vadd.f32 %v1715_v14, %v1623_v11  ;;  %v1732_v56 = vadd.f32 %v1716_v58, %v1624_v13  ;;  %v1047_v51 = vrot.slane %v1013_v7, 2  ;;  %v1048_v3 = vrot.slane %v1014_v44, 2  ;;  %v6260_v13 = vld [vmem:[#allocation2 + $0x70] sm:$0xff] }
 0x20e   : > { %v808_v37 = vadd.f32 %v790_v0, %v636_v22  ;;  %v809_v46 = vadd.f32 %v790_v0, %v637_v36  ;;  %v1315_v49 = vmul.f32 %v7654_v17, %v7595_v15  ;;  %v1553_v43 = vmul.f32 %v7654_v17, %v7598_v31 }
 0x20f   : > { %v1887_v28 = vadd.f32 %v1870_v42, %v1731_v2  ;;  %v1888_v16 = vadd.f32 %v1870_v42, %v1732_v56  ;;  %v1049_v27 = vsel %vm856_vm1, %v1047_v51, %v1048_v3  ;;  %v1554_v30 = vmul.f32 %v7667_v52, %v7598_v31 }
 0x210   : > { %v2126_v57 = vsel %vm856_vm1, %v2124_v60, %v2125_v21  ;;  %v1085_v61 = vadd.f32 %v1047_v51, %v808_v37  ;;  %v1086_v41 = vadd.f32 %v1049_v27, %v809_v46  ;;  %v1178_v29 = vmul.f32 %v7654_v17, %v7590_v20 }
 0x211   : > { %v2163_v47 = vadd.f32 %v2124_v60, %v1887_v28  ;;  %v2164_v23 = vadd.f32 %v2126_v57, %v1888_v16  ;;  %v1587_v35 = vrot.slane %v1553_v43, 2  ;;  %v1588_v39 = vrot.slane %v1554_v30, 2 }
 0x212   : > { %v1193_v53 = vadd.f32 %v1177_v32, %v1085_v61  ;;  %v1194_v14 = vadd.f32 %v1178_v29, %v1086_v41  ;;  %v1331_v58 = vrot.slane %v1315_v49, 1  ;;  %v1855_v33 = vmul.f32 %v7695_v10, %v7613_v25 }
 0x213   : > { %v2317_v62 = vrot.slane %v2163_v47, 7  ;;  %v2318_v38 = vrot.slane %v2164_v23, 7  ;;  %v1717_v42 = vmul.f32 %v7699_v1, %v7606_v5  ;;  %v2093_v60 = vmul.f32 %v7695_v10, %v7616_v8 }
 0x214   : > { %v1349_v22 = vadd.f32 %v1331_v58, %v1193_v53  ;;  %v1350_v19 = vadd.f32 %v1331_v58, %v1194_v14  ;;  %v1718_v11 = vmul.f32 %v7695_v10, %v7606_v5  ;;  %v2094_v7 = vmul.f32 %v6260_v13, %v7616_v8 }
 0x215   : > { %v2319_v44 = vsel %vm2193_vm2, %v2317_v62, %v2318_v38  ;;  %v1589_v21 = vsel %vm856_vm1, %v1587_v35, %v1588_v39  ;;  %v1871_v36 = vrot.slane %v1855_v33, 1  ;;  %v2127_v0 = vrot.slane %v2093_v60, 2 }
 0x216   : > { %v2351_v32 = vadd.f32 %v7649_v12, %v2319_v44  ;;  %v1625_v2 = vadd.f32 %v1587_v35, %v1349_v22  ;;  %v1626_v56 = vadd.f32 %v1589_v21, %v1350_v19  ;;  %v638_v51 = vmul.f32 %v7661_v4, %v8843_v34  ;;  %v7737_v44 = vld [vmem:[#allocation2 + $0x80] sm:$0xff] }
 0x217   : > { %v2128_v3 = vrot.slane %v2094_v7, 2  ;;  %v775_v37 = vmul.f32 %v7654_v17, %v8841_v50  ;;  %v1015_v46 = vmul.f32 %v7654_v17, %v8842_v24  ;;  %v1016_v49 = vmul.f32 %v7667_v52, %v8842_v24 }
 0x218   : > { %5461 = vmatmul.mubr.msk.f32.vlgmr.msra.gmra.mrb[8].mxu0 %vm343_vm0, %v2351_v32  ;;  %v1733_v43 = vadd.f32 %v1717_v42, %v1625_v2  ;;  %v1734_v28 = vadd.f32 %v1718_v11, %v1626_v56  ;;  %v639_v16 = vmul.f32 %v7654_v17, %v8843_v34  ;;  %v1179_v4 = vmul.f32 %v7699_v1, %v7590_v20  ;;  %v7733_v11 = vld [vmem:[#allocation2 + $0x78] sm:$0xff]  ;;  %v7743_v2 = vld [vmem:[#allocation2 + $0x88] sm:$0xff] }
 0x219   : > { %v791_v27 = vrot.slane %v775_v37, 1  ;;  %v1050_v30 = vrot.slane %v1015_v46, 2  ;;  %v1051_v57 = vrot.slane %v1016_v49, 2  ;;  %v1316_v61 = vmul.f32 %v7695_v10, %v7595_v15 }
 0x21a   : > { %v1889_v41 = vadd.f32 %v1871_v36, %v1733_v43  ;;  %v1890_v29 = vadd.f32 %v1871_v36, %v1734_v28  ;;  %v1555_v52 = vmul.f32 %v7695_v10, %v7598_v31  ;;  %v1556_v47 = vmul.f32 %v6260_v13, %v7598_v31 }
 0x21b   : > { %v2129_v23 = vsel %vm856_vm1, %v2127_v0, %v2128_v3  ;;  %v810_v35 = vadd.f32 %v791_v27, %v638_v51  ;;  %v811_v17 = vadd.f32 %v791_v27, %v639_v16  ;;  %v1052_v39 = vsel %vm856_vm1, %v1050_v30, %v1051_v57 }
 0x21c   : > { %v2165_v53 = vadd.f32 %v2127_v0, %v1889_v41  ;;  %v2166_v14 = vadd.f32 %v2129_v23, %v1890_v29  ;;  %v1590_v58 = vrot.slane %v1555_v52, 2  ;;  %v1591_v33 = vrot.slane %v1556_v47, 2 }
 0x21d   : > { %v1087_v62 = vadd.f32 %v1050_v30, %v810_v35  ;;  %v1088_v38 = vadd.f32 %v1052_v39, %v811_v17  ;;  %v1180_v42 = vmul.f32 %v7695_v10, %v7590_v20  ;;  %v1332_v60 = vrot.slane %v1316_v61, 1 }
 0x21e   : > { %v2320_v22 = vrot.slane %v2165_v53, 7  ;;  %v2321_v19 = vrot.slane %v2166_v14, 7  ;;  %v1719_v7 = vmul.f32 %v7733_v11, %v7606_v5  ;;  %v1856_v21 = vmul.f32 %v7737_v44, %v7613_v25 }
 0x21f   : > { %v1195_v36 = vadd.f32 %v1179_v4, %v1087_v62  ;;  %v1196_v0 = vadd.f32 %v1180_v42, %v1088_v38  ;;  %v2095_v32 = vmul.f32 %v7737_v44, %v7616_v8  ;;  %v2096_v56 = vmul.f32 %v7743_v2, %v7616_v8 }
 0x220   : > { %v2322_v51 = vsel %vm2193_vm2, %v2320_v22, %v2321_v19  ;;  %v1592_v3 = vsel %vm856_vm1, %v1590_v58, %v1591_v33  ;;  %v1720_v37 = vmul.f32 %v7737_v44, %v7606_v5  ;;  %v1872_v46 = vrot.slane %v1856_v21, 1 }
 0x221   : > { %v2352_v49 = vadd.f32 %v7649_v12, %v2322_v51  ;;  %v1351_v43 = vadd.f32 %v1332_v60, %v1195_v36  ;;  %v1352_v28 = vadd.f32 %v1332_v60, %v1196_v0  ;;  %v640_v16 = vmul.f32 %v7699_v1, %v8843_v34 }
 0x222   : > { %v641_v4 = vmul.f32 %v7695_v10, %v8843_v34  ;;  %v776_v27 = vmul.f32 %v7695_v10, %v8841_v50  ;;  %v1017_v30 = vmul.f32 %v7695_v10, %v8842_v24  ;;  %v1018_v57 = vmul.f32 %v6260_v13, %v8842_v24 }
 0x223   : > { %5463 = vmatprep.mubr.msk.f32.mxu0 %vm343_vm0, %v2352_v49  ;;  %v1627_v61 = vadd.f32 %v1590_v58, %v1351_v43  ;;  %v1628_v41 = vadd.f32 %v1592_v3, %v1352_v28  ;;  %v2130_v29 = vrot.slane %v2095_v32, 2  ;;  %v2131_v52 = vrot.slane %v2096_v56, 2  ;;  %v7774_v56 = vld [vmem:[#allocation2 + $0x98] sm:$0xff] }
 0x224   : > { %v792_v47 = vrot.slane %v776_v27, 1  ;;  %v1053_v23 = vrot.slane %v1017_v30, 2  ;;  %v1054_v1 = vrot.slane %v1018_v57, 2  ;;  %v1181_v35 = vmul.f32 %v7733_v11, %v7590_v20  ;;  %v7786_v27 = vld [vmem:[#allocation2 + $0xa0] sm:$0xff] }
 0x225   : > { %v1735_v17 = vadd.f32 %v1719_v7, %v1627_v61  ;;  %v1736_v39 = vadd.f32 %v1720_v37, %v1628_v41  ;;  %v1317_v53 = vmul.f32 %v7737_v44, %v7595_v15  ;;  %v1557_v10 = vmul.f32 %v7737_v44, %v7598_v31 }
 0x226   : > { %v812_v13 = vadd.f32 %v792_v47, %v640_v16  ;;  %v813_v14 = vadd.f32 %v792_v47, %v641_v4  ;;  %v1055_v58 = vsel %vm856_vm1, %v1053_v23, %v1054_v1  ;;  %v1558_v33 = vmul.f32 %v7743_v2, %v7598_v31 }
 0x227   : > { %v1891_v62 = vadd.f32 %v1872_v46, %v1735_v17  ;;  %v1892_v38 = vadd.f32 %v1872_v46, %v1736_v39  ;;  %v2132_v42 = vsel %vm856_vm1, %v2130_v29, %v2131_v52  ;;  %v1182_v60 = vmul.f32 %v7737_v44, %v7590_v20  ;;  %v7778_v46 = vld [vmem:[#allocation2 + $0x90] sm:$0xff] }
 0x228   : > { %v1089_v22 = vadd.f32 %v1053_v23, %v812_v13  ;;  %v1090_v19 = vadd.f32 %v1055_v58, %v813_v14  ;;  %v1593_v7 = vrot.slane %v1557_v10, 2  ;;  %v1594_v21 = vrot.slane %v1558_v33, 2 }
 0x229   : > { %v2167_v36 = vadd.f32 %v2130_v29, %v1891_v62  ;;  %v2168_v0 = vadd.f32 %v2132_v42, %v1892_v38  ;;  %v1333_v32 = vrot.slane %v1317_v53, 1  ;;  %v1857_v51 = vmul.f32 %v7774_v56, %v7613_v25 }
 0x22a   : > { %v1197_v3 = vadd.f32 %v1181_v35, %v1089_v22  ;;  %v1198_v37 = vadd.f32 %v1182_v60, %v1090_v19  ;;  %v1721_v49 = vmul.f32 %v7778_v46, %v7606_v5  ;;  %v2097_v43 = vmul.f32 %v7774_v56, %v7616_v8 }
 0x22b   : > { %v2323_v28 = vrot.slane %v2167_v36, 7  ;;  %v2324_v16 = vrot.slane %v2168_v0, 7  ;;  %v1722_v4 = vmul.f32 %v7774_v56, %v7606_v5  ;;  %v2098_v30 = vmul.f32 %v7786_v27, %v7616_v8 }
 0x22c   : > { %v1353_v57 = vadd.f32 %v1333_v32, %v1197_v3  ;;  %v1354_v61 = vadd.f32 %v1333_v32, %v1198_v37  ;;  %v1595_v41 = vsel %vm856_vm1, %v1593_v7, %v1594_v21  ;;  %v1873_v29 = vrot.slane %v1857_v51, 1 }
 0x22d   : > { %v2325_v52 = vsel %vm2193_vm2, %v2323_v28, %v2324_v16  ;;  %v2133_v47 = vrot.slane %v2097_v43, 2  ;;  %v642_v23 = vmul.f32 %v7733_v11, %v8843_v34  ;;  %v777_v1 = vmul.f32 %v7737_v44, %v8841_v50 }
 0x22e   : > { %v2353_v35 = vadd.f32 %v7649_v12, %v2325_v52  ;;  %v1629_v17 = vadd.f32 %v1593_v7, %v1353_v57  ;;  %v1630_v39 = vadd.f32 %v1595_v41, %v1354_v61  ;;  %v1019_v53 = vmul.f32 %v7737_v44, %v8842_v24 }
 0x22f   : > { %v2134_v10 = vrot.slane %v2098_v30, 2  ;;  %v643_v13 = vmul.f32 %v7737_v44, %v8843_v34  ;;  %v793_v14 = vrot.slane %v777_v1, 1  ;;  %v1020_v58 = vmul.f32 %v7743_v2, %v8842_v24  ;;  %v7816_v30 = vld [vmem:[#allocation2 + $0xb0] sm:$0xff] }
 0x230   : > { %5464 = vmatmul.mubr.msk.f32.gmra.mrb[10].mxu0 %vm343_vm0, %v2353_v35  ;;  %v1737_v11 = vadd.f32 %v1721_v49, %v1629_v17  ;;  %v1738_v33 = vadd.f32 %v1722_v4, %v1630_v39  ;;  %v1056_v62 = vrot.slane %v1019_v53, 2  ;;  %v1183_v38 = vmul.f32 %v7778_v46, %v7590_v20 }
 0x231   : > { %v814_v42 = vadd.f32 %v793_v14, %v642_v23  ;;  %v815_v60 = vadd.f32 %v793_v14, %v643_v13  ;;  %v1057_v22 = vrot.slane %v1020_v58, 2  ;;  %v1318_v19 = vmul.f32 %v7774_v56, %v7595_v15 }
 0x232   : > { %v1893_v7 = vadd.f32 %v1873_v29, %v1737_v11  ;;  %v1894_v44 = vadd.f32 %v1873_v29, %v1738_v33  ;;  %v1559_v21 = vmul.f32 %v7774_v56, %v7598_v31  ;;  %v1560_v2 = vmul.f32 %v7786_v27, %v7598_v31 }
 0x233   : > { %v2135_v36 = vsel %vm856_vm1, %v2133_v47, %v2134_v10  ;;  %v1058_v0 = vsel %vm856_vm1, %v1056_v62, %v1057_v22  ;;  %v1091_v32 = vadd.f32 %v1056_v62, %v814_v42  ;;  %v1184_v51 = vmul.f32 %v7774_v56, %v7590_v20 }
 0x234   : > { %v2169_v3 = vadd.f32 %v2133_v47, %v1893_v7  ;;  %v2170_v37 = vadd.f32 %v2135_v36, %v1894_v44  ;;  %v1092_v49 = vadd.f32 %v1058_v0, %v815_v60  ;;  %v1596_v43 = vrot.slane %v1559_v21, 2 }
 0x235   : > { %v1199_v28 = vadd.f32 %v1183_v38, %v1091_v32  ;;  %v1334_v16 = vrot.slane %v1318_v19, 1  ;;  %v1597_v4 = vrot.slane %v1560_v2, 2  ;;  %v1858_v57 = vmul.f32 %v7816_v30, %v7613_v25 }
 0x236   : > { %v2326_v61 = vrot.slane %v2169_v3, 7  ;;  %v2327_v41 = vrot.slane %v2170_v37, 7  ;;  %v1200_v29 = vadd.f32 %v1184_v51, %v1092_v49  ;;  %v2099_v52 = vmul.f32 %v7816_v30, %v7616_v8 }
 0x237   : > { %v1355_v23 = vadd.f32 %v1334_v16, %v1199_v28  ;;  %v1723_v47 = vmul.f32 %v7525_v26, %v7606_v5  ;;  %v1724_v1 = vmul.f32 %v7816_v30, %v7606_v5  ;;  %v2100_v35 = vmul.f32 %v7536_v54, %v7616_v8 }
 0x238   : > { %v2328_v17 = vsel %vm2193_vm2, %v2326_v61, %v2327_v41  ;;  %v1356_v39 = vadd.f32 %v1334_v16, %v1200_v29  ;;  %v1598_v53 = vsel %vm856_vm1, %v1596_v43, %v1597_v4  ;;  %v1874_v10 = vrot.slane %v1858_v57, 1 }
 0x239   : > { %v2354_v13 = vadd.f32 %v7649_v12, %v2328_v17  ;;  %v1631_v14 = vadd.f32 %v1596_v43, %v1355_v23  ;;  %v2136_v58 = vrot.slane %v2099_v52, 2  ;;  %v644_v11 = vmul.f32 %v7778_v46, %v8843_v34 }
 0x23a   : > { %v1632_v33 = vadd.f32 %v1598_v53, %v1356_v39  ;;  %v778_v62 = vmul.f32 %v7774_v56, %v8841_v50  ;;  %v1021_v38 = vmul.f32 %v7774_v56, %v8842_v24  ;;  %v1022_v42 = vmul.f32 %v7786_v27, %v8842_v24 }
 0x23b   : > { %5466 = vmatprep.mubr.msk.f32.mxu0 %vm343_vm0, %v2354_v13  ;;  %v1739_v60 = vadd.f32 %v1723_v47, %v1631_v14  ;;  %v2137_v22 = vrot.slane %v2100_v35, 2  ;;  %v645_v19 = vmul.f32 %v7774_v56, %v8843_v34  ;;  %v1185_v46 = vmul.f32 %v7525_v26, %v7590_v20 }
 0x23c   : > { %v1740_v7 = vadd.f32 %v1724_v1, %v1632_v33  ;;  %v794_v44 = vrot.slane %v778_v62, 1  ;;  %v1059_v21 = vrot.slane %v1021_v38, 2  ;;  %v1060_v2 = vrot.slane %v1022_v42, 2 }
 0x23d   : > { %v1895_v36 = vadd.f32 %v1874_v10, %v1739_v60  ;;  %v1319_v0 = vmul.f32 %v7816_v30, %v7595_v15  ;;  %v1561_v27 = vmul.f32 %v7816_v30, %v7598_v31  ;;  %v1562_v32 = vmul.f32 %v7536_v54, %v7598_v31 }
 0x23e   : > { %v1896_v51 = vadd.f32 %v1874_v10, %v1740_v7  ;;  %v816_v3 = vadd.f32 %v794_v44, %v644_v11  ;;  %v817_v56 = vadd.f32 %v794_v44, %v645_v19  ;;  %v1061_v37 = vsel %vm856_vm1, %v1059_v21, %v1060_v2 }
 0x23f   : > { %v2138_v49 = vsel %vm856_vm1, %v2136_v58, %v2137_v22  ;;  %v2171_v43 = vadd.f32 %v2136_v58, %v1895_v36  ;;  %v1599_v28 = vrot.slane %v1561_v27, 2  ;;  %v1600_v16 = vrot.slane %v1562_v32, 2 }
 0x240   : > { %v2172_v4 = vadd.f32 %v2138_v49, %v1896_v51  ;;  %v1093_v57 = vadd.f32 %v1059_v21, %v816_v3  ;;  %v1094_v61 = vadd.f32 %v1061_v37, %v817_v56  ;;  %v1186_v41 = vmul.f32 %v7816_v30, %v7590_v20 }
 0x241   : > { %v2329_v29 = vrot.slane %v2171_v43, 7  ;;  %v1335_v52 = vrot.slane %v1319_v0, 1  ;;  %v1725_v23 = vmul.f32 %v7459_v18, %v7606_v5  ;;  %v1859_v47 = vmul.f32 %v7613_v25, %v7420_v40  ;;  %v6268_v0 = vld [vmem:[#allocation2 + $0xc8] sm:$0xff] }
 0x242   : > { %v2330_v1 = vrot.slane %v2172_v4, 7  ;;  %v1201_v35 = vadd.f32 %v1185_v46, %v1093_v57  ;;  %v1202_v17 = vadd.f32 %v1186_v41, %v1094_v61  ;;  %v2101_v39 = vmul.f32 %v7616_v8, %v7420_v40 }
 0x243   : > { %v1601_v53 = vsel %vm856_vm1, %v1599_v28, %v1600_v16  ;;  %v1726_v10 = vmul.f32 %v7606_v5, %v7420_v40  ;;  %v1875_v13 = vrot.slane %v1859_v47, 1  ;;  %v2102_v14 = vmul.f32 %v7508_v45, %v7616_v8 }
 0x244   : > { %v2331_v58 = vsel %vm2193_vm2, %v2329_v29, %v2330_v1  ;;  %v1357_v11 = vadd.f32 %v1335_v52, %v1201_v35  ;;  %v1358_v33 = vadd.f32 %v1335_v52, %v1202_v17  ;;  %v646_v62 = vmul.f32 %v7525_v26, %v8843_v34 }
 0x245   : > { %v2355_v38 = vadd.f32 %v7649_v12, %v2331_v58  ;;  %v647_v42 = vmul.f32 %v7816_v30, %v8843_v34  ;;  %v779_v60 = vmul.f32 %v7816_v30, %v8841_v50  ;;  %v1023_v40 = vmul.f32 %v7816_v30, %v8842_v24 }
 0x246   : > { %v1633_v22 = vadd.f32 %v1599_v28, %v1357_v11  ;;  %v1634_v19 = vadd.f32 %v1601_v53, %v1358_v33  ;;  %v2139_v46 = vrot.slane %v2101_v39, 2  ;;  %v1024_v7 = vmul.f32 %v7536_v54, %v8842_v24 }
 0x247   : > { %5467 = vmatmul.mubr.msk.f32.gmra.mrb[12].mxu0 %vm343_vm0, %v2355_v38  ;;  %v2140_v26 = vrot.slane %v2102_v14, 2  ;;  %v795_v44 = vrot.slane %v779_v60, 1  ;;  %v1062_v21 = vrot.slane %v1023_v40, 2  ;;  %v1187_v34 = vmul.f32 %v7459_v18, %v7590_v20 }
 0x248   : > { %v1741_v2 = vadd.f32 %v1725_v23, %v1633_v22  ;;  %v1742_v36 = vadd.f32 %v1726_v10, %v1634_v19  ;;  %v1063_v50 = vrot.slane %v1024_v7, 2  ;;  %v1320_v30 = vmul.f32 %v6268_v0, %v7595_v15 }
 0x249   : > { %v818_v27 = vadd.f32 %v795_v44, %v646_v62  ;;  %v819_v32 = vadd.f32 %v795_v44, %v647_v42  ;;  %v1563_v51 = vmul.f32 %v6268_v0, %v7598_v31  ;;  %v1564_v54 = vmul.f32 %v7508_v45, %v7598_v31 }
 0x24a   : > { %v1897_v24 = vadd.f32 %v1875_v13, %v1741_v2  ;;  %v1898_v3 = vadd.f32 %v1875_v13, %v1742_v36  ;;  %v1064_v56 = vsel %vm856_vm1, %v1062_v21, %v1063_v50  ;;  %v2141_v37 = vsel %vm856_vm1, %v2139_v46, %v2140_v26 }
 0x24b   : > { %v1095_v18 = vadd.f32 %v1062_v21, %v818_v27  ;;  %v1096_v49 = vadd.f32 %v1064_v56, %v819_v32  ;;  %v1188_v43 = vmul.f32 %v6268_v0, %v7590_v20  ;;  %v1602_v15 = vrot.slane %v1563_v51, 2 }
 0x24c   : > { %v2173_v28 = vadd.f32 %v2139_v46, %v1897_v24  ;;  %v2174_v16 = vadd.f32 %v2141_v37, %v1898_v3  ;;  %v1603_v4 = vrot.slane %v1564_v54, 2  ;;  %v1336_v41 = vrot.slane %v1320_v30, 1 }
 0x24d   : > { %v1203_v57 = vadd.f32 %v1187_v34, %v1095_v18  ;;  %v1204_v61 = vadd.f32 %v1188_v43, %v1096_v49  ;;  %v1860_v45 = vmul.f32 %v7613_v25, %v7503_v9  ;;  %v2103_v52 = vmul.f32 %v7616_v8, %v7503_v9 }
 0x24e   : > { %v2332_v31 = vrot.slane %v2173_v28, 7  ;;  %v2333_v29 = vrot.slane %v2174_v16, 7  ;;  %v2104_v23 = vmul.f32 %v7616_v8, %v7512_v63  ;;  %v1727_v1 = vmul.f32 %v7606_v5, %v7497_v6  ;;  %v7903_v63 = vld [vmem:[%s8591_s6] sm:$0x7]  ;;  %v5422_v62 = vpop.f32.mrb[0].mxu0 }
 0x24f   : > { %v1359_v47 = vadd.f32 %v1336_v41, %v1203_v57  ;;  %v1360_v20 = vadd.f32 %v1336_v41, %v1204_v61  ;;  %v1728_v35 = vmul.f32 %v7606_v5, %v7503_v9  ;;  %v1604_v25 = vsel %vm856_vm1, %v1602_v15, %v1603_v4  ;;  %v2457_v60 = vpop.f32.mrb[1].mxu0 }
 0x250   : > { %v2334_v17 = vsel %vm2193_vm2, %v2332_v31, %v2333_v29  ;;  %v2142_v39 = vrot.slane %v2103_v52, 2  ;;  %v2143_v53 = vrot.slane %v2104_v23, 2  ;;  %v1876_v58 = vrot.slane %v1860_v45, 1 }
 0x251   : > { %v2356_v10 = vadd.f32 %v7649_v12, %v2334_v17  ;;  %v1635_v13 = vadd.f32 %v1602_v15, %v1359_v47  ;;  %v1636_v14 = vadd.f32 %v1604_v25, %v1360_v20  ;;  %v7909_v8 = vrot.slane %v7903_v63, %v8837_v48 }
 0x252   : > { %v2144_v5 = vsel %vm856_vm1, %v2142_v39, %v2143_v53  ;;  %v2504_v7 = vrot.slane %v7903_v63, %v8839_v59  ;;  %v2642_v47 = vrot.slane %v7903_v63, %v8840_v55 }
 0x253   : > { %5469 = vmatprep.mubr.msk.f32.mxu0 %vm343_vm0, %v2356_v10  ;;  %v1743_v6 = vadd.f32 %v1727_v1, %v1635_v13  ;;  %v1744_v9 = vadd.f32 %v1728_v35, %v1636_v14  ;;  %v7912_v40 = vadd.f32 %v2457_v60, %v7909_v8  ;;  %v7956_v31 = vadd.f32 %v5422_v62, %v7909_v8 }
 0x255   : > { %v1899_v11 = vadd.f32 %v1876_v58, %v1743_v6  ;;  %v1900_v33 = vadd.f32 %v1876_v58, %v1744_v9  ;;  %5488 = vmatprep.mubr.msk.f32.mxu1 %vm2776_vm3, %v7912_v40 }
 0x257   : > { %v2175_v38 = vadd.f32 %v2142_v39, %v1899_v11  ;;  %v2176_v42 = vadd.f32 %v2144_v5, %v1900_v33 }
 0x258   : > { %v5442_v26 = vpop.f32.mrb[0].mxu1 }
 0x259   : > { %v2335_v22 = vrot.slane %v2175_v38, 7  ;;  %v2336_v19 = vrot.slane %v2176_v42, 7  ;;  %v7921_v44 = vadd.f32 %v5442_v26, %v2504_v7  ;;  %v2595_v21 = vpop.f32.mrb[1].mxu1 }
 0x25a   : > { %v7923_v34 = vadd.f32 %v2595_v21, %v2504_v7 }
 0x25b   : > { %v2337_v46 = vsel %vm2193_vm2, %v2335_v22, %v2336_v19 }
 0x25c   : > { %v2357_v48 = vadd.f32 %v7649_v12, %v2337_v46  ;;  %v5776_v12 = vpack.c.bf16 %v7921_v44, %v7923_v34 }
 0x25e   : > { %5470 = vmatmul.mubr.msk.f32.gmra.mrb[14].mxu0 %vm343_vm0, %v2357_v48  ;;  %5778 = vmatprep.subr.msk.bf16.mxu1 %vm7927_vm4, %v5776_v12 }
 0x25f   : > { %5781 = vmatpush3.bf16.xpose.msk.msra.mxu1 %vm7927_vm4, %v5776_v12 }
 0x276   : > { %v5425_v59 = vpop.f32.mrb[2].mxu0 }
 0x277   : > { %v2467_v36 = vpop.f32.mrb[3].mxu0  ;;  %v7966_v52 = vadd.f32 %v5425_v59, %v7909_v8 }
 0x278   : > { %v7959_v29 = vadd.f32 %v2467_v36, %v7909_v8 }
 0x281   : > { %v5445_v50 = vpop.f32.mrb[2].mxu1 }
 0x282   : > { %v2611_v0 = vadd.f32 %v5445_v50, %v2504_v7  ;;  %v2605_v30 = vpop.f32.mrb[3].mxu1 }
 0x283   : > { %v2606_v27 = vadd.f32 %v2605_v30, %v2504_v7 }
 0x285   : > { %v5782_v32 = vpack.c.bf16 %v2611_v0, %v2606_v27  ;;  %v7941_v18 = vpack.i.bf16 %v2611_v0, %v2606_v27 }
 0x287   : > { %5784 = vmatprep.subr.msk.bf16.mxu1 %vm7927_vm4, %v5782_v32 }
 0x288   : > { %5787 = vmatpush3.bf16.xpose.msk.msra.mxu1 %vm7927_vm4, %v5782_v32 }
 0x29f   : > { %v5428_v51 = vpop.f32.mrb[4].mxu0 }
 0x2a0   : > { %v2477_v54 = vpop.f32.mrb[5].mxu0  ;;  %v7978_v20 = vadd.f32 %v5428_v51, %v7909_v8 }
 0x2a1   : > { %v7969_v23 = vadd.f32 %v2477_v54, %v7909_v8 }
 0x2aa   : > { %v5448_v24 = vpop.f32.mrb[4].mxu1 }
 0x2ab   : > { %v2621_v3 = vadd.f32 %v5448_v24, %v2504_v7  ;;  %v2615_v56 = vpop.f32.mrb[5].mxu1 }
 0x2ac   : > { %v2616_v37 = vadd.f32 %v2615_v56, %v2504_v7 }
 0x2ae   : > { %v5788_v49 = vpack.c.bf16 %v2621_v3, %v2616_v37  ;;  %v7947_v43 = vpack.i.bf16 %v2621_v3, %v2616_v37 }
 0x2b0   : > { %5790 = vmatprep.subr.msk.bf16.mxu1 %vm7927_vm4, %v5788_v49 }
 0x2b1   : > { %5793 = vmatpush3.bf16.xpose.msk.msra.mxu1 %vm7927_vm4, %v5788_v49 }
 0x2c7   : > { %v5431_v28 = vpop.f32.mrb[6].mxu0 }
 0x2c8   : > { %v2487_v16 = vpop.f32.mrb[7].mxu0  ;;  %v7988_v55 = vadd.f32 %v5431_v28, %v7909_v8 }
 0x2c9   : > { %v7981_v1 = vadd.f32 %v2487_v16, %v7909_v8 }
 0x2d5   : > { %v5451_v15 = vpop.f32.mrb[6].mxu1 }
 0x2d6   : > { %v2631_v4 = vadd.f32 %v5451_v15, %v2504_v7  ;;  %v2625_v57 = vpop.f32.mrb[7].mxu1 }
 0x2d7   : > { %v2626_v61 = vadd.f32 %v2625_v57, %v2504_v7 }
 0x2d9   : > { %v5794_v41 = vpack.c.bf16 %v2631_v4, %v2626_v61  ;;  %v7949_v45 = vpack.i.bf16 %v2631_v4, %v2626_v61 }
 0x2db   : > { %5796 = vmatprep.subr.msk.bf16.mxu1 %vm7927_vm4, %v5794_v41 }
 0x2dc   : > { %5799 = vmatpush3.bf16.xpose.msk.msra.mxu1 %vm7927_vm4, %v5794_v41 }
 0x2e3   : > { %5489 = vmatmul.mubr.msk.f32.vlgmr.msra.gmra.mrb[8].mxu1 %vm2776_vm3, %v7956_v31 }
 0x2e4   : > { %5491 = vmatprep.mubr.msk.f32.mxu1 %vm2776_vm3, %v7959_v29 }
 0x2e7   : > { %5492 = vmatmul.mubr.msk.f32.gmra.mrb[10].mxu1 %vm2776_vm3, %v7966_v52 }
 0x2e8   : > { %5494 = vmatprep.mubr.msk.f32.mxu1 %vm2776_vm3, %v7969_v23 }
 0x2eb   : > { %v5462_v35 = vpop.f32.mrb[8].mxu0  ;;  %5495 = vmatmul.mubr.msk.f32.gmra.mrb[12].mxu1 %vm2776_vm3, %v7978_v20 }
 0x2ec   : > { %v2739_v17 = vadd.f32 %v5462_v35, %v2642_v47  ;;  %v2733_v25 = vpop.f32.mrb[9].mxu0  ;;  %5497 = vmatprep.mubr.msk.f32.mxu1 %vm2776_vm3, %v7981_v1 }
 0x2ed   : > { %v2734_v39 = vadd.f32 %v2733_v25, %v2642_v47 }
 0x2ef   : > { %v5800_v53 = vpack.c.bf16 %v2739_v17, %v2734_v39  ;;  %5498 = vmatmul.mubr.msk.f32.gmra.mrb[14].mxu1 %vm2776_vm3, %v7988_v55  ;;  %v7992_v10 = vpack.i.bf16 %v2739_v17, %v2734_v39 }
 0x2f1   : > { %5801 = vmatprep.subr.bf16.mxu0 %v5800_v53 }
 0x2f2   : > { %5803 = vmatpush3.bf16.msra.mxu0 %v5800_v53 }
 0x303   : > { %v5465_v13 = vpop.f32.mrb[10].mxu0 }
 0x304   : > { %v2749_v14 = vadd.f32 %v5465_v13, %v2642_v47  ;;  %v2743_v58 = vpop.f32.mrb[11].mxu0 }
 0x305   : > { %v2744_v63 = vadd.f32 %v2743_v58, %v2642_v47 }
 0x307   : > { %v5804_v6 = vpack.c.bf16 %v2749_v14, %v2744_v63  ;;  %v7994_v9 = vpack.i.bf16 %v2749_v14, %v2744_v63  ;;  %v8026_v63 = vpack.i.bf16 %v7921_v44, %v7923_v34 }
 0x309   : > { %5805 = vmatprep.subr.bf16.mxu0 %v5804_v6 }
 0x30a   : > { %5807 = vmatpush3.bf16.msra.mxu0 %v5804_v6 }
 0x31a   : > { %v5468_v5 = vpop.f32.mrb[12].mxu0 }
 0x31b   : > { %v2759_v8 = vadd.f32 %v5468_v5, %v2642_v47  ;;  %v2753_v11 = vpop.f32.mrb[13].mxu0 }
 0x31c   : > { %v2754_v33 = vadd.f32 %v2753_v11, %v2642_v47 }
 0x31e   : > { %v5808_v62 = vpack.c.bf16 %v2759_v8, %v2754_v33  ;;  %v7996_v38 = vpack.i.bf16 %v2759_v8, %v2754_v33 }
 0x320   : > { %5809 = vmatprep.subr.bf16.mxu0 %v5808_v62 }
 0x321   : > { %5811 = vmatpush3.bf16.msra.mxu0 %v5808_v62 }
 0x331   : > { %v5471_v42 = vpop.f32.mrb[14].mxu0 }
 0x332   : > { %v2769_v60 = vadd.f32 %v5471_v42, %v2642_v47  ;;  %v2763_v22 = vpop.f32.mrb[15].mxu0 }
 0x333   : > { %v2764_v19 = vadd.f32 %v2763_v22, %v2642_v47 }
 0x335   : > { %v5812_v46 = vpack.c.bf16 %v2769_v60, %v2764_v19  ;;  %v7998_v48 = vpack.i.bf16 %v2769_v60, %v2764_v19 }
 0x337   : > { %5813 = vmatprep.subr.bf16.mxu0 %v5812_v46 }
 0x338   : > { %5815 = vmatpush3.bf16.msra.mxu0 %v5812_v46 }
 0x3b6   : > { %v5490_v7 = vpop.f32.mrb[8].mxu1 }
 0x3b7   : > { %v2931_v26 = vmul.f32 0.35355338, %v5490_v7  ;;  %v2891_v21 = vpop.f32.mrb[9].mxu1 }
 0x3b8   : > { %v2930_v12 = vmul.f32 0.35355338, %v2891_v21 }
 0x3b9   : > { %v2942_v59 = vsel %vm2938_vm5, %v2931_v26, -inf }
 0x3ba   : > { %2943 = vmax.xlane.f32.xlu1 %v2942_v59  ;;  %v5493_v36 = vpop.f32.mrb[10].mxu1  ;;  %v2939_v50 = vsel %vm2938_vm5, %v2930_v12, -inf }
 0x3bb   : > { %v2933_v0 = vmul.f32 0.35355338, %v5493_v36  ;;  %2940 = vmax.xlane.f32.xlu0 %v2939_v50  ;;  %v2901_v30 = vpop.f32.mrb[11].mxu1 }
 0x3bc   : > { %v2932_v27 = vmul.f32 0.35355338, %v2901_v30 }
 0x3bd   : > { %v2948_v32 = vsel %vm2938_vm5, %v2933_v0, -inf }
 0x3be   : > { %2949 = vmax.xlane.f32.xlu1 %v2948_v32  ;;  %v5496_v51 = vpop.f32.mrb[12].mxu1  ;;  %v2945_v54 = vsel %vm2938_vm5, %v2932_v27, -inf }
 0x3bf   : > { %v2935_v24 = vmul.f32 0.35355338, %v5496_v51  ;;  %2946 = vmax.xlane.f32.xlu0 %v2945_v54  ;;  %v2911_v3 = vpop.f32.mrb[13].mxu1 }
 0x3c0   : > { %v2934_v56 = vmul.f32 0.35355338, %v2911_v3 }
 0x3c1   : > { %v2954_v37 = vsel %vm2938_vm5, %v2935_v24, -inf }
 0x3c2   : > { %2955 = vmax.xlane.f32.xlu1 %v2954_v37  ;;  %v5499_v49 = vpop.f32.mrb[14].mxu1  ;;  %v2951_v28 = vsel %vm2938_vm5, %v2934_v56, -inf }
 0x3c3   : > { %v8006_v16 = vmul.f32 0.35355338, %v5499_v49  ;;  %2952 = vmax.xlane.f32.xlu0 %v2951_v28  ;;  %v2921_v15 = vpop.f32.mrb[15].mxu1 }
 0x3c4   : > { %v8008_v4 = vmul.f32 0.35355338, %v2921_v15 }
 0x3c5   : > { %v2960_v57 = vsel %vm2938_vm5, %v8006_v16, -inf }
 0x3c6   : > { %2961 = vmax.xlane.f32.xlu1 %v2960_v57  ;;  %v2957_v61 = vsel %vm2938_vm5, %v8008_v4, -inf }
 0x3c7   : > { %2958 = vmax.xlane.f32.xlu0 %v2957_v61 }
 0x447   : > { %v2944_v41 = vpop.xlane.xlu1 %2943 }
 0x448   : > { %v2964_v47 = vsub.f32 %v2931_v26, %v2944_v41  ;;  %v2941_v35 = vpop.xlane.xlu0 %2940 }
 0x449   : > { %v2963_v17 = vsub.f32 %v2930_v12, %v2941_v35 }
 0x44a   : > { %v2973_v25 = vmul.f32 1.442695, %v2964_v47 }
 0x44b   : > { %v2971_v39 = vmul.f32 1.442695, %v2963_v17  ;;  %v2950_v6 = vpop.xlane.xlu1 %2949 }
 0x44c   : > { %6116 = vpow2.f32 %v2973_v25  ;;  %v2947_v5 = vpop.xlane.xlu0 %2946  ;;  %v2966_v8 = vsub.f32 %v2933_v0, %v2950_v6 }
 0x44d   : > { %6118 = vpow2.f32 %v2971_v39  ;;  %v2965_v11 = vsub.f32 %v2932_v27, %v2947_v5 }
 0x44e   : > { %v2977_v42 = vmul.f32 1.442695, %v2966_v8 }
 0x44f   : > { %v2956_v33 = vpop.xlane.xlu1 %2955  ;;  %v2975_v22 = vmul.f32 1.442695, %v2965_v11 }
 0x450   : > { %v2953_v62 = vpop.xlane.xlu0 %2952  ;;  %v2968_v60 = vsub.f32 %v2935_v24, %v2956_v33  ;;  %6120 = vpow2.f32 %v2977_v42 }
 0x451   : > { %v2967_v19 = vsub.f32 %v2934_v56, %v2953_v62  ;;  %6122 = vpow2.f32 %v2975_v22 }
 0x452   : > { %v2981_v46 = vmul.f32 1.442695, %v2968_v60 }
 0x453   : > { %v2979_v7 = vmul.f32 1.442695, %v2967_v19  ;;  %v2962_v0 = vpop.xlane.xlu1 %2961 }
 0x454   : > { %6124 = vpow2.f32 %v2981_v46  ;;  %v2970_v30 = vsub.f32 %v8006_v16, %v2962_v0  ;;  %v2959_v27 = vpop.xlane.xlu0 %2958 }
 0x455   : > { %6126 = vpow2.f32 %v2979_v7  ;;  %v2969_v51 = vsub.f32 %v8008_v4, %v2959_v27 }
 0x456   : > { %v8014_v53 = vpop.eup %6116  ;;  %v2985_v32 = vmul.f32 1.442695, %v2970_v30 }
 0x457   : > { %v8016_v13 = vpop.eup %6118  ;;  %v2990_v14 = vsel %vm2938_vm5, %v8014_v53, 0.0  ;;  %v2983_v54 = vmul.f32 1.442695, %v2969_v51 }
 0x458   : > { %2991 = vadd.xlane.f32.xlu1 %v2990_v14  ;;  %v2987_v58 = vsel %vm2938_vm5, %v8016_v13, 0.0  ;;  %6128 = vpow2.f32 %v2985_v32 }
 0x459   : > { %2988 = vadd.xlane.f32.xlu0 %v2987_v58  ;;  %6130 = vpow2.f32 %v2983_v54 }
 0x45a   : > { %v8030_v44 = vpop.eup %6120 }
 0x45b   : > { %v8032_v34 = vpop.eup %6122  ;;  %v2996_v26 = vsel %vm2938_vm5, %v8030_v44, 0.0 }
 0x45c   : > { %v2993_v12 = vsel %vm2938_vm5, %v8032_v34, 0.0 }
 0x45e   : > { %v8036_v21 = vpop.eup %6124 }
 0x45f   : > { %v8040_v59 = vpop.eup %6126  ;;  %v3002_v36 = vsel %vm2938_vm5, %v8036_v21, 0.0 }
 0x460   : > { %v2999_v50 = vsel %vm2938_vm5, %v8040_v59, 0.0 }
 0x462   : > { %v8068_v24 = vpop.eup %6128 }
 0x463   : > { %v3008_v3 = vsel %vm2938_vm5, %v8068_v24, 0.0  ;;  %v8074_v56 = vpop.eup %6130 }
 0x464   : > { %v3005_v37 = vsel %vm2938_vm5, %v8074_v56, 0.0 }
 0x469   : > { %5986 = vrot.lane.b32.xlu1 %v7941_v18, %s6286_s16 }
 0x46f   : > { %5981 = vrot.lane.b32.xlu0 %v8026_v63, %s6286_s16 }
 0x48d   : > { %2997 = vadd.xlane.f32.xlu1 %v2996_v26 }
 0x48e   : > { %2994 = vadd.xlane.f32.xlu0 %v2993_v12 }
 0x491   : > { %3003 = vadd.xlane.f32.xlu1 %v3002_v36 }
 0x492   : > { %3000 = vadd.xlane.f32.xlu0 %v2999_v50 }
 0x4a2   : > { %5996 = vrot.lane.b32.xlu1 %v7949_v45, %s6286_s16 }
 0x4a6   : > { %3158 = vrot.lane.b32.xlu1 %v7956_v31, %s6286_s16 }
 0x4a8   : > { %5991 = vrot.lane.b32.xlu0 %v7947_v43, %s6286_s16 }
 0x4ac   : > { %3156 = vrot.lane.b32.xlu0 %v7912_v40, %s6286_s16 }
 0x4b0   : > { %3160 = vrot.lane.b32.xlu0 %v7959_v29, %s6286_s16 }
 0x4b4   : > { %3164 = vrot.lane.b32.xlu0 %v7969_v23, %s6286_s16 }
 0x4b8   : > { %3168 = vrot.lane.b32.xlu0 %v7981_v1, %s6286_s16 }
 0x4bc   : > { %6001 = vrot.lane.b32.xlu0 %v8026_v63, %s6287_s17 }
 0x4c0   : > { %6011 = vrot.lane.b32.xlu0 %v7947_v43, %s6287_s17 }
 0x4c4   : > { %3840 = vrot.lane.b32.xlu0 %v7912_v40, %s6287_s17 }
 0x4c8   : > { %3844 = vrot.lane.b32.xlu0 %v7959_v29, %s6287_s17 }
 0x4ca   : > { %3009 = vadd.xlane.f32.xlu1 %v3008_v3 }
 0x4cc   : > { %3848 = vrot.lane.b32.xlu0 %v7969_v23, %s6287_s17 }
 0x4ce   : > { %3006 = vadd.xlane.f32.xlu1 %v3005_v37 }
 0x4d0   : > { %3852 = vrot.lane.b32.xlu0 %v7981_v1, %s6287_s17 }
 0x4df   : > { %3162 = vrot.lane.b32.xlu1 %v7966_v52, %s6286_s16 }
 0x4e3   : > { %3166 = vrot.lane.b32.xlu1 %v7978_v20, %s6286_s16 }
 0x4e5   : > { %v2992_v49 = vpop.xlane.xlu1 %2991 }
 0x4e6   : > { %6132 = vrcp.f32 %v2992_v49  ;;  %v2989_v28 = vpop.xlane.xlu0 %2988 }
 0x4e7   : > { %6134 = vrcp.f32 %v2989_v28  ;;  %3170 = vrot.lane.b32.xlu1 %v7988_v55, %s6286_s16 }
 0x4e9   : > { %v5987_v61 = vpop.permute.xlu1 %5986 }
 0x4ea   : > { %v5982_v16 = vpop.permute.xlu0 %5981  ;;  %v5989_v35 = vunpack.i.h.bf16 %v5987_v61  ;;  %v5988_v17 = vunpack.i.l.bf16 %v5987_v61 }
 0x4eb   : > { %v5984_v15 = vunpack.i.h.bf16 %v5982_v16  ;;  %v5983_v4 = vunpack.i.l.bf16 %v5982_v16  ;;  %6006 = vrot.lane.b32.xlu1 %v7941_v18, %s6287_s17 }
 0x4ec   : > { %v5822_v14 = vpack.c.bf16 %v5989_v35, %v5988_v17 }
 0x4ed   : > { %v5816_v57 = vpack.c.bf16 %v5984_v15, %v5983_v4 }
 0x4ef   : > { %6016 = vrot.lane.b32.xlu1 %v7949_v45, %s6287_s17  ;;  %5818 = vmatprep.subr.msk.bf16.mxu0 %vm7927_vm4, %v5816_v57 }
 0x4f0   : > { %v6133_v41 = vpop.eup %6132 }
 0x4f1   : > { %v6135_v47 = vpop.eup %6134  ;;  %v3020_v39 = vmul.f32 %v6133_v41, %v8014_v53 }
 0x4f2   : > { %v3019_v25 = vmul.f32 %v6135_v47, %v8016_v13 }
 0x4f3   : > { %3842 = vrot.lane.b32.xlu1 %v7956_v31, %s6287_s17 }
 0x4f4   : > { %5516 = vmatprep.mubr.msk.f32.mxu0 %vm2938_vm5, %v3019_v25 }
 0x4f5   : > { %5517 = vmatmul.mubr.msk.f32.vlgmr.msra.gmra.mrb[16].mxu0 %vm2938_vm5, %v3020_v39 }
 0x4f6   : > { %5821 = vmatpush3.bf16.xpose.msk.msra.mxu0 %vm7927_vm4, %v5816_v57 }
 0x4f7   : > { %5824 = vmatprep.subr.msk.bf16.mxu0 %vm7927_vm4, %v5822_v14  ;;  %3846 = vrot.lane.b32.xlu1 %v7966_v52, %s6287_s17 }
 0x4fb   : > { %3850 = vrot.lane.b32.xlu1 %v7978_v20, %s6287_s17 }
 0x4fe   : > { %5827 = vmatpush3.bf16.xpose.msk.msra.mxu0 %vm7927_vm4, %v5822_v14 }
 0x4ff   : > { %3854 = vrot.lane.b32.xlu1 %v7988_v55, %s6287_s17 }
 0x51a   : > { %v2998_v53 = vpop.xlane.xlu1 %2997 }
 0x51b   : > { %6136 = vrcp.f32 %v2998_v53  ;;  %v2995_v13 = vpop.xlane.xlu0 %2994 }
 0x51c   : > { %6138 = vrcp.f32 %v2995_v13 }
 0x51e   : > { %v3004_v58 = vpop.xlane.xlu1 %3003 }
 0x51f   : > { %6140 = vrcp.f32 %v3004_v58  ;;  %v3001_v6 = vpop.xlane.xlu0 %3000 }
 0x520   : > { %6142 = vrcp.f32 %v3001_v6 }
 0x522   : > { %v5997_v5 = vpop.permute.xlu1 %5996 }
 0x523   : > { %v5992_v8 = vpop.permute.xlu0 %5991  ;;  %v5999_v11 = vunpack.i.h.bf16 %v5997_v5  ;;  %v5998_v33 = vunpack.i.l.bf16 %v5997_v5 }
 0x524   : > { %v5994_v62 = vunpack.i.h.bf16 %v5992_v8  ;;  %v5993_v42 = vunpack.i.l.bf16 %v5992_v8 }
 0x525   : > { %v6137_v60 = vpop.eup %6136  ;;  %v5834_v26 = vpack.c.bf16 %v5999_v11, %v5998_v33 }
 0x526   : > { %v6139_v22 = vpop.eup %6138  ;;  %v5828_v19 = vpack.c.bf16 %v5994_v62, %v5993_v42  ;;  %v3022_v12 = vmul.f32 %v6137_v60, %v8030_v44  ;;  %v3159_v37 = vpop.permute.xlu1 %3158 }
 0x527   : > { %v3157_v46 = vpop.permute.xlu0 %3156  ;;  %v3021_v7 = vmul.f32 %v6139_v22, %v8032_v34 }
 0x528   : > { %5830 = vmatprep.subr.msk.bf16.mxu0 %vm7927_vm4, %v5828_v19 }
 0x529   : > { %v6141_v36 = vpop.eup %6140  ;;  %5519 = vmatprep.mubr.msk.f32.mxu0 %vm2938_vm5, %v3021_v7  ;;  %5833 = vmatpush3.bf16.xpose.msk.msra.mxu0 %vm7927_vm4, %v5828_v19 }
 0x52a   : > { %v6143_v50 = vpop.eup %6142  ;;  %5520 = vmatmul.mubr.msk.f32.gmra.mrb[18].mxu0 %vm2938_vm5, %v3022_v12  ;;  %5836 = vmatprep.subr.msk.bf16.mxu0 %vm7927_vm4, %v5834_v26  ;;  %v3024_v30 = vmul.f32 %v6141_v36, %v8036_v21 }
 0x52b   : > { %v3161_v0 = vpop.permute.xlu0 %3160  ;;  %v3023_v34 = vmul.f32 %v6143_v50, %v8040_v59 }
 0x52d   : > { %5522 = vmatprep.mubr.msk.f32.mxu0 %vm2938_vm5, %v3023_v34 }
 0x52e   : > { %5523 = vmatmul.mubr.msk.f32.gmra.mrb[20].mxu0 %vm2938_vm5, %v3024_v30 }
 0x52f   : > { %v3165_v44 = vpop.permute.xlu0 %3164 }
 0x531   : > { %5839 = vmatpush3.bf16.xpose.msk.msra.mxu0 %vm7927_vm4, %v5834_v26 }
 0x533   : > { %v3169_v27 = vpop.permute.xlu0 %3168 }
 0x537   : > { %v6002_v32 = vpop.permute.xlu0 %6001 }
 0x538   : > { %v6004_v51 = vunpack.i.h.bf16 %v6002_v32  ;;  %v6003_v54 = vunpack.i.l.bf16 %v6002_v32 }
 0x53a   : > { %v5856_v3 = vpack.c.bf16 %v6004_v51, %v6003_v54 }
 0x53b   : > { %v6012_v25 = vpop.permute.xlu0 %6011 }
 0x53c   : > { %5858 = vmatprep.subr.msk.bf16.mxu0 %vm7927_vm4, %v5856_v3 }
 0x53f   : > { %v3841_v53 = vpop.permute.xlu0 %3840 }
 0x543   : > { %v3845_v8 = vpop.permute.xlu0 %3844 }
 0x547   : > { %v3849_v33 = vpop.permute.xlu0 %3848 }
 0x54b   : > { %v3853_v42 = vpop.permute.xlu0 %3852 }
 0x557   : > { %v3010_v59 = vpop.xlane.xlu1 %3009 }
 0x558   : > { %6144 = vrcp.f32 %v3010_v59 }
 0x55b   : > { %v3007_v21 = vpop.xlane.xlu1 %3006 }
 0x55c   : > { %6146 = vrcp.f32 %v3007_v21 }
 0x55f   : > { %v3163_v49 = vpop.permute.xlu1 %3162 }
 0x562   : > { %v6145_v16 = vpop.eup %6144 }
 0x563   : > { %v3167_v28 = vpop.permute.xlu1 %3166  ;;  %v3026_v61 = vmul.f32 %v6145_v16, %v8068_v24  ;;  %v6014_v24 = vunpack.i.h.bf16 %v6012_v25 }
 0x566   : > { %v6147_v15 = vpop.eup %6146 }
 0x567   : > { %v3171_v4 = vpop.permute.xlu1 %3170  ;;  %v3025_v57 = vmul.f32 %v6147_v15, %v8074_v56  ;;  %v6013_v56 = vunpack.i.l.bf16 %v6012_v25 }
 0x569   : > { %5525 = vmatprep.mubr.msk.f32.mxu0 %vm2938_vm5, %v3025_v57  ;;  %v5868_v39 = vpack.c.bf16 %v6014_v24, %v6013_v56 }
 0x56a   : > { %5526 = vmatmul.mubr.msk.f32.gmra.mrb[22].mxu0 %vm2938_vm5, %v3026_v61 }
 0x56b   : > { %v6007_v41 = vpop.permute.xlu1 %6006  ;;  %5544 = vmatprep.mubr.msk.f32.mxu0 %vm2776_vm3, %v3157_v46 }
 0x56c   : > { %v6009_v47 = vunpack.i.h.bf16 %v6007_v41  ;;  %v6008_v35 = vunpack.i.l.bf16 %v6007_v41 }
 0x56e   : > { %v5862_v17 = vpack.c.bf16 %v6009_v47, %v6008_v35  ;;  %5545 = vmatmul.mubr.msk.f32.vlgmr.msra.gmra.mrb[24].mxu0 %vm2776_vm3, %v3159_v37 }
 0x56f   : > { %5861 = vmatpush3.bf16.xpose.msk.msra.mxu0 %vm7927_vm4, %v5856_v3  ;;  %5547 = vmatprep.mubr.msk.f32.mxu0 %vm2776_vm3, %v3161_v0  ;;  %v6017_v14 = vpop.permute.xlu1 %6016 }
 0x570   : > { %5864 = vmatprep.subr.msk.bf16.mxu0 %vm7927_vm4, %v5862_v17  ;;  %v6019_v13 = vunpack.i.h.bf16 %v6017_v14  ;;  %v6018_v58 = vunpack.i.l.bf16 %v6017_v14 }
 0x572   : > { %5548 = vmatmul.mubr.msk.f32.gmra.mrb[26].mxu0 %vm2776_vm3, %v3163_v49  ;;  %v5874_v6 = vpack.c.bf16 %v6019_v13, %v6018_v58 }
 0x573   : > { %5550 = vmatprep.mubr.msk.f32.mxu0 %vm2776_vm3, %v3165_v44  ;;  %v3843_v5 = vpop.permute.xlu1 %3842 }
 0x576   : > { %5551 = vmatmul.mubr.msk.f32.gmra.mrb[28].mxu0 %vm2776_vm3, %v3167_v28 }
 0x577   : > { %5867 = vmatpush3.bf16.xpose.msk.msra.mxu0 %vm7927_vm4, %v5862_v17  ;;  %5553 = vmatprep.mubr.msk.f32.mxu0 %vm2776_vm3, %v3169_v27  ;;  %v3847_v11 = vpop.permute.xlu1 %3846 }
 0x578   : > { %5870 = vmatprep.subr.msk.bf16.mxu0 %vm7927_vm4, %v5868_v39 }
 0x57a   : > { %5554 = vmatmul.mubr.msk.f32.gmra.mrb[30].mxu0 %vm2776_vm3, %v3171_v4 }
 0x57b   : > { %5628 = vmatprep.mubr.msk.f32.mxu0 %vm2776_vm3, %v3841_v53  ;;  %v3851_v62 = vpop.permute.xlu1 %3850 }
 0x57f   : > { %5873 = vmatpush3.bf16.xpose.msk.msra.mxu0 %vm7927_vm4, %v5868_v39  ;;  %v3855_v60 = vpop.permute.xlu1 %3854 }
 0x580   : > { %5876 = vmatprep.subr.msk.bf16.mxu0 %vm7927_vm4, %v5874_v6 }
 0x587   : > { %5879 = vmatpush3.bf16.xpose.msk.msra.mxu0 %vm7927_vm4, %v5874_v6 }
 0x58e   : > { %5629 = vmatmul.mubr.msk.f32.vlgmr.msra.gmra.mrb[32].mxu0 %vm2776_vm3, %v3843_v5 }
 0x58f   : > { %5631 = vmatprep.mubr.msk.f32.mxu0 %vm2776_vm3, %v3845_v8 }
 0x592   : > { %5632 = vmatmul.mubr.msk.f32.gmra.mrb[34].mxu0 %vm2776_vm3, %v3847_v11 }
 0x593   : > { %5634 = vmatprep.mubr.msk.f32.mxu0 %vm2776_vm3, %v3849_v33 }
 0x596   : > { %5635 = vmatmul.mubr.msk.f32.gmra.mrb[36].mxu0 %vm2776_vm3, %v3851_v62 }
 0x597   : > { %5637 = vmatprep.mubr.msk.f32.mxu0 %vm2776_vm3, %v3853_v42 }
 0x59a   : > { %5638 = vmatmul.mubr.msk.f32.gmra.mrb[38].mxu0 %vm2776_vm3, %v3855_v60 }
 0x5c8   : > { %v8164_v22 = vpop.f32.mrb[16].mxu0 }
 0x5c9   : > { %v8166_v19 = vpop.f32.mrb[17].mxu0 }
 0x5fd   : > { %v8168_v46 = vpop.f32.mrb[18].mxu0 }
 0x5fe   : > { %v8170_v7 = vpop.f32.mrb[19].mxu0 }
 0x601   : > { %v8172_v26 = vpop.f32.mrb[20].mxu0 }
 0x602   : > { %v8174_v12 = vpop.f32.mrb[21].mxu0 }
 0x63d   : > { %v8176_v36 = vpop.f32.mrb[22].mxu0 }
 0x63e   : > { %v8178_v50 = vpop.f32.mrb[23].mxu0 }
 0x641   : > { %v5546_v0 = vpop.f32.mrb[24].mxu0 }
 0x642   : > { %v3326_v34 = vmul.f32 0.35355338, %v5546_v0  ;;  %v3286_v30 = vpop.f32.mrb[25].mxu0 }
 0x643   : > { %v3325_v44 = vmul.f32 0.35355338, %v3286_v30 }
 0x644   : > { %v3336_v27 = vsel %vm2938_vm5, %v3326_v34, -inf }
 0x645   : > { %3337 = vmax.xlane.f32.xlu1 %v3336_v27  ;;  %v5549_v32 = vpop.f32.mrb[26].mxu0  ;;  %v3333_v51 = vsel %vm2938_vm5, %v3325_v44, -inf }
 0x646   : > { %v3328_v54 = vmul.f32 0.35355338, %v5549_v32  ;;  %3334 = vmax.xlane.f32.xlu0 %v3333_v51  ;;  %v3296_v3 = vpop.f32.mrb[27].mxu0 }
 0x647   : > { %v3327_v59 = vmul.f32 0.35355338, %v3296_v3 }
 0x648   : > { %v3342_v37 = vsel %vm2938_vm5, %v3328_v54, -inf }
 0x649   : > { %v5552_v21 = vpop.f32.mrb[28].mxu0  ;;  %v3339_v57 = vsel %vm2938_vm5, %v3327_v59, -inf }
 0x64a   : > { %v3330_v49 = vmul.f32 0.35355338, %v5552_v21  ;;  %3343 = vmax.xlane.f32.xlu0 %v3342_v37  ;;  %v3306_v28 = vpop.f32.mrb[29].mxu0 }
 0x64b   : > { %v3329_v15 = vmul.f32 0.35355338, %v3306_v28 }
 0x64c   : > { %v3348_v16 = vsel %vm2938_vm5, %v3330_v49, -inf }
 0x64d   : > { %3349 = vmax.xlane.f32.xlu1 %v3348_v16  ;;  %v5555_v4 = vpop.f32.mrb[30].mxu0  ;;  %v3345_v17 = vsel %vm2938_vm5, %v3329_v15, -inf }
 0x64e   : > { %v3332_v61 = vmul.f32 0.35355338, %v5555_v4  ;;  %3340 = vmax.xlane.f32.xlu0 %v3339_v57  ;;  %v3316_v41 = vpop.f32.mrb[31].mxu0 }
 0x64f   : > { %v3331_v35 = vmul.f32 0.35355338, %v3316_v41 }
 0x650   : > { %v3354_v47 = vsel %vm2938_vm5, %v3332_v61, -inf }
 0x651   : > { %3355 = vmax.xlane.f32.xlu1 %v3354_v47  ;;  %v3351_v25 = vsel %vm2938_vm5, %v3331_v35, -inf }
 0x652   : > { %3346 = vmax.xlane.f32.xlu0 %v3345_v17 }
 0x656   : > { %3352 = vmax.xlane.f32.xlu0 %v3351_v25 }
 0x661   : > { %v8188_v24 = vpop.f32.mrb[32].mxu0 }
 0x662   : > { %v8190_v56 = vpop.f32.mrb[33].mxu0  ;;  %6026 = vrot.lane.b32.xlu1 %v7994_v9, %s6286_s16 }
 0x665   : > { %v8194_v39 = vpop.f32.mrb[34].mxu0 }
 0x666   : > { %v8196_v14 = vpop.f32.mrb[35].mxu0 }
 0x669   : > { %v8198_v53 = vpop.f32.mrb[36].mxu0 }
 0x66a   : > { %v8200_v13 = vpop.f32.mrb[37].mxu0 }
 0x66c   : > { %6021 = vrot.lane.b32.xlu0 %v7992_v10, %s6286_s16 }
 0x66d   : > { %v8204_v58 = vpop.f32.mrb[38].mxu0 }
 0x66e   : > { %v8206_v6 = vpop.f32.mrb[39].mxu0 }
 0x6d2   : > { %v3338_v5 = vpop.xlane.xlu1 %3337 }
 0x6d3   : > { %v3358_v8 = vsub.f32 %v3326_v34, %v3338_v5  ;;  %v3335_v11 = vpop.xlane.xlu0 %3334 }
 0x6d4   : > { %v3357_v33 = vsub.f32 %v3325_v44, %v3335_v11 }
 0x6d5   : > { %v3367_v62 = vmul.f32 1.442695, %v3358_v8 }
 0x6d6   : > { %v3365_v42 = vmul.f32 1.442695, %v3357_v33 }
 0x6d7   : > { %6148 = vpow2.f32 %v3367_v62  ;;  %v3344_v60 = vpop.xlane.xlu0 %3343 }
 0x6d8   : > { %6150 = vpow2.f32 %v3365_v42  ;;  %v3360_v0 = vsub.f32 %v3328_v54, %v3344_v60 }
 0x6da   : > { %v3371_v30 = vmul.f32 1.442695, %v3360_v0  ;;  %v3350_v27 = vpop.xlane.xlu1 %3349 }
 0x6db   : > { %v3362_v32 = vsub.f32 %v3330_v49, %v3350_v27  ;;  %v3341_v51 = vpop.xlane.xlu0 %3340 }
 0x6dc   : > { %6152 = vpow2.f32 %v3371_v30  ;;  %v3359_v3 = vsub.f32 %v3327_v59, %v3341_v51 }
 0x6dd   : > { %v3375_v37 = vmul.f32 1.442695, %v3362_v32 }
 0x6de   : > { %v3369_v21 = vmul.f32 1.442695, %v3359_v3  ;;  %v3356_v28 = vpop.xlane.xlu1 %3355 }
 0x6df   : > { %6154 = vpow2.f32 %v3375_v37  ;;  %v3364_v16 = vsub.f32 %v3332_v61, %v3356_v28  ;;  %v3347_v34 = vpop.xlane.xlu0 %3346 }
 0x6e0   : > { %6156 = vpow2.f32 %v3369_v21  ;;  %v3361_v44 = vsub.f32 %v3329_v15, %v3347_v34 }
 0x6e1   : > { %v8208_v4 = vpop.eup %6148  ;;  %v3379_v57 = vmul.f32 1.442695, %v3364_v16 }
 0x6e2   : > { %v8210_v41 = vpop.eup %6150  ;;  %v3373_v54 = vmul.f32 1.442695, %v3361_v44  ;;  %v3384_v49 = vsel %vm2938_vm5, %v8208_v4, 0.0  ;;  %v6027_v15 = vpop.permute.xlu1 %6026 }
 0x6e3   : > { %6158 = vpow2.f32 %v3379_v57  ;;  %3385 = vadd.xlane.f32.xlu1 %v3384_v49  ;;  %v3353_v59 = vpop.xlane.xlu0 %3352  ;;  %v3381_v47 = vsel %vm2938_vm5, %v8210_v41, 0.0  ;;  %v6029_v42 = vunpack.i.h.bf16 %v6027_v15  ;;  %v6028_v60 = vunpack.i.l.bf16 %v6027_v15 }
 0x6e4   : > { %6160 = vpow2.f32 %v3373_v54  ;;  %v3363_v61 = vsub.f32 %v3331_v35, %v3353_v59  ;;  %3382 = vadd.xlane.f32.xlu0 %v3381_v47 }
 0x6e5   : > { %v5844_v51 = vpack.c.bf16 %v6029_v42, %v6028_v60 }
 0x6e6   : > { %v8216_v17 = vpop.eup %6152  ;;  %v3377_v25 = vmul.f32 1.442695, %v3363_v61 }
 0x6e7   : > { %v6022_v5 = vpop.permute.xlu0 %6021  ;;  %v3390_v8 = vsel %vm2938_vm5, %v8216_v17, 0.0 }
 0x6e8   : > { %6162 = vpow2.f32 %v3377_v25  ;;  %v6024_v11 = vunpack.i.h.bf16 %v6022_v5  ;;  %v6023_v33 = vunpack.i.l.bf16 %v6022_v5  ;;  %3391 = vadd.xlane.f32.xlu1 %v3390_v8 }
 0x6e9   : > { %v8220_v62 = vpop.eup %6154 }
 0x6ea   : > { %v8222_v0 = vpop.eup %6156  ;;  %v5840_v35 = vpack.c.bf16 %v6024_v11, %v6023_v33  ;;  %v3396_v30 = vsel %vm2938_vm5, %v8220_v62, 0.0 }
 0x6eb   : > { %v3387_v27 = vsel %vm2938_vm5, %v8222_v0, 0.0 }
 0x6ec   : > { %3397 = vadd.xlane.f32.xlu1 %v3396_v30  ;;  %3388 = vadd.xlane.f32.xlu0 %v3387_v27 }
 0x6ed   : > { %v8228_v32 = vpop.eup %6158  ;;  %5841 = vmatprep.subr.bf16.mxu1 %v5840_v35 }
 0x6ee   : > { %v8230_v3 = vpop.eup %6160  ;;  %5843 = vmatpush3.bf16.msra.mxu1 %v5840_v35  ;;  %v3402_v37 = vsel %vm2938_vm5, %v8228_v32, 0.0 }
 0x6ef   : > { %5845 = vmatprep.subr.bf16.mxu1 %v5844_v51  ;;  %v3393_v21 = vsel %vm2938_vm5, %v8230_v3, 0.0 }
 0x6f0   : > { %3403 = vadd.xlane.f32.xlu1 %v3402_v37  ;;  %3394 = vadd.xlane.f32.xlu0 %v3393_v21 }
 0x6f2   : > { %v8236_v28 = vpop.eup %6162  ;;  %5847 = vmatpush3.bf16.msra.mxu1 %v5844_v51 }
 0x6f3   : > { %v3399_v16 = vsel %vm2938_vm5, %v8236_v28, 0.0 }
 0x6f4   : > { %3400 = vadd.xlane.f32.xlu1 %v3399_v16 }
 0x705   : > { %6036 = vrot.lane.b32.xlu1 %v7998_v48, %s6286_s16 }
 0x706   : > { %6031 = vrot.lane.b32.xlu0 %v7996_v38, %s6286_s16 }
 0x709   : > { %6046 = vrot.lane.b32.xlu1 %v7941_v18, %s6288_s18  ;;  %v8272_v18 = vmul.f32 0.35355338, %v8188_v24  ;;  %v8300_v24 = vmul.f32 0.35355338, %v8206_v6 }
 0x70a   : > { %6041 = vrot.lane.b32.xlu0 %v8026_v63, %s6288_s18 }
 0x70d   : > { %6056 = vrot.lane.b32.xlu1 %v7949_v45, %s6288_s18 }
 0x70e   : > { %6051 = vrot.lane.b32.xlu0 %v7947_v43, %s6288_s18  ;;  %v8275_v43 = vmul.f32 0.35355338, %v8196_v14  ;;  %v4035_v14 = vsel %vm2938_vm5, %v8300_v24, -inf }
 0x711   : > { %4397 = vrot.lane.b32.xlu1 %v7956_v31, %s6288_s18  ;;  %v8280_v31 = vmul.f32 0.35355338, %v8194_v39 }
 0x712   : > { %4395 = vrot.lane.b32.xlu0 %v7912_v40, %s6288_s18  ;;  %v8269_v40 = vmul.f32 0.35355338, %v8190_v56 }
 0x714   : > { %v4017_v45 = vsel %vm2938_vm5, %v8269_v40, -inf }
 0x715   : > { %4401 = vrot.lane.b32.xlu1 %v7966_v52, %s6288_s18  ;;  %v4023_v52 = vsel %vm2938_vm5, %v8275_v43, -inf }
 0x716   : > { %4399 = vrot.lane.b32.xlu0 %v7959_v29, %s6288_s18  ;;  %v8283_v29 = vmul.f32 0.35355338, %v8198_v53 }
 0x718   : > { %v4032_v63 = vsel %vm2938_vm5, %v8283_v29, -inf }
 0x719   : > { %4405 = vrot.lane.b32.xlu1 %v7978_v20, %s6288_s18  ;;  %v8290_v20 = vmul.f32 0.35355338, %v8200_v13 }
 0x71a   : > { %4403 = vrot.lane.b32.xlu0 %v7969_v23, %s6288_s18  ;;  %v4020_v23 = vsel %vm2938_vm5, %v8272_v18, -inf }
 0x71b   : > { %v4029_v56 = vsel %vm2938_vm5, %v8290_v20, -inf }
 0x71d   : > { %4409 = vrot.lane.b32.xlu1 %v7988_v55, %s6288_s18  ;;  %v4026_v55 = vsel %vm2938_vm5, %v8280_v31, -inf }
 0x71e   : > { %4407 = vrot.lane.b32.xlu0 %v7981_v1, %s6288_s18  ;;  %v8293_v1 = vmul.f32 0.35355338, %v8204_v58 }
 0x720   : > { %v4038_v39 = vsel %vm2938_vm5, %v8293_v1, -inf }
 0x73d   : > { %4018 = vmax.xlane.f32.xlu0 %v4017_v45 }
 0x741   : > { %4024 = vmax.xlane.f32.xlu0 %v4023_v52  ;;  %4021 = vmax.xlane.f32.xlu1 %v4020_v23 }
 0x745   : > { %4027 = vmax.xlane.f32.xlu0 %v4026_v55  ;;  %4033 = vmax.xlane.f32.xlu1 %v4032_v63 }
 0x749   : > { %4030 = vmax.xlane.f32.xlu0 %v4029_v56  ;;  %4039 = vmax.xlane.f32.xlu1 %v4038_v39 }
 0x74d   : > { %4036 = vmax.xlane.f32.xlu0 %v4035_v14 }
 0x75a   : > { %6066 = vrot.lane.b32.xlu1 %v7994_v9, %s6287_s17 }
 0x763   : > { %6061 = vrot.lane.b32.xlu0 %v7992_v10, %s6287_s17 }
 0x770   : > { %v3386_v53 = vpop.xlane.xlu1 %3385 }
 0x771   : > { %v3383_v13 = vpop.xlane.xlu0 %3382 }
 0x772   : > { %6164 = vrcp.f32 %v3383_v13 }
 0x773   : > { %6166 = vrcp.f32 %v3386_v53 }
 0x775   : > { %v3392_v58 = vpop.xlane.xlu1 %3391 }
 0x779   : > { %v3398_v6 = vpop.xlane.xlu1 %3397  ;;  %v3389_v34 = vpop.xlane.xlu0 %3388 }
 0x77a   : > { %6168 = vrcp.f32 %v3389_v34 }
 0x77b   : > { %6170 = vrcp.f32 %v3392_v58 }
 0x77c   : > { %v6165_v44 = vpop.eup %6164 }
 0x77d   : > { %v3404_v57 = vpop.xlane.xlu1 %3403  ;;  %v3395_v54 = vpop.xlane.xlu0 %3394  ;;  %v3413_v49 = vmul.f32 %v6165_v44, %v8210_v41 }
 0x77e   : > { %6172 = vrcp.f32 %v3395_v54  ;;  %v6167_v30 = vpop.eup %6166 }
 0x77f   : > { %5572 = vmatprep.mubr.msk.f32.mxu1 %vm2938_vm5, %v3413_v49  ;;  %6174 = vrcp.f32 %v3398_v6  ;;  %v3414_v45 = vmul.f32 %v6167_v30, %v8208_v4 }
 0x781   : > { %v3401_v59 = vpop.xlane.xlu1 %3400  ;;  %v6032_v47 = vpop.permute.xlu0 %6031 }
 0x782   : > { %v6034_v61 = vunpack.i.h.bf16 %v6032_v47  ;;  %v6033_v15 = vunpack.i.l.bf16 %v6032_v47  ;;  %6176 = vrcp.f32 %v3401_v59 }
 0x783   : > { %6178 = vrcp.f32 %v3404_v57 }
 0x784   : > { %v5848_v25 = vpack.c.bf16 %v6034_v61, %v6033_v15  ;;  %v6169_v37 = vpop.eup %6168 }
 0x785   : > { %v6037_v5 = vpop.permute.xlu1 %6036  ;;  %v6042_v8 = vpop.permute.xlu0 %6041  ;;  %v3415_v63 = vmul.f32 %v6169_v37, %v8222_v0 }
 0x786   : > { %v6039_v11 = vunpack.i.h.bf16 %v6037_v5  ;;  %v6038_v33 = vunpack.i.l.bf16 %v6037_v5  ;;  %v6044_v42 = vunpack.i.h.bf16 %v6042_v8  ;;  %v6043_v60 = vunpack.i.l.bf16 %v6042_v8  ;;  %5849 = vmatprep.subr.bf16.mxu1 %v5848_v25  ;;  %v6171_v23 = vpop.eup %6170 }
 0x787   : > { %5851 = vmatpush3.bf16.msra.mxu1 %v5848_v25  ;;  %v3416_v53 = vmul.f32 %v6171_v23, %v8216_v17 }
 0x788   : > { %v5852_v41 = vpack.c.bf16 %v6039_v11, %v6038_v33  ;;  %v5896_v35 = vpack.c.bf16 %v6044_v42, %v6043_v60  ;;  %v6173_v56 = vpop.eup %6172 }
 0x789   : > { %v6047_v27 = vpop.permute.xlu1 %6046  ;;  %v6052_v51 = vpop.permute.xlu0 %6051  ;;  %v3417_v13 = vmul.f32 %v6173_v56, %v8230_v3 }
 0x78a   : > { %v6049_v21 = vunpack.i.h.bf16 %v6047_v27  ;;  %v6048_v16 = vunpack.i.l.bf16 %v6047_v27  ;;  %5853 = vmatprep.subr.bf16.mxu1 %v5852_v41  ;;  %5898 = vmatprep.subr.msk.bf16.mxu0 %vm7927_vm4, %v5896_v35  ;;  %v6054_v39 = vunpack.i.h.bf16 %v6052_v51  ;;  %v6053_v14 = vunpack.i.l.bf16 %v6052_v51  ;;  %v6175_v4 = vpop.eup %6174 }
 0x78b   : > { %5855 = vmatpush3.bf16.msra.mxu1 %v5852_v41  ;;  %5901 = vmatpush3.bf16.xpose.msk.msra.mxu0 %vm7927_vm4, %v5896_v35  ;;  %v3418_v34 = vmul.f32 %v6175_v4, %v8220_v62  ;;  %v2772_v4 = vld [vmem:[%s8592_s7] sm:$0xff] }
 0x78c   : > { %v5902_v52 = vpack.c.bf16 %v6049_v21, %v6048_v16  ;;  %v6177_v58 = vpop.eup %6176  ;;  %v5908_v6 = vpack.c.bf16 %v6054_v39, %v6053_v14 }
 0x78d   : > { %v4396_v55 = vpop.permute.xlu0 %4395  ;;  %v6057_v0 = vpop.permute.xlu1 %6056  ;;  %v3419_v17 = vmul.f32 %v6177_v58, %v8236_v28 }
 0x78e   : > { %5573 = vmatmul.mubr.msk.f32.vlgmr.msra.gmra.mrb[16].mxu1 %vm2938_vm5, %v3414_v45  ;;  %5904 = vmatprep.subr.msk.bf16.mxu0 %vm7927_vm4, %v5902_v52  ;;  %v6179_v44 = vpop.eup %6178  ;;  %v6059_v57 = vunpack.i.h.bf16 %v6057_v0  ;;  %v6058_v3 = vunpack.i.l.bf16 %v6057_v0 }
 0x78f   : > { %5698 = vmatprep.mubr.msk.f32.mxu0 %vm2776_vm3, %v4396_v55  ;;  %5575 = vmatprep.mubr.msk.f32.mxu1 %vm2938_vm5, %v3415_v63  ;;  %v3420_v54 = vmul.f32 %v6179_v44, %v8228_v32 }
 0x790   : > { %v5914_v49 = vpack.c.bf16 %v6059_v57, %v6058_v3 }
 0x791   : > { %v4398_v62 = vpop.permute.xlu1 %4397  ;;  %v4400_v28 = vpop.permute.xlu0 %4399 }
 0x792   : > { %5576 = vmatmul.mubr.msk.f32.gmra.mrb[18].mxu1 %vm2938_vm5, %v3416_v53 }
 0x793   : > { %5578 = vmatprep.mubr.msk.f32.mxu1 %vm2938_vm5, %v3417_v13  ;;  %5907 = vmatpush3.bf16.xpose.msk.msra.mxu0 %vm7927_vm4, %v5902_v52 }
 0x794   : > { %5910 = vmatprep.subr.msk.bf16.mxu0 %vm7927_vm4, %v5908_v6 }
 0x795   : > { %v4402_v59 = vpop.permute.xlu1 %4401  ;;  %v4404_v32 = vpop.permute.xlu0 %4403 }
 0x796   : > { %5579 = vmatmul.mubr.msk.f32.gmra.mrb[20].mxu1 %vm2938_vm5, %v3418_v34 }
 0x797   : > { %5581 = vmatprep.mubr.msk.f32.mxu1 %vm2938_vm5, %v3419_v17 }
 0x799   : > { %v4406_v47 = vpop.permute.xlu1 %4405  ;;  %v4408_v61 = vpop.permute.xlu0 %4407 }
 0x79a   : > { %5582 = vmatmul.mubr.msk.f32.gmra.mrb[22].mxu1 %vm2938_vm5, %v3420_v54 }
 0x79b   : > { %5913 = vmatpush3.bf16.xpose.msk.msra.mxu0 %vm7927_vm4, %v5908_v6 }
 0x79c   : > { %5916 = vmatprep.subr.msk.bf16.mxu0 %vm7927_vm4, %v5914_v49 }
 0x79d   : > { %v4410_v15 = vpop.permute.xlu1 %4409 }
 0x7a3   : > { %5919 = vmatpush3.bf16.xpose.msk.msra.mxu0 %vm7927_vm4, %v5914_v49 }
 0x7aa   : > { %5699 = vmatmul.mubr.msk.f32.vlgmr.msra.gmra.mrb[40].mxu0 %vm2776_vm3, %v4398_v62 }
 0x7ab   : > { %5701 = vmatprep.mubr.msk.f32.mxu0 %vm2776_vm3, %v4400_v28 }
 0x7ae   : > { %5702 = vmatmul.mubr.msk.f32.gmra.mrb[42].mxu0 %vm2776_vm3, %v4402_v59 }
 0x7af   : > { %5704 = vmatprep.mubr.msk.f32.mxu0 %vm2776_vm3, %v4404_v32 }
 0x7b2   : > { %5705 = vmatmul.mubr.msk.f32.gmra.mrb[44].mxu0 %vm2776_vm3, %v4406_v47 }
 0x7b3   : > { %5707 = vmatprep.mubr.msk.f32.mxu0 %vm2776_vm3, %v4408_v61 }
 0x7b6   : > { %5708 = vmatmul.mubr.msk.f32.gmra.mrb[46].mxu0 %vm2776_vm3, %v4410_v15 }
 0x7ca   : > { %v4019_v2 = vpop.xlane.xlu0 %4018 }
 0x7cb   : > { %v4041_v25 = vsub.f32 %v8269_v40, %v4019_v2 }
 0x7cd   : > { %v4049_v5 = vmul.f32 1.442695, %v4041_v25 }
 0x7ce   : > { %v4022_v8 = vpop.xlane.xlu1 %4021  ;;  %v4025_v11 = vpop.xlane.xlu0 %4024 }
 0x7cf   : > { %6180 = vpow2.f32 %v4049_v5  ;;  %v4042_v33 = vsub.f32 %v8272_v18, %v4022_v8  ;;  %v4043_v42 = vsub.f32 %v8275_v43, %v4025_v11 }
 0x7d1   : > { %v4051_v60 = vmul.f32 1.442695, %v4042_v33  ;;  %v4053_v41 = vmul.f32 1.442695, %v4043_v42 }
 0x7d2   : > { %v4034_v35 = vpop.xlane.xlu1 %4033  ;;  %v4028_v30 = vpop.xlane.xlu0 %4027 }
 0x7d3   : > { %6182 = vpow2.f32 %v4051_v60  ;;  %v4046_v27 = vsub.f32 %v8283_v29, %v4034_v35  ;;  %v4044_v51 = vsub.f32 %v8280_v31, %v4028_v30 }
 0x7d4   : > { %6184 = vpow2.f32 %v4053_v41 }
 0x7d5   : > { %v4055_v37 = vmul.f32 1.442695, %v4044_v51  ;;  %v4059_v40 = vmul.f32 1.442695, %v4046_v27 }
 0x7d6   : > { %v4040_v21 = vpop.xlane.xlu1 %4039  ;;  %v4031_v16 = vpop.xlane.xlu0 %4030 }
 0x7d7   : > { %v4048_v45 = vsub.f32 %v8293_v1, %v4040_v21  ;;  %v4045_v18 = vsub.f32 %v8290_v20, %v4031_v16  ;;  %6186 = vpow2.f32 %v4055_v37 }
 0x7d8   : > { %6188 = vpow2.f32 %v4059_v40 }
 0x7d9   : > { %v8359_v43 = vpop.eup %6180  ;;  %v4057_v52 = vmul.f32 1.442695, %v4045_v18  ;;  %v4063_v23 = vmul.f32 1.442695, %v4048_v45 }
 0x7da   : > { %v4037_v55 = vpop.xlane.xlu0 %4036  ;;  %v4065_v29 = vsel %vm2938_vm5, %v8359_v43, 0.0  ;;  %v6067_v61 = vpop.permute.xlu1 %6066 }
 0x7db   : > { %v4047_v31 = vsub.f32 %v8300_v24, %v4037_v55  ;;  %4066 = vadd.xlane.f32.xlu0 %v4065_v29  ;;  %6190 = vpow2.f32 %v4057_v52  ;;  %v2773_v24 = vld [vmem:[%s8592_s7 + $0x8] sm:$0xff]  ;;  %v6069_v33 = vunpack.i.h.bf16 %v6067_v61  ;;  %v6068_v42 = vunpack.i.l.bf16 %v6067_v61 }
 0x7dc   : > { %6192 = vpow2.f32 %v4063_v23  ;;  %5584 = vmatprep.subr.mxu1 %v2773_v24 }
 0x7dd   : > { %v8364_v63 = vpop.eup %6182  ;;  %v4061_v20 = vmul.f32 1.442695, %v4047_v31  ;;  %5585 = vmatpush3.msra.mxu1 %v2773_v24  ;;  %v5884_v35 = vpack.c.bf16 %v6069_v33, %v6068_v42 }
 0x7de   : > { %v8366_v56 = vpop.eup %6184  ;;  %v4068_v1 = vsel %vm2938_vm5, %v8364_v63, 0.0  ;;  %5598 = vmatprep.subr.mxu1 %v2772_v4  ;;  %v6062_v3 = vpop.permute.xlu0 %6061 }
 0x7df   : > { %4069 = vadd.xlane.f32.xlu1 %v4068_v1  ;;  %v4071_v39 = vsel %vm2938_vm5, %v8366_v56, 0.0  ;;  %6194 = vpow2.f32 %v4061_v20  ;;  %v6064_v54 = vunpack.i.h.bf16 %v6062_v3  ;;  %v6063_v49 = vunpack.i.l.bf16 %v6062_v3 }
 0x7e0   : > { %4072 = vadd.xlane.f32.xlu0 %v4071_v39 }
 0x7e1   : > { %v8375_v14 = vpop.eup %6186  ;;  %v5880_v59 = vpack.c.bf16 %v6064_v54, %v6063_v49 }
 0x7e2   : > { %v4074_v53 = vsel %vm2938_vm5, %v8375_v14, 0.0  ;;  %v8382_v13 = vpop.eup %6188 }
 0x7e3   : > { %4075 = vadd.xlane.f32.xlu1 %v4074_v53  ;;  %v4080_v6 = vsel %vm2938_vm5, %v8382_v13, 0.0 }
 0x7e5   : > { %v8384_v58 = vpop.eup %6190 }
 0x7e6   : > { %v4077_v0 = vsel %vm2938_vm5, %v8384_v58, 0.0  ;;  %v8390_v34 = vpop.eup %6192 }
 0x7e7   : > { %4081 = vadd.xlane.f32.xlu1 %v4080_v6  ;;  %4078 = vadd.xlane.f32.xlu0 %v4077_v0  ;;  %v4086_v44 = vsel %vm2938_vm5, %v8390_v34, 0.0 }
 0x7e9   : > { %v8394_v17 = vpop.eup %6194 }
 0x7ea   : > { %v4083_v57 = vsel %vm2938_vm5, %v8394_v17, 0.0 }
 0x7eb   : > { %4087 = vadd.xlane.f32.xlu1 %v4086_v44 }
 0x7ef   : > { %4084 = vadd.xlane.f32.xlu1 %v4083_v57 }
 0x7fd   : > { %6071 = vrot.lane.b32.xlu0 %v7996_v38, %s6287_s17 }
 0x800   : > { %6076 = vrot.lane.b32.xlu1 %v7998_v48, %s6287_s17 }
 0x861   : > { %v5574_v62 = vpop.f32.mrb[16].mxu1 }
 0x862   : > { %v3543_v28 = vpop.f32.mrb[17].mxu1 }
 0x863   : > { %5586 = vmatprep.mubr.msk.f32.mxu1 %vm2776_vm3, %v3543_v28 }
 0x864   : > { %5587 = vmatmul.mubr.msk.f32.vlgmr.msra.gmra.mrb[24].mxu1 %vm2776_vm3, %v5574_v62 }
 0x865   : > { %5599 = vmatpush3.msra.mxu1 %v2772_v4  ;;  %v5577_v32 = vpop.f32.mrb[18].mxu1 }
 0x866   : > { %5881 = vmatprep.subr.bf16.mxu1 %v5880_v59  ;;  %v3553_v47 = vpop.f32.mrb[19].mxu1 }
 0x867   : > { %5589 = vmatprep.mubr.msk.f32.mxu1 %vm2776_vm3, %v3553_v47 }
 0x868   : > { %5590 = vmatmul.mubr.msk.f32.gmra.mrb[26].mxu1 %vm2776_vm3, %v5577_v32  ;;  %v4067_v25 = vpop.xlane.xlu0 %4066 }
 0x869   : > { %v5580_v15 = vpop.f32.mrb[20].mxu1  ;;  %6196 = vrcp.f32 %v4067_v25 }
 0x86a   : > { %v3563_v2 = vpop.f32.mrb[21].mxu1 }
 0x86b   : > { %5592 = vmatprep.mubr.msk.f32.mxu1 %vm2776_vm3, %v3563_v2 }
 0x86c   : > { %v4070_v5 = vpop.xlane.xlu1 %4069  ;;  %5593 = vmatmul.mubr.msk.f32.gmra.mrb[28].mxu1 %vm2776_vm3, %v5580_v15 }
 0x86d   : > { %v5583_v8 = vpop.f32.mrb[22].mxu1  ;;  %v4073_v60 = vpop.xlane.xlu0 %4072  ;;  %6198 = vrcp.f32 %v4070_v5 }
 0x86e   : > { %v3573_v11 = vpop.f32.mrb[23].mxu1  ;;  %6200 = vrcp.f32 %v4073_v60 }
 0x86f   : > { %5595 = vmatprep.mubr.msk.f32.mxu1 %vm2776_vm3, %v3573_v11 }
 0x870   : > { %5596 = vmatmul.mubr.msk.f32.gmra.mrb[30].mxu1 %vm2776_vm3, %v5583_v8  ;;  %v4076_v41 = vpop.xlane.xlu1 %4075 }
 0x871   : > { %5600 = vmatprep.mubr.msk.f32.mxu1 %vm2776_vm3, %v8166_v19  ;;  %6202 = vrcp.f32 %v4076_v41 }
 0x874   : > { %5601 = vmatmul.mubr.msk.f32.vlgmr.msra.gmra.mrb[24].mxu1 %vm2776_vm3, %v8164_v22  ;;  %v4082_v30 = vpop.xlane.xlu1 %4081  ;;  %v4079_v27 = vpop.xlane.xlu0 %4078 }
 0x875   : > { %5883 = vmatpush3.bf16.msra.mxu1 %v5880_v59  ;;  %5603 = vmatprep.mubr.msk.f32.mxu1 %vm2776_vm3, %v8170_v7  ;;  %v6197_v22 = vpop.eup %6196  ;;  %6204 = vrcp.f32 %v4079_v27 }
 0x876   : > { %5885 = vmatprep.subr.bf16.mxu1 %v5884_v35  ;;  %v4097_v18 = vmul.f32 %v6197_v22, %v8359_v43  ;;  %6206 = vrcp.f32 %v4082_v30 }
 0x877   : > { %v6199_v20 = vpop.eup %6198 }
 0x878   : > { %5604 = vmatmul.mubr.msk.f32.gmra.mrb[26].mxu1 %vm2776_vm3, %v8168_v46  ;;  %v4088_v51 = vpop.xlane.xlu1 %4087  ;;  %v6072_v37 = vpop.permute.xlu0 %6071  ;;  %v4098_v0 = vmul.f32 %v6199_v20, %v8364_v63 }
 0x879   : > { %5887 = vmatpush3.bf16.msra.mxu1 %v5884_v35  ;;  %5606 = vmatprep.mubr.msk.f32.mxu1 %vm2776_vm3, %v8174_v12  ;;  %v6074_v19 = vunpack.i.h.bf16 %v6072_v37  ;;  %v6073_v40 = vunpack.i.l.bf16 %v6072_v37  ;;  %v6201_v53 = vpop.eup %6200 }
 0x87a   : > { %v4099_v62 = vmul.f32 %v6201_v53, %v8366_v56 }
 0x87b   : > { %v5888_v21 = vpack.c.bf16 %v6074_v19, %v6073_v40  ;;  %v6203_v57 = vpop.eup %6202 }
 0x87c   : > { %5607 = vmatmul.mubr.msk.f32.gmra.mrb[28].mxu1 %vm2776_vm3, %v8172_v26  ;;  %v4085_v7 = vpop.xlane.xlu1 %4084  ;;  %v4100_v47 = vmul.f32 %v6203_v57, %v8375_v14 }
 0x87d   : > { %5609 = vmatprep.mubr.msk.f32.mxu1 %vm2776_vm3, %v8178_v50  ;;  %v5700_v46 = vpop.f32.mrb[40].mxu0  ;;  %5889 = vmatprep.subr.bf16.mxu1 %v5888_v21  ;;  %6208 = vrcp.f32 %v4085_v7 }
 0x87e   : > { %v8424_v16 = vmul.f32 0.35355338, %v5700_v46  ;;  %v4525_v45 = vpop.f32.mrb[41].mxu0  ;;  %5891 = vmatpush3.bf16.msra.mxu1 %v5888_v21  ;;  %6210 = vrcp.f32 %v4088_v51 }
 0x87f   : > { %v8426_v12 = vmul.f32 0.35355338, %v4525_v45  ;;  %v6205_v28 = vpop.eup %6204 }
 0x880   : > { %5610 = vmatmul.mubr.msk.f32.gmra.mrb[30].mxu1 %vm2776_vm3, %v8176_v36  ;;  %v4575_v26 = vsel %vm2938_vm5, %v8424_v16, -inf  ;;  %v6077_v52 = vpop.permute.xlu1 %6076  ;;  %v6207_v61 = vpop.eup %6206  ;;  %v4101_v56 = vmul.f32 %v6205_v28, %v8384_v58 }
 0x881   : > { %4576 = vmax.xlane.f32.xlu1 %v4575_v26  ;;  %5656 = vmatprep.mubr.msk.f32.mxu1 %vm2938_vm5, %v4097_v18  ;;  %v5703_v50 = vpop.f32.mrb[42].mxu0  ;;  %v4572_v23 = vsel %vm2938_vm5, %v8426_v12, -inf  ;;  %v6079_v55 = vunpack.i.h.bf16 %v6077_v52  ;;  %v6078_v29 = vunpack.i.l.bf16 %v6077_v52  ;;  %v4102_v5 = vmul.f32 %v6207_v61, %v8382_v13  ;;  %v2774_v13 = vld [vmem:[%s8592_s7 + $0x10] sm:$0xff] }
 0x882   : > { %4573 = vmax.xlane.f32.xlu0 %v4572_v23  ;;  %v4535_v31 = vpop.f32.mrb[43].mxu0  ;;  %v8438_v1 = vmul.f32 0.35355338, %v5703_v50 }
 0x883   : > { %v8436_v43 = vmul.f32 0.35355338, %v4535_v31  ;;  %v5892_v36 = vpack.c.bf16 %v6079_v55, %v6078_v29 }
 0x884   : > { %v4581_v49 = vsel %vm2938_vm5, %v8438_v1, -inf }
 0x885   : > { %v5706_v39 = vpop.f32.mrb[44].mxu0  ;;  %v4578_v24 = vsel %vm2938_vm5, %v8436_v43, -inf  ;;  %5893 = vmatprep.subr.bf16.mxu1 %v5892_v36 }
 0x886   : > { %v4569_v4 = vmul.f32 0.35355338, %v5706_v39  ;;  %4579 = vmax.xlane.f32.xlu0 %v4578_v24  ;;  %v4545_v6 = vpop.f32.mrb[45].mxu0  ;;  %5895 = vmatpush3.bf16.msra.mxu1 %v5892_v36 }
 0x887   : > { %v8444_v3 = vmul.f32 0.35355338, %v4545_v6  ;;  %v6209_v25 = vpop.eup %6208  ;;  %5668 = vmatprep.subr.mxu1 %v2774_v13 }
 0x888   : > { %v4587_v44 = vsel %vm2938_vm5, %v4569_v4, -inf  ;;  %v6211_v8 = vpop.eup %6210  ;;  %v4103_v14 = vmul.f32 %v6209_v25, %v8394_v17 }
 0x889   : > { %4588 = vmax.xlane.f32.xlu1 %v4587_v44  ;;  %v5709_v54 = vpop.f32.mrb[46].mxu0  ;;  %5657 = vmatmul.mubr.msk.f32.vlgmr.msra.gmra.mrb[32].mxu1 %vm2938_vm5, %v4098_v0  ;;  %v4584_v2 = vsel %vm2938_vm5, %v8444_v3, -inf  ;;  %v4104_v58 = vmul.f32 %v6211_v8, %v8390_v34 }
 0x88a   : > { %v4571_v59 = vmul.f32 0.35355338, %v5709_v54  ;;  %4582 = vmax.xlane.f32.xlu0 %v4581_v49  ;;  %v4555_v32 = vpop.f32.mrb[47].mxu0  ;;  %5659 = vmatprep.mubr.msk.f32.mxu1 %vm2938_vm5, %v4099_v62 }
 0x88b   : > { %v4570_v15 = vmul.f32 0.35355338, %v4555_v32  ;;  %5669 = vmatpush3.msra.mxu1 %v2774_v13 }
 0x88c   : > { %v4593_v63 = vsel %vm2938_vm5, %v4571_v59, -inf }
 0x88d   : > { %4594 = vmax.xlane.f32.xlu1 %v4593_v63  ;;  %5660 = vmatmul.mubr.msk.f32.gmra.mrb[34].mxu1 %vm2938_vm5, %v4100_v47  ;;  %v4590_v11 = vsel %vm2938_vm5, %v4570_v15, -inf }
 0x88e   : > { %4585 = vmax.xlane.f32.xlu0 %v4584_v2  ;;  %5662 = vmatprep.mubr.msk.f32.mxu1 %vm2938_vm5, %v4101_v56 }
 0x891   : > { %5663 = vmatmul.mubr.msk.f32.gmra.mrb[36].mxu1 %vm2938_vm5, %v4102_v5 }
 0x892   : > { %4591 = vmax.xlane.f32.xlu0 %v4590_v11  ;;  %5665 = vmatprep.mubr.msk.f32.mxu1 %vm2938_vm5, %v4103_v14 }
 0x895   : > { %5666 = vmatmul.mubr.msk.f32.gmra.mrb[38].mxu1 %vm2938_vm5, %v4104_v58 }
 0x89e   : > { %6086 = vrot.lane.b32.xlu1 %v7994_v9, %s6288_s18 }
 0x8a8   : > { %6081 = vrot.lane.b32.xlu0 %v7992_v10, %s6288_s18 }
 0x90e   : > { %v4577_v17 = vpop.xlane.xlu1 %4576 }
 0x90f   : > { %v4597_v33 = vsub.f32 %v8424_v16, %v4577_v17  ;;  %v4574_v42 = vpop.xlane.xlu0 %4573 }
 0x910   : > { %v4596_v34 = vsub.f32 %v8426_v12, %v4574_v42 }
 0x911   : > { %v4606_v60 = vmul.f32 1.442695, %v4597_v33 }
 0x912   : > { %v4604_v41 = vmul.f32 1.442695, %v4596_v34 }
 0x913   : > { %6212 = vpow2.f32 %v4606_v60  ;;  %v4580_v35 = vpop.xlane.xlu0 %4579 }
 0x914   : > { %6214 = vpow2.f32 %v4604_v41  ;;  %v4598_v9 = vsub.f32 %v8436_v43, %v4580_v35 }
 0x916   : > { %v4608_v30 = vmul.f32 1.442695, %v4598_v9  ;;  %v4589_v27 = vpop.xlane.xlu1 %4588 }
 0x917   : > { %v4601_v51 = vsub.f32 %v4569_v4, %v4589_v27  ;;  %v4583_v37 = vpop.xlane.xlu0 %4582 }
 0x918   : > { %6216 = vpow2.f32 %v4608_v30  ;;  %v4599_v10 = vsub.f32 %v8438_v1, %v4583_v37 }
 0x919   : > { %v4614_v19 = vmul.f32 1.442695, %v4601_v51 }
 0x91a   : > { %v4610_v40 = vmul.f32 1.442695, %v4599_v10  ;;  %v4595_v22 = vpop.xlane.xlu1 %4594 }
 0x91b   : > { %v4603_v21 = vsub.f32 %v4571_v59, %v4595_v22  ;;  %v4586_v7 = vpop.xlane.xlu0 %4585 }
 0x91c   : > { %6218 = vpow2.f32 %v4610_v40  ;;  %v4600_v46 = vsub.f32 %v8444_v3, %v4586_v7  ;;  %v2775_v40 = vld [vmem:[%s8592_s7 + $0x18] sm:$0xff] }
 0x91d   : > { %v8477_v16 = vpop.eup %6212  ;;  %6220 = vpow2.f32 %v4614_v19  ;;  %v4618_v12 = vmul.f32 1.442695, %v4603_v21 }
 0x91e   : > { %v8479_v45 = vpop.eup %6214  ;;  %v4612_v18 = vmul.f32 1.442695, %v4600_v46  ;;  %v4623_v26 = vsel %vm2938_vm5, %v8477_v16, 0.0  ;;  %v6087_v55 = vpop.permute.xlu1 %6086 }
 0x91f   : > { %4624 = vadd.xlane.f32.xlu1 %v4623_v26  ;;  %v4592_v52 = vpop.xlane.xlu0 %4591  ;;  %v4620_v50 = vsel %vm2938_vm5, %v8479_v45, 0.0  ;;  %v6089_v20 = vunpack.i.h.bf16 %v6087_v55  ;;  %v6088_v1 = vunpack.i.l.bf16 %v6087_v55 }
 0x920   : > { %6222 = vpow2.f32 %v4612_v18  ;;  %v4602_v23 = vsub.f32 %v4570_v15, %v4592_v52  ;;  %4621 = vadd.xlane.f32.xlu0 %v4620_v50 }
 0x921   : > { %6224 = vpow2.f32 %v4618_v12  ;;  %v5924_v44 = vpack.c.bf16 %v6089_v20, %v6088_v1  ;;  %v5207_v1 = vld [vmem:[%s8593_s8] ss:$0 sm:$0xff] }
 0x922   : > { %v8485_v29 = vpop.eup %6216  ;;  %v4616_v31 = vmul.f32 1.442695, %v4602_v23 }
 0x923   : > { %v6082_v43 = vpop.permute.xlu0 %6081  ;;  %v4626_v36 = vsel %vm2938_vm5, %v8485_v29, 0.0 }
 0x924   : > { %v6084_v39 = vunpack.i.h.bf16 %v6082_v43  ;;  %v6083_v24 = vunpack.i.l.bf16 %v6082_v43  ;;  %4627 = vadd.xlane.f32.xlu0 %v4626_v36  ;;  %6226 = vpow2.f32 %v4616_v31 }
 0x926   : > { %v8489_v53 = vpop.eup %6218  ;;  %v5920_v4 = vpack.c.bf16 %v6084_v39, %v6083_v24 }
 0x927   : > { %v4629_v6 = vsel %vm2938_vm5, %v8489_v53, 0.0  ;;  %v8493_v0 = vpop.eup %6220 }
 0x928   : > { %4630 = vadd.xlane.f32.xlu1 %v4629_v6  ;;  %5921 = vmatprep.subr.bf16.mxu0 %v5920_v4  ;;  %v4635_v3 = vsel %vm2938_vm5, %v8493_v0, 0.0  ;;  %v6269_v6 = vld [vmem:[%s6355_s14 + $0x8] sm:$0xff] }
 0x929   : > { %5936 = vmatprep.subr.bf16.mxu1 %v5920_v4  ;;  %5923 = vmatpush3.bf16.msra.mxu0 %v5920_v4 }
 0x92a   : > { %v8495_v57 = vpop.eup %6222  ;;  %5925 = vmatprep.subr.bf16.mxu0 %v5924_v44 }
 0x92b   : > { %v4632_v54 = vsel %vm2938_vm5, %v8495_v57, 0.0  ;;  %v8501_v49 = vpop.eup %6224 }
 0x92c   : > { %4636 = vadd.xlane.f32.xlu1 %v4635_v3  ;;  %4633 = vadd.xlane.f32.xlu0 %v4632_v54  ;;  %v4641_v62 = vsel %vm2938_vm5, %v8501_v49, 0.0 }
 0x92d   : > { %5927 = vmatpush3.bf16.msra.mxu0 %v5924_v44 }
 0x92e   : > { %v8505_v28 = vpop.eup %6226 }
 0x92f   : > { %v4638_v59 = vsel %vm2938_vm5, %v8505_v28, 0.0 }
 0x930   : > { %4642 = vadd.xlane.f32.xlu1 %v4641_v62 }
 0x934   : > { %4639 = vadd.xlane.f32.xlu1 %v4638_v59 }
 0x942   : > { %6091 = vrot.lane.b32.xlu0 %v7996_v38, %s6288_s18 }
 0x945   : > { %6096 = vrot.lane.b32.xlu1 %v7998_v48, %s6288_s18 }
 0x95c   : > { %v5658_v32 = vpop.f32.mrb[32].mxu1 }
 0x95d   : > { %v4219_v63 = vpop.f32.mrb[33].mxu1 }
 0x95e   : > { %5670 = vmatprep.mubr.msk.f32.mxu1 %vm2776_vm3, %v4219_v63 }
 0x95f   : > { %5671 = vmatmul.mubr.msk.f32.vlgmr.msra.gmra.mrb[24].mxu1 %vm2776_vm3, %v5658_v32  ;;  %v6272_v32 = vld [vmem:[%s6355_s14 + $0x10] sm:$0xff] }
 0x960   : > { %5940 = vmatpush3.bf16.msra.mxu1 %v5920_v4  ;;  %v5661_v47 = vpop.f32.mrb[34].mxu1 }
 0x961   : > { %5937 = vmatprep.subr.bf16.mxu1 %v5924_v44  ;;  %v4229_v61 = vpop.f32.mrb[35].mxu1 }
 0x962   : > { %5673 = vmatprep.mubr.msk.f32.mxu1 %vm2776_vm3, %v4229_v61 }
 0x963   : > { %5674 = vmatmul.mubr.msk.f32.gmra.mrb[26].mxu1 %vm2776_vm3, %v5661_v47 }
 0x964   : > { %5941 = vmatpush3.bf16.msra.mxu1 %v5924_v44  ;;  %v5664_v15 = vpop.f32.mrb[36].mxu1  ;;  %v6270_v44 = vld [vmem:[%s6355_s14] sm:$0xff] }
 0x965   : > { %v4239_v38 = vpop.f32.mrb[37].mxu1 }
 0x966   : > { %5676 = vmatprep.mubr.msk.f32.mxu1 %vm2776_vm3, %v4239_v38 }
 0x967   : > { %5677 = vmatmul.mubr.msk.f32.gmra.mrb[28].mxu1 %vm2776_vm3, %v5664_v15 }
 0x968   : > { %v5667_v48 = vpop.f32.mrb[38].mxu1 }
 0x969   : > { %v4249_v2 = vpop.f32.mrb[39].mxu1 }
 0x96a   : > { %5679 = vmatprep.mubr.msk.f32.mxu1 %vm2776_vm3, %v4249_v2 }
 0x96b   : > { %5680 = vmatmul.mubr.msk.f32.gmra.mrb[30].mxu1 %vm2776_vm3, %v5667_v48  ;;  %v6273_v48 = vld [vmem:[%s6355_s14 + $0x28] sm:$0xff] }
 0x9ac   : > { %v4625_v25 = vpop.xlane.xlu1 %4624 }
 0x9ad   : > { %v4622_v56 = vpop.xlane.xlu0 %4621 }
 0x9ae   : > { %6228 = vrcp.f32 %v4622_v56  ;;  %v6274_v56 = vld [vmem:[%s6355_s14 + $0x20] sm:$0xff] }
 0x9b1   : > { %v4628_v5 = vpop.xlane.xlu0 %4627 }
 0x9b5   : > { %v4631_v8 = vpop.xlane.xlu1 %4630 }
 0x9b8   : > { %v6229_v11 = vpop.eup %6228 }
 0x9b9   : > { %v4637_v14 = vpop.xlane.xlu1 %4636  ;;  %v4634_v58 = vpop.xlane.xlu0 %4633  ;;  %v4652_v13 = vmul.f32 %v6229_v11, %v8479_v45 }
 0x9ba   : > { %6230 = vrcp.f32 %v4634_v58  ;;  %v6275_v58 = vld [vmem:[%s6355_s14 + $0x38] sm:$0xff] }
 0x9bb   : > { %5726 = vmatprep.mubr.msk.f32.mxu0 %vm2938_vm5, %v4652_v13  ;;  %6232 = vrcp.f32 %v4625_v25 }
 0x9bc   : > { %6234 = vrcp.f32 %v4637_v14 }
 0x9bd   : > { %v4643_v17 = vpop.xlane.xlu1 %4642  ;;  %v6092_v33 = vpop.permute.xlu0 %6091  ;;  %6236 = vrcp.f32 %v4628_v5 }
 0x9be   : > { %v6094_v42 = vunpack.i.h.bf16 %v6092_v33  ;;  %v6093_v34 = vunpack.i.l.bf16 %v6092_v33  ;;  %6238 = vrcp.f32 %v4631_v8 }
 0x9c0   : > { %v5928_v60 = vpack.c.bf16 %v6094_v42, %v6093_v34 }
 0x9c1   : > { %v4640_v41 = vpop.xlane.xlu1 %4639 }
 0x9c2   : > { %6240 = vrcp.f32 %v4640_v41  ;;  %5929 = vmatprep.subr.bf16.mxu0 %v5928_v60  ;;  %5938 = vmatprep.subr.bf16.mxu1 %v5928_v60 }
 0x9c3   : > { %6242 = vrcp.f32 %v4643_v17  ;;  %5931 = vmatpush3.bf16.msra.mxu0 %v5928_v60  ;;  %5942 = vmatpush3.bf16.msra.mxu1 %v5928_v60  ;;  %v6276_v17 = vld [vmem:[%s6355_s14 + $0x30] sm:$0xff] }
 0x9c4   : > { %v6231_v35 = vpop.eup %6230 }
 0x9c5   : > { %v6097_v9 = vpop.permute.xlu1 %6096  ;;  %v4656_v51 = vmul.f32 %v6231_v35, %v8495_v57  ;;  %v6233_v37 = vpop.eup %6232 }
 0x9c6   : > { %v6099_v30 = vunpack.i.h.bf16 %v6097_v9  ;;  %v6098_v27 = vunpack.i.l.bf16 %v6097_v9  ;;  %v6235_v19 = vpop.eup %6234  ;;  %v4653_v46 = vmul.f32 %v6233_v37, %v8477_v16 }
 0x9c7   : > { %5732 = vmatprep.mubr.msk.f32.mxu1 %vm2938_vm5, %v4656_v51  ;;  %v6237_v22 = vpop.eup %6236  ;;  %v4657_v45 = vmul.f32 %v6235_v19, %v8493_v0 }
 0x9c8   : > { %v5932_v10 = vpack.c.bf16 %v6099_v30, %v6098_v27  ;;  %v6239_v21 = vpop.eup %6238  ;;  %v4654_v18 = vmul.f32 %v6237_v22, %v8485_v29 }
 0x9c9   : > { %v4655_v52 = vmul.f32 %v6239_v21, %v8489_v53 }
 0x9ca   : > { %5933 = vmatprep.subr.bf16.mxu0 %v5932_v10  ;;  %5939 = vmatprep.subr.bf16.mxu1 %v5932_v10 }
 0x9cb   : > { %5935 = vmatpush3.bf16.msra.mxu0 %v5932_v10  ;;  %5943 = vmatpush3.bf16.msra.mxu1 %v5932_v10 }
 0x9cc   : > { %v6241_v7 = vpop.eup %6240  ;;  %5738 = vmatprep.subr.mxu1 %v2775_v40 }
 0x9cd   : > { %v6243_v12 = vpop.eup %6242  ;;  %v4658_v26 = vmul.f32 %v6241_v7, %v8505_v28  ;;  %v6271_v28 = vld [vmem:[%s6355_s14 + $0x18] sm:$0xff] }
 0x9ce   : > { %5727 = vmatmul.mubr.msk.f32.vlgmr.msra.gmra.mrb[48].mxu0 %vm2938_vm5, %v4653_v46  ;;  %5733 = vmatmul.mubr.msk.f32.vlgmr.msra.gmra.mrb[40].mxu1 %vm2938_vm5, %v4657_v45  ;;  %v4659_v16 = vmul.f32 %v6243_v12, %v8501_v49 }
 0x9cf   : > { %5729 = vmatprep.mubr.msk.f32.mxu0 %vm2938_vm5, %v4654_v18  ;;  %5735 = vmatprep.mubr.msk.f32.mxu1 %vm2938_vm5, %v4658_v26 }
 0x9d0   : > { %5739 = vmatpush3.msra.mxu1 %v2775_v40 }
 0x9d2   : > { %5730 = vmatmul.mubr.msk.f32.gmra.mrb[50].mxu0 %vm2938_vm5, %v4655_v52  ;;  %5736 = vmatmul.mubr.msk.f32.gmra.mrb[42].mxu1 %vm2938_vm5, %v4659_v16 }
 0xaa1   : > { %v5728_v50 = vpop.f32.mrb[48].mxu0  ;;  %v5734_v23 = vpop.f32.mrb[40].mxu1 }
 0xaa2   : > { %v4774_v55 = vpop.f32.mrb[49].mxu0  ;;  %v4794_v29 = vpop.f32.mrb[41].mxu1 }
 0xaa3   : > { %5740 = vmatprep.mubr.msk.f32.mxu1 %vm2776_vm3, %v4774_v55 }
 0xaa4   : > { %5741 = vmatmul.mubr.msk.f32.vlgmr.msra.gmra.mrb[24].mxu1 %vm2776_vm3, %v5728_v50 }
 0xaa5   : > { %v5731_v31 = vpop.f32.mrb[50].mxu0  ;;  %v5737_v43 = vpop.f32.mrb[42].mxu1 }
 0xaa6   : > { %v4784_v36 = vpop.f32.mrb[51].mxu0  ;;  %v4804_v20 = vpop.f32.mrb[43].mxu1 }
 0xaa7   : > { %5743 = vmatprep.mubr.msk.f32.mxu1 %vm2776_vm3, %v4784_v36 }
 0xaa8   : > { %5744 = vmatmul.mubr.msk.f32.gmra.mrb[26].mxu1 %vm2776_vm3, %v5731_v31 }
 0xaa9   : > { %5746 = vmatprep.mubr.msk.f32.mxu1 %vm2776_vm3, %v4794_v29 }
 0xaac   : > { %5747 = vmatmul.mubr.msk.f32.gmra.mrb[28].mxu1 %vm2776_vm3, %v5734_v23 }
 0xaad   : > { %5749 = vmatprep.mubr.msk.f32.mxu1 %vm2776_vm3, %v4804_v20 }
 0xab0   : > { %5750 = vmatmul.mubr.msk.f32.gmra.mrb[30].mxu1 %vm2776_vm3, %v5737_v43 }
 0xb77   : > { %v5742_v39 = vpop.f32.mrb[24].mxu1 }
 0xb78   : > { %v4958_v24 = vadd.f32 %v5742_v39, %v5207_v1  ;;  %v4903_v53 = vpop.f32.mrb[25].mxu1 }
 0xb79   : > { %v4957_v4 = vadd.f32 %v5207_v1, %v4903_v53 }
 0xb7a   : > { %v4966_v0 = vadd.f32 %v6269_v6, %v4958_v24 }
 0xb7b   : > { %v4965_v57 = vadd.f32 %v6270_v44, %v4957_v4  ;;  %v5745_v3 = vpop.f32.mrb[26].mxu1 }
 0xb7c   : > { %4974 = vst.msk [vmem:[%s8556_s13 + $0x8] sm:$0xff] %vm343_vm0, %v4966_v0  ;;  %v4960_v54 = vadd.f32 %v5745_v3, %v5207_v1  ;;  %v4913_v49 = vpop.f32.mrb[27].mxu1 }
 0xb7d   : > { %4973 = vst.msk [vmem:[%s8556_s13] sm:$0xff] %vm343_vm0, %v4965_v57  ;;  %v4959_v62 = vadd.f32 %v5207_v1, %v4913_v49 }
 0xb7e   : > { %v4968_v59 = vadd.f32 %v6271_v28, %v4960_v54 }
 0xb7f   : > { %v4967_v63 = vadd.f32 %v6272_v32, %v4959_v62  ;;  %v5748_v47 = vpop.f32.mrb[28].mxu1 }
 0xb80   : > { %4976 = vst.msk [vmem:[%s8556_s13 + $0x18] sm:$0xff] %vm343_vm0, %v4968_v59  ;;  %v4962_v61 = vadd.f32 %v5748_v47, %v5207_v1  ;;  %v4923_v15 = vpop.f32.mrb[29].mxu1 }
 0xb81   : > { %4975 = vst.msk [vmem:[%s8556_s13 + $0x10] sm:$0xff] %vm343_vm0, %v4967_v63  ;;  %v4961_v38 = vadd.f32 %v5207_v1, %v4923_v15 }
 0xb82   : > { %v4970_v2 = vadd.f32 %v6273_v48, %v4962_v61 }
 0xb83   : > { %v4969_v25 = vadd.f32 %v6274_v56, %v4961_v38  ;;  %v5751_v5 = vpop.f32.mrb[30].mxu1 }
 0xb84   : > { %4978 = vst.msk [vmem:[%s8556_s13 + $0x28] sm:$0xff] %vm343_vm0, %v4970_v2  ;;  %v4964_v8 = vadd.f32 %v5751_v5, %v5207_v1  ;;  %v4933_v11 = vpop.f32.mrb[31].mxu1 }
 0xb85   : > { %4977 = vst.msk [vmem:[%s8556_s13 + $0x20] sm:$0xff] %vm343_vm0, %v4969_v25  ;;  %v4963_v14 = vadd.f32 %v5207_v1, %v4933_v11 }
 0xb86   : > { %v4972_v13 = vadd.f32 %v6275_v58, %v4964_v8 }
 0xb87   : > { %v4971_v33 = vadd.f32 %v6276_v17, %v4963_v14 }
 0xb88   : > { %4980 = vst.msk [vmem:[%s8556_s13 + $0x38] sm:$0xff] %vm343_vm0, %v4972_v13 }
 0xb89   : > { %4979 = vst.msk [vmem:[%s8556_s13 + $0x30] sm:$0xff] %vm343_vm0, %v4971_v33 }
 0xb8a PF: > { %s19_s30 = sadd.s32 1, %s6283_s30  }
 0xb8b   : > { %p16_p4 = scmp.ge.s32.totalorder %s19_s30, 4  }
 0xb8d   :  { %18 = sbr.rel (!%p16_p4) target bundleno = 1 (0x1), region = 89 }

</bundles_post_ra>
